<compile_context>
chip_gen: v7x
topology: tpu7x:2x2x1
jax: 0.10.0
libtpu: 0.0.40
codegen_flags: <defaults>
</compile_context>

<pallas_src>
import functools
import math

import jax
import jax.numpy as jnp
from jax.experimental import pallas as pl
from jax.experimental.pallas import tpu as pltpu


# ----------------------------------------------------------------------------
# In-kernel math helpers
# ----------------------------------------------------------------------------
_GELU_C = math.sqrt(2.0 / math.pi)


def _gelu(x):
    # tanh-form GELU (perf feedback): pushes the transcendental onto the EUP slot
    # instead of a ~10-op VALU erf polynomial.  Max abs deviation from PyTorch's
    # exact-erf GELU is ~1e-3 and washes out through the following LayerNorms.
    return 0.5 * x * (1.0 + jnp.tanh(_GELU_C * (x + 0.044715 * x * x * x)))


def _layernorm(x, g, b, eps=1e-5):
    mu = jnp.mean(x, axis=-1, keepdims=True)
    xc = x - mu
    var = jnp.mean(xc * xc, axis=-1, keepdims=True)
    return xc * jax.lax.rsqrt(var + eps) * g + b


def _conv1d_k3(x, w_cat, b):
    # Conv1d(kernel_size=3, padding=1) as ONE MXU matmul: the three taps are stacked
    # along the contraction axis (x_cat (L,3D) @ w_cat (3D,D)).  The zero halo is
    # built in-register, so there is no host-side pad and no extra HBM round trip.
    L, D = x.shape
    zero = jnp.zeros((1, D), jnp.float32)
    x_prev = jnp.concatenate([zero, x[:L - 1, :]], axis=0)   # x[l-1]
    x_next = jnp.concatenate([x[1:, :], zero], axis=0)       # x[l+1]
    x_cat = jnp.concatenate([x_prev, x, x_next], axis=-1)    # (L, 3D)
    return jnp.dot(x_cat, w_cat, preferred_element_type=jnp.float32) + b


# ----------------------------------------------------------------------------
# Fused Pallas kernels (one grid step == one batch element)
# ----------------------------------------------------------------------------
def _embedding_kernel(tok_ref, par_ref, pw_ref, pb_ref, pos_ref, o_ref):
    L, P = par_ref.shape[1], par_ref.shape[2]
    D = pw_ref.shape[1]
    par = par_ref[...].reshape(L, P).astype(jnp.float32)
    proj = jnp.dot(par, pw_ref[...], preferred_element_type=jnp.float32) + pb_ref[...]
    y = tok_ref[...].reshape(L, D) + proj + pos_ref[...]
    o_ref[...] = y[None].astype(o_ref.dtype)


def _pool_stage_kernel(x_ref, w1_ref, b1_ref, w2_ref, b2_ref, lng_ref, lnb_ref,
                       o_ref, *, pool):
    # Fused ProgressivePooling stage: Conv1d -> GELU -> MaxPool1d -> Conv1d
    # -> LayerNorm -> + identity.
    L, D = x_ref.shape[1], x_ref.shape[2]
    Lp = L // pool
    x = x_ref[...].reshape(L, D).astype(jnp.float32)

    y = _gelu(_conv1d_k3(x, w1_ref[...], b1_ref[...]))               # Conv1d + GELU

    # MaxPool1d(kernel=stride=pool): gather window member k via a one-hot selection
    # matmul (robust on both Mosaic and interpret — avoids strided ref reads and
    # sublane-splitting reshapes), then reduce with jnp.maximum.
    row = jax.lax.broadcasted_iota(jnp.int32, (Lp, L), 0)
    col = jax.lax.broadcasted_iota(jnp.int32, (Lp, L), 1)
    pooled = None
    for kk in range(pool):
        sel = (col == row * pool + kk).astype(jnp.float32)           # (Lp, L)
        g = jnp.dot(sel, y, preferred_element_type=jnp.float32)      # rows kk::pool
        pooled = g if pooled is None else jnp.maximum(pooled, g)

    y2 = _conv1d_k3(pooled, w2_ref[...], b2_ref[...])                # Conv1d
    out = _layernorm(y2, lng_ref[...], lnb_ref[...]) + pooled        # LN + identity
    o_ref[...] = out[None].astype(o_ref.dtype)


def _encoder_layer_kernel(x_ref, inw_ref, inb_ref, outw_ref, outb_ref,
                          n1g_ref, n1b_ref, w1_ref, b1_ref, w2_ref, b2_ref,
                          n2g_ref, n2b_ref, *rest, nhead, apply_final_ln):
    # Fused nn.TransformerEncoderLayer (post-norm, ReLU FFN, eval mode).  When
    # apply_final_ln the encoder's trailing nn.LayerNorm is folded in as well.
    if apply_final_ln:
        fg_ref, fb_ref, o_ref = rest
    else:
        (o_ref,) = rest

    S, D = x_ref.shape[1], x_ref.shape[2]
    hd = D // nhead
    scale = 1.0 / math.sqrt(hd)

    x = x_ref[...].reshape(S, D).astype(jnp.float32)

    # ---- self-attention: all heads batched in VMEM, no HBM transposes ----
    qkv = jnp.dot(x, inw_ref[...], preferred_element_type=jnp.float32) + inb_ref[...]
    q, k, v = qkv[:, :D], qkv[:, D:2 * D], qkv[:, 2 * D:]

    def to_heads(t):   # (S, D) -> (H, S, hd) via static lane slices, in-register
        return jnp.concatenate(
            [t[None, :, h * hd:(h + 1) * hd] for h in range(nhead)], axis=0)

    q3, k3, v3 = to_heads(q), to_heads(k), to_heads(v)
    s = jnp.einsum("hqd,hkd->hqk", q3, k3,
                   preferred_element_type=jnp.float32) * scale       # (H, S, S)
    s = s - jnp.max(s, axis=-1, keepdims=True)
    p = jnp.exp(s)
    p = p * (1.0 / jnp.sum(p, axis=-1, keepdims=True))               # softmax
    o3 = jnp.einsum("hqk,hkd->hqd", p, v3,
                    preferred_element_type=jnp.float32)              # (H, S, hd)
    attn = jnp.concatenate([o3[h] for h in range(nhead)], axis=-1)   # (S, D)
    attn = jnp.dot(attn, outw_ref[...],
                   preferred_element_type=jnp.float32) + outb_ref[...]

    # ---- post-norm residual blocks ----
    x = _layernorm(x + attn, n1g_ref[...], n1b_ref[...])
    ff = jnp.maximum(
        jnp.dot(x, w1_ref[...], preferred_element_type=jnp.float32) + b1_ref[...],
        0.0)
    ff = jnp.dot(ff, w2_ref[...], preferred_element_type=jnp.float32) + b2_ref[...]
    x = _layernorm(x + ff, n2g_ref[...], n2b_ref[...])

    if apply_final_ln:
        x = _layernorm(x, fg_ref[...], fb_ref[...])

    o_ref[...] = x[None].astype(o_ref.dtype)


# ----------------------------------------------------------------------------
# pallas_call wrappers
# ----------------------------------------------------------------------------
def _rep(shape):
    # replicated (whole-array) operand: same block for every grid step
    return pl.BlockSpec(shape, lambda i: (0,) * len(shape))


def _par_params():
    return pltpu.CompilerParams(dimension_semantics=("parallel",))


def embedding_call(tok, entity_params, pw, pb, pos):
    B, L, D = tok.shape
    P = entity_params.shape[-1]
    return pl.pallas_call(
        _embedding_kernel,
        out_shape=jax.ShapeDtypeStruct((B, L, D), jnp.float32),
        grid=(B,),
        in_specs=[
            pl.BlockSpec((1, L, D), lambda i: (i, 0, 0)),
            pl.BlockSpec((1, L, P), lambda i: (i, 0, 0)),
            _rep((P, D)), _rep((1, D)), _rep((L, D)),
        ],
        out_specs=pl.BlockSpec((1, L, D), lambda i: (i, 0, 0)),
        compiler_params=_par_params(),
    )(tok, entity_params, pw, pb, pos)


def pool_stage_call(x, stage):
    B, L, D = x.shape
    pool = stage["pool"]
    Lp = L // pool
    return pl.pallas_call(
        functools.partial(_pool_stage_kernel, pool=pool),
        out_shape=jax.ShapeDtypeStruct((B, Lp, D), x.dtype),
        grid=(B,),
        in_specs=[
            pl.BlockSpec((1, L, D), lambda i: (i, 0, 0)),
            _rep((3 * D, D)), _rep((1, D)),
            _rep((3 * D, D)), _rep((1, D)),
            _rep((1, D)), _rep((1, D)),
        ],
        out_specs=pl.BlockSpec((1, Lp, D), lambda i: (i, 0, 0)),
        compiler_params=_par_params(),
    )(x, stage["conv1_w"], stage["conv1_b"], stage["conv2_w"], stage["conv2_b"],
      stage["ln_g"], stage["ln_b"])


def encoder_layer_call(x, p, nhead, final_ln=None):
    B, S, D = x.shape
    F = p["w1"].shape[1]
    args = [x, p["in_w"], p["in_b"], p["out_w"], p["out_b"], p["n1_g"], p["n1_b"],
            p["w1"], p["b1"], p["w2"], p["b2"], p["n2_g"], p["n2_b"]]
    in_specs = [
        pl.BlockSpec((1, S, D), lambda i: (i, 0, 0)),
        _rep((D, 3 * D)), _rep((1, 3 * D)),
        _rep((D, D)), _rep((1, D)),
        _rep((1, D)), _rep((1, D)),
        _rep((D, F)), _rep((1, F)),
        _rep((F, D)), _rep((1, D)),
        _rep((1, D)), _rep((1, D)),
    ]
    if final_ln is not None:
        args += [final_ln[0], final_ln[1]]
        in_specs += [_rep((1, D)), _rep((1, D))]
    return pl.pallas_call(
        functools.partial(_encoder_layer_kernel, nhead=nhead,
                          apply_final_ln=final_ln is not None),
        out_shape=jax.ShapeDtypeStruct((B, S, D), x.dtype),
        grid=(B,),
        in_specs=in_specs,
        out_specs=pl.BlockSpec((1, S, D), lambda i: (i, 0, 0)),
        compiler_params=_par_params(),
    )(*args)


# ----------------------------------------------------------------------------
# Model (parameter init + forward glue)
# ----------------------------------------------------------------------------
def _calculate_stages(input_length, output_length):
    stages = []
    current = input_length
    while current > output_length:
        current = current // 2
        if current <= output_length:
            stages.append(output_length)
            break
        stages.append(current)
    return stages


def init_params(key, *, d_model, num_layers, nhead, dim_feedforward,
                input_length, output_length, num_entity_types, param_dim, max_len):
    def nrm(k, shape, scale=0.02):
        return scale * jax.random.normal(k, shape, dtype=jnp.float32)

    keys = iter(jax.random.split(key, 256))
    params = {}

    # --- SeqEmbedding (synthetic parameters; see TODO in seq_embedding) ---
    params["tok_emb"] = nrm(next(keys), (num_entity_types, d_model))
    params["param_w"] = nrm(next(keys), (param_dim, d_model))
    params["param_b"] = jnp.zeros((1, d_model), jnp.float32)
    pos = jnp.arange(max_len, dtype=jnp.float32)[:, None]
    div = jnp.exp(jnp.arange(0, d_model, 2, dtype=jnp.float32)
                  * (-math.log(10000.0) / d_model))
    pe = jnp.zeros((max_len, d_model), jnp.float32)
    pe = pe.at[:, 0::2].set(jnp.sin(pos * div))
    pe = pe.at[:, 1::2].set(jnp.cos(pos * div))
    params["pos_enc"] = pe

    # --- ProgressivePooling: conv weights stored tap-stacked as (3D, D), i.e.
    #     rows [k*D:(k+1)*D] == W_pt[:, :, k].T, so each conv is one matmul. ---
    pool_stages = []
    current = input_length
    for tgt in _calculate_stages(input_length, output_length):
        pool_stages.append({
            "pool": current // tgt,
            "conv1_w": nrm(next(keys), (3 * d_model, d_model)),
            "conv1_b": nrm(next(keys), (1, d_model)),
            "conv2_w": nrm(next(keys), (3 * d_model, d_model)),
            "conv2_b": nrm(next(keys), (1, d_model)),
            "ln_g": jnp.ones((1, d_model), jnp.float32),
            "ln_b": jnp.zeros((1, d_model), jnp.float32),
        })
        current = tgt
    params["pool_stages"] = pool_stages

    # --- TransformerEncoder ---
    layers = []
    for _ in range(num_layers):
        layers.append({
            "in_w": nrm(next(keys), (d_model, 3 * d_model)),   # [Wq|Wk|Wv]^T
            "in_b": jnp.zeros((1, 3 * d_model), jnp.float32),
            "out_w": nrm(next(keys), (d_model, d_model)),
            "out_b": jnp.zeros((1, d_model), jnp.float32),
            "n1_g": jnp.ones((1, d_model), jnp.float32),
            "n1_b": jnp.zeros((1, d_model), jnp.float32),
            "w1": nrm(next(keys), (d_model, dim_feedforward)),
            "b1": jnp.zeros((1, dim_feedforward), jnp.float32),
            "w2": nrm(next(keys), (dim_feedforward, d_model)),
            "b2": jnp.zeros((1, d_model), jnp.float32),
            "n2_g": jnp.ones((1, d_model), jnp.float32),
            "n2_b": jnp.zeros((1, d_model), jnp.float32),
        })
    params["enc_layers"] = layers
    params["final_g"] = jnp.ones((1, d_model), jnp.float32)
    params["final_b"] = jnp.zeros((1, d_model), jnp.float32)
    return params


def seq_transformer_forward(entity_type, entity_params, params, nhead):
    # TODO(synk): SeqEmbedding source was not provided; implemented as
    # token-embedding + linear projection of entity_params + sinusoidal pos-enc.
    L = entity_type.shape[1]
    tok = jnp.take(params["tok_emb"], entity_type, axis=0)            # XLA gather
    src = embedding_call(tok, entity_params, params["param_w"],
                         params["param_b"], params["pos_enc"][:L])    # (B, L, D)

    for stage in params["pool_stages"]:                               # ProgressivePooling
        src = pool_stage_call(src, stage)

    # Encoder kept batch-first: equivalent to PyTorch's permute(1,0,2) -> encoder
    # -> permute back, without the two HBM layout ops.
    n_layers = len(params["enc_layers"])
    for li, layer in enumerate(params["enc_layers"]):
        final_ln = ((params["final_g"], params["final_b"])
                    if li == n_layers - 1 else None)                  # fused final LN
        src = encoder_layer_call(src, layer, nhead, final_ln=final_ln)
    return src                                                        # (B, L_out, D)


# ----------------------------------------------------------------------------
if __name__ == "__main__":
    d_model, num_layers, nhead, dim_ff = 32, 2, 4, 64
    input_length, output_length, max_len = 16, 4, 16
    B, param_dim, num_types = 2, 6, 10

    key = jax.random.PRNGKey(0)
    kp, kt, ke = jax.random.split(key, 3)
    params = init_params(kp, d_model=d_model, num_layers=num_layers, nhead=nhead,
                         dim_feedforward=dim_ff, input_length=input_length,
                         output_length=output_length, num_entity_types=num_types,
                         param_dim=param_dim, max_len=max_len)

    entity_type = jax.random.randint(kt, (B, input_length), 0, num_types)
    entity_params = jax.random.normal(ke, (B, input_length, param_dim),
                                      dtype=jnp.float32)

    fwd = jax.jit(functools.partial(seq_transformer_forward, params=params,
                                    nhead=nhead))
    out = fwd(entity_type, entity_params)
    jax.block_until_ready(out)
    assert out.shape == (B, output_length, d_model), out.shape
    assert bool(jnp.all(jnp.isfinite(out)))
    print("KERNEL_OK")
</pallas_src>

<mosaic_0001>
module attributes {stable_mosaic.version = 11 : i64} {
  func.func @_pool_stage_kernel(%arg0: i32, %arg1: memref<1x8x32xf32, #tpu.memory_space<vmem>>, %arg2: memref<96x32xf32, #tpu.memory_space<vmem>>, %arg3: memref<1x32xf32, #tpu.memory_space<vmem>>, %arg4: memref<96x32xf32, #tpu.memory_space<vmem>>, %arg5: memref<1x32xf32, #tpu.memory_space<vmem>>, %arg6: memref<1x32xf32, #tpu.memory_space<vmem>>, %arg7: memref<1x32xf32, #tpu.memory_space<vmem>>, %arg8: memref<1x4x32xf32, #tpu.memory_space<vmem>>) attributes {dimension_semantics = [#tpu.dimension_semantics<parallel>], iteration_bounds = array<i64: 2>, scalar_prefetch = 0 : i64, scratch_operands = 0 : i64, tpu.core_type = #tpu.core_type<tc>, window_params = [{transform_indices = @transform_0, window_bounds = array<i64: 1, 8, 32>}, {pipeline_mode = #tpu.pipeline_mode<synchronous>, transform_indices = @transform_1, window_bounds = array<i64: 96, 32>}, {pipeline_mode = #tpu.pipeline_mode<synchronous>, transform_indices = @transform_2, window_bounds = array<i64: 1, 32>}, {pipeline_mode = #tpu.pipeline_mode<synchronous>, transform_indices = @transform_3, window_bounds = array<i64: 96, 32>}, {pipeline_mode = #tpu.pipeline_mode<synchronous>, transform_indices = @transform_4, window_bounds = array<i64: 1, 32>}, {pipeline_mode = #tpu.pipeline_mode<synchronous>, transform_indices = @transform_5, window_bounds = array<i64: 1, 32>}, {pipeline_mode = #tpu.pipeline_mode<synchronous>, transform_indices = @transform_6, window_bounds = array<i64: 1, 32>}, {transform_indices = @transform_7, window_bounds = array<i64: 1, 4, 32>}]} {
    %c0 = arith.constant 0 : index
    %c0_0 = arith.constant 0 : index
    %c0_1 = arith.constant 0 : index
    %0 = vector.load %arg1[%c0, %c0_0, %c0_1] : memref<1x8x32xf32, #tpu.memory_space<vmem>>, vector<1x8x32xf32>
    %1 = vector.shape_cast %0 : vector<1x8x32xf32> to vector<8x32xf32>
    %c0_2 = arith.constant 0 : index
    %c0_3 = arith.constant 0 : index
    %2 = vector.load %arg2[%c0_2, %c0_3] : memref<96x32xf32, #tpu.memory_space<vmem>>, vector<96x32xf32>
    %c0_4 = arith.constant 0 : index
    %c0_5 = arith.constant 0 : index
    %3 = vector.load %arg3[%c0_4, %c0_5] : memref<1x32xf32, #tpu.memory_space<vmem>>, vector<1x32xf32>
    %cst = arith.constant 0.000000e+00 : f32
    %4 = vector.broadcast %cst : f32 to vector<1x32xf32>
    %5 = vector.extract_strided_slice %1 {offsets = [0, 0], sizes = [7, 32], strides = [1, 1]} : vector<8x32xf32> to vector<7x32xf32>
    %6 = tpu.concatenate %4, %5 in 0 : vector<1x32xf32>, vector<7x32xf32> -> vector<8x32xf32>
    %7 = vector.extract_strided_slice %1 {offsets = [1, 0], sizes = [7, 32], strides = [1, 1]} : vector<8x32xf32> to vector<7x32xf32>
    %8 = tpu.concatenate %7, %4 in 0 : vector<7x32xf32>, vector<1x32xf32> -> vector<8x32xf32>
    %9 = tpu.concatenate %6, %1, %8 in 1 : vector<8x32xf32>, vector<8x32xf32>, vector<8x32xf32> -> vector<8x96xf32>
    %cst_6 = arith.constant dense<0.000000e+00> : vector<8x32xf32>
    %10 = tpu.matmul %9, %2, %cst_6 {dimension_numbers = #tpu.dot_dimension_numbers<[1], [0], [0], [1], [0, 0, 1, 1], [], []>} : vector<8x96xf32>, vector<96x32xf32>, vector<8x32xf32> -> vector<8x32xf32>
    %11 = vector.broadcast %3 : vector<1x32xf32> to vector<8x32xf32>
    %12 = arith.addf %10, %11 : vector<8x32xf32>
    %cst_7 = arith.constant 5.000000e-01 : f32
    %13 = vector.broadcast %cst_7 : f32 to vector<8x32xf32>
    %14 = arith.mulf %13, %12 : vector<8x32xf32>
    %cst_8 = arith.constant 4.471500e-02 : f32
    %15 = vector.broadcast %cst_8 : f32 to vector<8x32xf32>
    %16 = arith.mulf %15, %12 : vector<8x32xf32>
    %17 = arith.mulf %16, %12 : vector<8x32xf32>
    %18 = arith.mulf %17, %12 : vector<8x32xf32>
    %19 = arith.addf %12, %18 : vector<8x32xf32>
    %cst_9 = arith.constant 0.797884583 : f32
    %20 = vector.broadcast %cst_9 : f32 to vector<8x32xf32>
    %21 = arith.mulf %20, %19 : vector<8x32xf32>
    %22 = math.tanh %21 : vector<8x32xf32>
    %cst_10 = arith.constant 1.000000e+00 : f32
    %23 = vector.broadcast %cst_10 : f32 to vector<8x32xf32>
    %24 = arith.addf %23, %22 : vector<8x32xf32>
    %25 = arith.mulf %14, %24 : vector<8x32xf32>
    %26 = tpu.iota {dimensions = array<i32: 0>} : vector<4x8xi32>
    %27 = tpu.iota {dimensions = array<i32: 1>} : vector<4x8xi32>
    %c2_i32 = arith.constant 2 : i32
    %28 = vector.broadcast %c2_i32 : i32 to vector<4x8xi32>
    %29 = arith.muli %26, %28 : vector<4x8xi32>
    %c0_i32 = arith.constant 0 : i32
    %30 = vector.broadcast %c0_i32 : i32 to vector<4x8xi32>
    %31 = arith.addi %29, %30 : vector<4x8xi32>
    %32 = arith.cmpi eq, %27, %31 : vector<4x8xi32>
    %33 = arith.extui %32 : vector<4x8xi1> to vector<4x8xi32>
    %34 = arith.sitofp %33 : vector<4x8xi32> to vector<4x8xf32>
    %cst_11 = arith.constant dense<0.000000e+00> : vector<4x32xf32>
    %35 = tpu.matmul %34, %25, %cst_11 {dimension_numbers = #tpu.dot_dimension_numbers<[1], [0], [0], [1], [0, 0, 1, 1], [], []>} : vector<4x8xf32>, vector<8x32xf32>, vector<4x32xf32> -> vector<4x32xf32>
    %c2_i32_12 = arith.constant 2 : i32
    %36 = vector.broadcast %c2_i32_12 : i32 to vector<4x8xi32>
    %37 = arith.muli %26, %36 : vector<4x8xi32>
    %c1_i32 = arith.constant 1 : i32
    %38 = vector.broadcast %c1_i32 : i32 to vector<4x8xi32>
    %39 = arith.addi %37, %38 : vector<4x8xi32>
    %40 = arith.cmpi eq, %27, %39 : vector<4x8xi32>
    %41 = arith.extui %40 : vector<4x8xi1> to vector<4x8xi32>
    %42 = arith.sitofp %41 : vector<4x8xi32> to vector<4x8xf32>
    %cst_13 = arith.constant dense<0.000000e+00> : vector<4x32xf32>
    %43 = tpu.matmul %42, %25, %cst_13 {dimension_numbers = #tpu.dot_dimension_numbers<[1], [0], [0], [1], [0, 0, 1, 1], [], []>} : vector<4x8xf32>, vector<8x32xf32>, vector<4x32xf32> -> vector<4x32xf32>
    %44 = arith.maximumf %35, %43 : vector<4x32xf32>
    %c0_14 = arith.constant 0 : index
    %c0_15 = arith.constant 0 : index
    %45 = vector.load %arg4[%c0_14, %c0_15] : memref<96x32xf32, #tpu.memory_space<vmem>>, vector<96x32xf32>
    %c0_16 = arith.constant 0 : index
    %c0_17 = arith.constant 0 : index
    %46 = vector.load %arg5[%c0_16, %c0_17] : memref<1x32xf32, #tpu.memory_space<vmem>>, vector<1x32xf32>
    %cst_18 = arith.constant 0.000000e+00 : f32
    %47 = vector.broadcast %cst_18 : f32 to vector<1x32xf32>
    %48 = vector.extract_strided_slice %44 {offsets = [0, 0], sizes = [3, 32], strides = [1, 1]} : vector<4x32xf32> to vector<3x32xf32>
    %49 = tpu.concatenate %47, %48 in 0 : vector<1x32xf32>, vector<3x32xf32> -> vector<4x32xf32>
    %50 = vector.extract_strided_slice %44 {offsets = [1, 0], sizes = [3, 32], strides = [1, 1]} : vector<4x32xf32> to vector<3x32xf32>
    %51 = tpu.concatenate %50, %47 in 0 : vector<3x32xf32>, vector<1x32xf32> -> vector<4x32xf32>
    %52 = tpu.concatenate %49, %44, %51 in 1 : vector<4x32xf32>, vector<4x32xf32>, vector<4x32xf32> -> vector<4x96xf32>
    %cst_19 = arith.constant dense<0.000000e+00> : vector<4x32xf32>
    %53 = tpu.matmul %52, %45, %cst_19 {dimension_numbers = #tpu.dot_dimension_numbers<[1], [0], [0], [1], [0, 0, 1, 1], [], []>} : vector<4x96xf32>, vector<96x32xf32>, vector<4x32xf32> -> vector<4x32xf32>
    %54 = vector.broadcast %46 : vector<1x32xf32> to vector<4x32xf32>
    %55 = arith.addf %53, %54 : vector<4x32xf32>
    %c0_20 = arith.constant 0 : index
    %c0_21 = arith.constant 0 : index
    %56 = vector.load %arg6[%c0_20, %c0_21] : memref<1x32xf32, #tpu.memory_space<vmem>>, vector<1x32xf32>
    %c0_22 = arith.constant 0 : index
    %c0_23 = arith.constant 0 : index
    %57 = vector.load %arg7[%c0_22, %c0_23] : memref<1x32xf32, #tpu.memory_space<vmem>>, vector<1x32xf32>
    %cst_24 = arith.constant dense<0.000000e+00> : vector<4xf32>
    %58 = vector.multi_reduction <add>, %55, %cst_24 [1] : vector<4x32xf32> to vector<4xf32>
    %59 = vector.shape_cast %58 : vector<4xf32> to vector<4x1xf32>
    %cst_25 = arith.constant 3.200000e+01 : f32
    %60 = vector.broadcast %cst_25 : f32 to vector<4x1xf32>
    %61 = arith.divf %59, %60 : vector<4x1xf32>
    %62 = vector.broadcast %61 : vector<4x1xf32> to vector<4x32xf32>
    %63 = arith.subf %55, %62 : vector<4x32xf32>
    %64 = arith.mulf %63, %63 : vector<4x32xf32>
    %cst_26 = arith.constant dense<0.000000e+00> : vector<4xf32>
    %65 = vector.multi_reduction <add>, %64, %cst_26 [1] : vector<4x32xf32> to vector<4xf32>
    %66 = vector.shape_cast %65 : vector<4xf32> to vector<4x1xf32>
    %cst_27 = arith.constant 3.200000e+01 : f32
    %67 = vector.broadcast %cst_27 : f32 to vector<4x1xf32>
    %68 = arith.divf %66, %67 : vector<4x1xf32>
    %cst_28 = arith.constant 9.99999974E-6 : f32
    %69 = vector.broadcast %cst_28 : f32 to vector<4x1xf32>
    %70 = arith.addf %68, %69 : vector<4x1xf32>
    %71 = math.rsqrt %70 : vector<4x1xf32>
    %72 = vector.broadcast %71 : vector<4x1xf32> to vector<4x32xf32>
    %73 = arith.mulf %63, %72 : vector<4x32xf32>
    %74 = vector.broadcast %56 : vector<1x32xf32> to vector<4x32xf32>
    %75 = arith.mulf %73, %74 : vector<4x32xf32>
    %76 = vector.broadcast %57 : vector<1x32xf32> to vector<4x32xf32>
    %77 = arith.addf %75, %76 : vector<4x32xf32>
    %78 = arith.addf %77, %44 : vector<4x32xf32>
    %79 = vector.shape_cast %78 : vector<4x32xf32> to vector<1x4x32xf32>
    %c0_29 = arith.constant 0 : index
    %c0_30 = arith.constant 0 : index
    %c0_31 = arith.constant 0 : index
    %80 = vector.load %arg8[%c0_29, %c0_30, %c0_31] : memref<1x4x32xf32, #tpu.memory_space<vmem>>, vector<1x4x32xf32>
    tpu.vector_store %arg8[%c0_29, %c0_30, %c0_31], %79 {strides = array<i32>} : memref<1x4x32xf32, #tpu.memory_space<vmem>>, vector<1x4x32xf32>,
    return
  }
  func.func @transform_0(%arg0: i32) -> (i32, i32, i32) {
    %c0_i32 = arith.constant 0 : i32
    %c0_i32_0 = arith.constant 0 : i32
    %c0_i32_1 = arith.constant 0 : i32
    return %arg0, %c0_i32, %c0_i32_0 : i32, i32, i32
  }
  func.func @transform_1(%arg0: i32) -> (i32, i32) {
    %c0_i32 = arith.constant 0 : i32
    %c0_i32_0 = arith.constant 0 : i32
    %c0_i32_1 = arith.constant 0 : i32
    return %c0_i32, %c0_i32_0 : i32, i32
  }
  func.func @transform_2(%arg0: i32) -> (i32, i32) {
    %c0_i32 = arith.constant 0 : i32
    %c0_i32_0 = arith.constant 0 : i32
    %c0_i32_1 = arith.constant 0 : i32
    return %c0_i32, %c0_i32_0 : i32, i32
  }
  func.func @transform_3(%arg0: i32) -> (i32, i32) {
    %c0_i32 = arith.constant 0 : i32
    %c0_i32_0 = arith.constant 0 : i32
    %c0_i32_1 = arith.constant 0 : i32
    return %c0_i32, %c0_i32_0 : i32, i32
  }
  func.func @transform_4(%arg0: i32) -> (i32, i32) {
    %c0_i32 = arith.constant 0 : i32
    %c0_i32_0 = arith.constant 0 : i32
    %c0_i32_1 = arith.constant 0 : i32
    return %c0_i32, %c0_i32_0 : i32, i32
  }
  func.func @transform_5(%arg0: i32) -> (i32, i32) {
    %c0_i32 = arith.constant 0 : i32
    %c0_i32_0 = arith.constant 0 : i32
    %c0_i32_1 = arith.constant 0 : i32
    return %c0_i32, %c0_i32_0 : i32, i32
  }
  func.func @transform_6(%arg0: i32) -> (i32, i32) {
    %c0_i32 = arith.constant 0 : i32
    %c0_i32_0 = arith.constant 0 : i32
    %c0_i32_1 = arith.constant 0 : i32
    return %c0_i32, %c0_i32_0 : i32, i32
  }
  func.func @transform_7(%arg0: i32) -> (i32, i32, i32) {
    %c0_i32 = arith.constant 0 : i32
    %c0_i32_0 = arith.constant 0 : i32
    %c0_i32_1 = arith.constant 0 : i32
    return %arg0, %c0_i32, %c0_i32_0 : i32, i32, i32
  }
}

module attributes {stable_mosaic.version = 11 : i64} {
  func.func @_embedding_kernel(%arg0: i32, %arg1: memref<1x16x32xf32, #tpu.memory_space<vmem>>, %arg2: memref<1x16x6xf32, #tpu.memory_space<vmem>>, %arg3: memref<6x32xf32, #tpu.memory_space<vmem>>, %arg4: memref<1x32xf32, #tpu.memory_space<vmem>>, %arg5: memref<16x32xf32, #tpu.memory_space<vmem>>, %arg6: memref<1x16x32xf32, #tpu.memory_space<vmem>>) attributes {dimension_semantics = [#tpu.dimension_semantics<parallel>], iteration_bounds = array<i64: 2>, scalar_prefetch = 0 : i64, scratch_operands = 0 : i64, tpu.core_type = #tpu.core_type<tc>, window_params = [{transform_indices = @transform_0, window_bounds = array<i64: 1, 16, 32>}, {transform_indices = @transform_1, window_bounds = array<i64: 1, 16, 6>}, {pipeline_mode = #tpu.pipeline_mode<synchronous>, transform_indices = @transform_2, window_bounds = array<i64: 6, 32>}, {pipeline_mode = #tpu.pipeline_mode<synchronous>, transform_indices = @transform_3, window_bounds = array<i64: 1, 32>}, {pipeline_mode = #tpu.pipeline_mode<synchronous>, transform_indices = @transform_4, window_bounds = array<i64: 16, 32>}, {transform_indices = @transform_5, window_bounds = array<i64: 1, 16, 32>}]} {
    %c0 = arith.constant 0 : index
    %c0_0 = arith.constant 0 : index
    %c0_1 = arith.constant 0 : index
    %0 = vector.load %arg2[%c0, %c0_0, %c0_1] : memref<1x16x6xf32, #tpu.memory_space<vmem>>, vector<1x16x6xf32>
    %1 = vector.shape_cast %0 : vector<1x16x6xf32> to vector<16x6xf32>
    %c0_2 = arith.constant 0 : index
    %c0_3 = arith.constant 0 : index
    %2 = vector.load %arg3[%c0_2, %c0_3] : memref<6x32xf32, #tpu.memory_space<vmem>>, vector<6x32xf32>
    %cst = arith.constant dense<0.000000e+00> : vector<16x32xf32>
    %3 = tpu.matmul %1, %2, %cst {dimension_numbers = #tpu.dot_dimension_numbers<[1], [0], [0], [1], [0, 0, 1, 1], [], []>} : vector<16x6xf32>, vector<6x32xf32>, vector<16x32xf32> -> vector<16x32xf32>
    %c0_4 = arith.constant 0 : index
    %c0_5 = arith.constant 0 : index
    %4 = vector.load %arg4[%c0_4, %c0_5] : memref<1x32xf32, #tpu.memory_space<vmem>>, vector<1x32xf32>
    %5 = vector.broadcast %4 : vector<1x32xf32> to vector<16x32xf32>
    %6 = arith.addf %3, %5 : vector<16x32xf32>
    %c0_6 = arith.constant 0 : index
    %c0_7 = arith.constant 0 : index
    %c0_8 = arith.constant 0 : index
    %7 = vector.load %arg1[%c0_6, %c0_7, %c0_8] : memref<1x16x32xf32, #tpu.memory_space<vmem>>, vector<1x16x32xf32>
    %8 = vector.shape_cast %7 : vector<1x16x32xf32> to vector<16x32xf32>
    %9 = arith.addf %8, %6 : vector<16x32xf32>
    %c0_9 = arith.constant 0 : index
    %c0_10 = arith.constant 0 : index
    %10 = vector.load %arg5[%c0_9, %c0_10] : memref<16x32xf32, #tpu.memory_space<vmem>>, vector<16x32xf32>
    %11 = arith.addf %9, %10 : vector<16x32xf32>
    %12 = vector.shape_cast %11 : vector<16x32xf32> to vector<1x16x32xf32>
    %c0_11 = arith.constant 0 : index
    %c0_12 = arith.constant 0 : index
    %c0_13 = arith.constant 0 : index
    %13 = vector.load %arg6[%c0_11, %c0_12, %c0_13] : memref<1x16x32xf32, #tpu.memory_space<vmem>>, vector<1x16x32xf32>
    tpu.vector_store %arg6[%c0_11, %c0_12, %c0_13], %12 {strides = array<i32>} : memref<1x16x32xf32, #tpu.memory_space<vmem>>, vector<1x16x32xf32>,
    return
  }
  func.func @transform_0(%arg0: i32) -> (i32, i32, i32) {
    %c0_i32 = arith.constant 0 : i32
    %c0_i32_0 = arith.constant 0 : i32
    %c0_i32_1 = arith.constant 0 : i32
    return %arg0, %c0_i32, %c0_i32_0 : i32, i32, i32
  }
  func.func @transform_1(%arg0: i32) -> (i32, i32, i32) {
    %c0_i32 = arith.constant 0 : i32
    %c0_i32_0 = arith.constant 0 : i32
    %c0_i32_1 = arith.constant 0 : i32
    return %arg0, %c0_i32, %c0_i32_0 : i32, i32, i32
  }
  func.func @transform_2(%arg0: i32) -> (i32, i32) {
    %c0_i32 = arith.constant 0 : i32
    %c0_i32_0 = arith.constant 0 : i32
    %c0_i32_1 = arith.constant 0 : i32
    return %c0_i32, %c0_i32_0 : i32, i32
  }
  func.func @transform_3(%arg0: i32) -> (i32, i32) {
    %c0_i32 = arith.constant 0 : i32
    %c0_i32_0 = arith.constant 0 : i32
    %c0_i32_1 = arith.constant 0 : i32
    return %c0_i32, %c0_i32_0 : i32, i32
  }
  func.func @transform_4(%arg0: i32) -> (i32, i32) {
    %c0_i32 = arith.constant 0 : i32
    %c0_i32_0 = arith.constant 0 : i32
    %c0_i32_1 = arith.constant 0 : i32
    return %c0_i32, %c0_i32_0 : i32, i32
  }
  func.func @transform_5(%arg0: i32) -> (i32, i32, i32) {
    %c0_i32 = arith.constant 0 : i32
    %c0_i32_0 = arith.constant 0 : i32
    %c0_i32_1 = arith.constant 0 : i32
    return %arg0, %c0_i32, %c0_i32_0 : i32, i32, i32
  }
}

module attributes {stable_mosaic.version = 11 : i64} {
  func.func @_pool_stage_kernel(%arg0: i32, %arg1: memref<1x16x32xf32, #tpu.memory_space<vmem>>, %arg2: memref<96x32xf32, #tpu.memory_space<vmem>>, %arg3: memref<1x32xf32, #tpu.memory_space<vmem>>, %arg4: memref<96x32xf32, #tpu.memory_space<vmem>>, %arg5: memref<1x32xf32, #tpu.memory_space<vmem>>, %arg6: memref<1x32xf32, #tpu.memory_space<vmem>>, %arg7: memref<1x32xf32, #tpu.memory_space<vmem>>, %arg8: memref<1x8x32xf32, #tpu.memory_space<vmem>>) attributes {dimension_semantics = [#tpu.dimension_semantics<parallel>], iteration_bounds = array<i64: 2>, scalar_prefetch = 0 : i64, scratch_operands = 0 : i64, tpu.core_type = #tpu.core_type<tc>, window_params = [{transform_indices = @transform_0, window_bounds = array<i64: 1, 16, 32>}, {pipeline_mode = #tpu.pipeline_mode<synchronous>, transform_indices = @transform_1, window_bounds = array<i64: 96, 32>}, {pipeline_mode = #tpu.pipeline_mode<synchronous>, transform_indices = @transform_2, window_bounds = array<i64: 1, 32>}, {pipeline_mode = #tpu.pipeline_mode<synchronous>, transform_indices = @transform_3, window_bounds = array<i64: 96, 32>}, {pipeline_mode = #tpu.pipeline_mode<synchronous>, transform_indices = @transform_4, window_bounds = array<i64: 1, 32>}, {pipeline_mode = #tpu.pipeline_mode<synchronous>, transform_indices = @transform_5, window_bounds = array<i64: 1, 32>}, {pipeline_mode = #tpu.pipeline_mode<synchronous>, transform_indices = @transform_6, window_bounds = array<i64: 1, 32>}, {transform_indices = @transform_7, window_bounds = array<i64: 1, 8, 32>}]} {
    %c0 = arith.constant 0 : index
    %c0_0 = arith.constant 0 : index
    %c0_1 = arith.constant 0 : index
    %0 = vector.load %arg1[%c0, %c0_0, %c0_1] : memref<1x16x32xf32, #tpu.memory_space<vmem>>, vector<1x16x32xf32>
    %1 = vector.shape_cast %0 : vector<1x16x32xf32> to vector<16x32xf32>
    %c0_2 = arith.constant 0 : index
    %c0_3 = arith.constant 0 : index
    %2 = vector.load %arg2[%c0_2, %c0_3] : memref<96x32xf32, #tpu.memory_space<vmem>>, vector<96x32xf32>
    %c0_4 = arith.constant 0 : index
    %c0_5 = arith.constant 0 : index
    %3 = vector.load %arg3[%c0_4, %c0_5] : memref<1x32xf32, #tpu.memory_space<vmem>>, vector<1x32xf32>
    %cst = arith.constant 0.000000e+00 : f32
    %4 = vector.broadcast %cst : f32 to vector<1x32xf32>
    %5 = vector.extract_strided_slice %1 {offsets = [0, 0], sizes = [15, 32], strides = [1, 1]} : vector<16x32xf32> to vector<15x32xf32>
    %6 = tpu.concatenate %4, %5 in 0 : vector<1x32xf32>, vector<15x32xf32> -> vector<16x32xf32>
    %7 = vector.extract_strided_slice %1 {offsets = [1, 0], sizes = [15, 32], strides = [1, 1]} : vector<16x32xf32> to vector<15x32xf32>
    %8 = tpu.concatenate %7, %4 in 0 : vector<15x32xf32>, vector<1x32xf32> -> vector<16x32xf32>
    %9 = tpu.concatenate %6, %1, %8 in 1 : vector<16x32xf32>, vector<16x32xf32>, vector<16x32xf32> -> vector<16x96xf32>
    %cst_6 = arith.constant dense<0.000000e+00> : vector<16x32xf32>
    %10 = tpu.matmul %9, %2, %cst_6 {dimension_numbers = #tpu.dot_dimension_numbers<[1], [0], [0], [1], [0, 0, 1, 1], [], []>} : vector<16x96xf32>, vector<96x32xf32>, vector<16x32xf32> -> vector<16x32xf32>
    %11 = vector.broadcast %3 : vector<1x32xf32> to vector<16x32xf32>
    %12 = arith.addf %10, %11 : vector<16x32xf32>
    %cst_7 = arith.constant 5.000000e-01 : f32
    %13 = vector.broadcast %cst_7 : f32 to vector<16x32xf32>
    %14 = arith.mulf %13, %12 : vector<16x32xf32>
    %cst_8 = arith.constant 4.471500e-02 : f32
    %15 = vector.broadcast %cst_8 : f32 to vector<16x32xf32>
    %16 = arith.mulf %15, %12 : vector<16x32xf32>
    %17 = arith.mulf %16, %12 : vector<16x32xf32>
    %18 = arith.mulf %17, %12 : vector<16x32xf32>
    %19 = arith.addf %12, %18 : vector<16x32xf32>
    %cst_9 = arith.constant 0.797884583 : f32
    %20 = vector.broadcast %cst_9 : f32 to vector<16x32xf32>
    %21 = arith.mulf %20, %19 : vector<16x32xf32>
    %22 = math.tanh %21 : vector<16x32xf32>
    %cst_10 = arith.constant 1.000000e+00 : f32
    %23 = vector.broadcast %cst_10 : f32 to vector<16x32xf32>
    %24 = arith.addf %23, %22 : vector<16x32xf32>
    %25 = arith.mulf %14, %24 : vector<16x32xf32>
    %26 = tpu.iota {dimensions = array<i32: 0>} : vector<8x16xi32>
    %27 = tpu.iota {dimensions = array<i32: 1>} : vector<8x16xi32>
    %c2_i32 = arith.constant 2 : i32
    %28 = vector.broadcast %c2_i32 : i32 to vector<8x16xi32>
    %29 = arith.muli %26, %28 : vector<8x16xi32>
    %c0_i32 = arith.constant 0 : i32
    %30 = vector.broadcast %c0_i32 : i32 to vector<8x16xi32>
    %31 = arith.addi %29, %30 : vector<8x16xi32>
    %32 = arith.cmpi eq, %27, %31 : vector<8x16xi32>
    %33 = arith.extui %32 : vector<8x16xi1> to vector<8x16xi32>
    %34 = arith.sitofp %33 : vector<8x16xi32> to vector<8x16xf32>
    %cst_11 = arith.constant dense<0.000000e+00> : vector<8x32xf32>
    %35 = tpu.matmul %34, %25, %cst_11 {dimension_numbers = #tpu.dot_dimension_numbers<[1], [0], [0], [1], [0, 0, 1, 1], [], []>} : vector<8x16xf32>, vector<16x32xf32>, vector<8x32xf32> -> vector<8x32xf32>
    %c2_i32_12 = arith.constant 2 : i32
    %36 = vector.broadcast %c2_i32_12 : i32 to vector<8x16xi32>
    %37 = arith.muli %26, %36 : vector<8x16xi32>
    %c1_i32 = arith.constant 1 : i32
    %38 = vector.broadcast %c1_i32 : i32 to vector<8x16xi32>
    %39 = arith.addi %37, %38 : vector<8x16xi32>
    %40 = arith.cmpi eq, %27, %39 : vector<8x16xi32>
    %41 = arith.extui %40 : vector<8x16xi1> to vector<8x16xi32>
    %42 = arith.sitofp %41 : vector<8x16xi32> to vector<8x16xf32>
    %cst_13 = arith.constant dense<0.000000e+00> : vector<8x32xf32>
    %43 = tpu.matmul %42, %25, %cst_13 {dimension_numbers = #tpu.dot_dimension_numbers<[1], [0], [0], [1], [0, 0, 1, 1], [], []>} : vector<8x16xf32>, vector<16x32xf32>, vector<8x32xf32> -> vector<8x32xf32>
    %44 = arith.maximumf %35, %43 : vector<8x32xf32>
    %c0_14 = arith.constant 0 : index
    %c0_15 = arith.constant 0 : index
    %45 = vector.load %arg4[%c0_14, %c0_15] : memref<96x32xf32, #tpu.memory_space<vmem>>, vector<96x32xf32>
    %c0_16 = arith.constant 0 : index
    %c0_17 = arith.constant 0 : index
    %46 = vector.load %arg5[%c0_16, %c0_17] : memref<1x32xf32, #tpu.memory_space<vmem>>, vector<1x32xf32>
    %cst_18 = arith.constant 0.000000e+00 : f32
    %47 = vector.broadcast %cst_18 : f32 to vector<1x32xf32>
    %48 = vector.extract_strided_slice %44 {offsets = [0, 0], sizes = [7, 32], strides = [1, 1]} : vector<8x32xf32> to vector<7x32xf32>
    %49 = tpu.concatenate %47, %48 in 0 : vector<1x32xf32>, vector<7x32xf32> -> vector<8x32xf32>
    %50 = vector.extract_strided_slice %44 {offsets = [1, 0], sizes = [7, 32], strides = [1, 1]} : vector<8x32xf32> to vector<7x32xf32>
    %51 = tpu.concatenate %50, %47 in 0 : vector<7x32xf32>, vector<1x32xf32> -> vector<8x32xf32>
    %52 = tpu.concatenate %49, %44, %51 in 1 : vector<8x32xf32>, vector<8x32xf32>, vector<8x32xf32> -> vector<8x96xf32>
    %cst_19 = arith.constant dense<0.000000e+00> : vector<8x32xf32>
    %53 = tpu.matmul %52, %45, %cst_19 {dimension_numbers = #tpu.dot_dimension_numbers<[1], [0], [0], [1], [0, 0, 1, 1], [], []>} : vector<8x96xf32>, vector<96x32xf32>, vector<8x32xf32> -> vector<8x32xf32>
    %54 = vector.broadcast %46 : vector<1x32xf32> to vector<8x32xf32>
    %55 = arith.addf %53, %54 : vector<8x32xf32>
    %c0_20 = arith.constant 0 : index
    %c0_21 = arith.constant 0 : index
    %56 = vector.load %arg6[%c0_20, %c0_21] : memref<1x32xf32, #tpu.memory_space<vmem>>, vector<1x32xf32>
    %c0_22 = arith.constant 0 : index
    %c0_23 = arith.constant 0 : index
    %57 = vector.load %arg7[%c0_22, %c0_23] : memref<1x32xf32, #tpu.memory_space<vmem>>, vector<1x32xf32>
    %cst_24 = arith.constant dense<0.000000e+00> : vector<8xf32>
    %58 = vector.multi_reduction <add>, %55, %cst_24 [1] : vector<8x32xf32> to vector<8xf32>
    %59 = vector.shape_cast %58 : vector<8xf32> to vector<8x1xf32>
    %cst_25 = arith.constant 3.200000e+01 : f32
    %60 = vector.broadcast %cst_25 : f32 to vector<8x1xf32>
    %61 = arith.divf %59, %60 : vector<8x1xf32>
    %62 = vector.broadcast %61 : vector<8x1xf32> to vector<8x32xf32>
    %63 = arith.subf %55, %62 : vector<8x32xf32>
    %64 = arith.mulf %63, %63 : vector<8x32xf32>
    %cst_26 = arith.constant dense<0.000000e+00> : vector<8xf32>
    %65 = vector.multi_reduction <add>, %64, %cst_26 [1] : vector<8x32xf32> to vector<8xf32>
    %66 = vector.shape_cast %65 : vector<8xf32> to vector<8x1xf32>
    %cst_27 = arith.constant 3.200000e+01 : f32
    %67 = vector.broadcast %cst_27 : f32 to vector<8x1xf32>
    %68 = arith.divf %66, %67 : vector<8x1xf32>
    %cst_28 = arith.constant 9.99999974E-6 : f32
    %69 = vector.broadcast %cst_28 : f32 to vector<8x1xf32>
    %70 = arith.addf %68, %69 : vector<8x1xf32>
    %71 = math.rsqrt %70 : vector<8x1xf32>
    %72 = vector.broadcast %71 : vector<8x1xf32> to vector<8x32xf32>
    %73 = arith.mulf %63, %72 : vector<8x32xf32>
    %74 = vector.broadcast %56 : vector<1x32xf32> to vector<8x32xf32>
    %75 = arith.mulf %73, %74 : vector<8x32xf32>
    %76 = vector.broadcast %57 : vector<1x32xf32> to vector<8x32xf32>
    %77 = arith.addf %75, %76 : vector<8x32xf32>
    %78 = arith.addf %77, %44 : vector<8x32xf32>
    %79 = vector.shape_cast %78 : vector<8x32xf32> to vector<1x8x32xf32>
    %c0_29 = arith.constant 0 : index
    %c0_30 = arith.constant 0 : index
    %c0_31 = arith.constant 0 : index
    %80 = vector.load %arg8[%c0_29, %c0_30, %c0_31] : memref<1x8x32xf32, #tpu.memory_space<vmem>>, vector<1x8x32xf32>
    tpu.vector_store %arg8[%c0_29, %c0_30, %c0_31], %79 {strides = array<i32>} : memref<1x8x32xf32, #tpu.memory_space<vmem>>, vector<1x8x32xf32>,
    return
  }
  func.func @transform_0(%arg0: i32) -> (i32, i32, i32) {
    %c0_i32 = arith.constant 0 : i32
    %c0_i32_0 = arith.constant 0 : i32
    %c0_i32_1 = arith.constant 0 : i32
    return %arg0, %c0_i32, %c0_i32_0 : i32, i32, i32
  }
  func.func @transform_1(%arg0: i32) -> (i32, i32) {
    %c0_i32 = arith.constant 0 : i32
    %c0_i32_0 = arith.constant 0 : i32
    %c0_i32_1 = arith.constant 0 : i32
    return %c0_i32, %c0_i32_0 : i32, i32
  }
  func.func @transform_2(%arg0: i32) -> (i32, i32) {
    %c0_i32 = arith.constant 0 : i32
    %c0_i32_0 = arith.constant 0 : i32
    %c0_i32_1 = arith.constant 0 : i32
    return %c0_i32, %c0_i32_0 : i32, i32
  }
  func.func @transform_3(%arg0: i32) -> (i32, i32) {
    %c0_i32 = arith.constant 0 : i32
    %c0_i32_0 = arith.constant 0 : i32
    %c0_i32_1 = arith.constant 0 : i32
    return %c0_i32, %c0_i32_0 : i32, i32
  }
  func.func @transform_4(%arg0: i32) -> (i32, i32) {
    %c0_i32 = arith.constant 0 : i32
    %c0_i32_0 = arith.constant 0 : i32
    %c0_i32_1 = arith.constant 0 : i32
    return %c0_i32, %c0_i32_0 : i32, i32
  }
  func.func @transform_5(%arg0: i32) -> (i32, i32) {
    %c0_i32 = arith.constant 0 : i32
    %c0_i32_0 = arith.constant 0 : i32
    %c0_i32_1 = arith.constant 0 : i32
    return %c0_i32, %c0_i32_0 : i32, i32
  }
  func.func @transform_6(%arg0: i32) -> (i32, i32) {
    %c0_i32 = arith.constant 0 : i32
    %c0_i32_0 = arith.constant 0 : i32
    %c0_i32_1 = arith.constant 0 : i32
    return %c0_i32, %c0_i32_0 : i32, i32
  }
  func.func @transform_7(%arg0: i32) -> (i32, i32, i32) {
    %c0_i32 = arith.constant 0 : i32
    %c0_i32_0 = arith.constant 0 : i32
    %c0_i32_1 = arith.constant 0 : i32
    return %arg0, %c0_i32, %c0_i32_0 : i32, i32, i32
  }
}

module attributes {stable_mosaic.version = 11 : i64} {
  func.func @_encoder_layer_kernel(%arg0: i32, %arg1: memref<1x4x32xf32, #tpu.memory_space<vmem>>, %arg2: memref<32x96xf32, #tpu.memory_space<vmem>>, %arg3: memref<1x96xf32, #tpu.memory_space<vmem>>, %arg4: memref<32x32xf32, #tpu.memory_space<vmem>>, %arg5: memref<1x32xf32, #tpu.memory_space<vmem>>, %arg6: memref<1x32xf32, #tpu.memory_space<vmem>>, %arg7: memref<1x32xf32, #tpu.memory_space<vmem>>, %arg8: memref<32x64xf32, #tpu.memory_space<vmem>>, %arg9: memref<1x64xf32, #tpu.memory_space<vmem>>, %arg10: memref<64x32xf32, #tpu.memory_space<vmem>>, %arg11: memref<1x32xf32, #tpu.memory_space<vmem>>, %arg12: memref<1x32xf32, #tpu.memory_space<vmem>>, %arg13: memref<1x32xf32, #tpu.memory_space<vmem>>, %arg14: memref<1x4x32xf32, #tpu.memory_space<vmem>>) attributes {dimension_semantics = [#tpu.dimension_semantics<parallel>], iteration_bounds = array<i64: 2>, scalar_prefetch = 0 : i64, scratch_operands = 0 : i64, tpu.core_type = #tpu.core_type<tc>, window_params = [{transform_indices = @transform_0, window_bounds = array<i64: 1, 4, 32>}, {pipeline_mode = #tpu.pipeline_mode<synchronous>, transform_indices = @transform_1, window_bounds = array<i64: 32, 96>}, {pipeline_mode = #tpu.pipeline_mode<synchronous>, transform_indices = @transform_2, window_bounds = array<i64: 1, 96>}, {pipeline_mode = #tpu.pipeline_mode<synchronous>, transform_indices = @transform_3, window_bounds = array<i64: 32, 32>}, {pipeline_mode = #tpu.pipeline_mode<synchronous>, transform_indices = @transform_4, window_bounds = array<i64: 1, 32>}, {pipeline_mode = #tpu.pipeline_mode<synchronous>, transform_indices = @transform_5, window_bounds = array<i64: 1, 32>}, {pipeline_mode = #tpu.pipeline_mode<synchronous>, transform_indices = @transform_6, window_bounds = array<i64: 1, 32>}, {pipeline_mode = #tpu.pipeline_mode<synchronous>, transform_indices = @transform_7, window_bounds = array<i64: 32, 64>}, {pipeline_mode = #tpu.pipeline_mode<synchronous>, transform_indices = @transform_8, window_bounds = array<i64: 1, 64>}, {pipeline_mode = #tpu.pipeline_mode<synchronous>, transform_indices = @transform_9, window_bounds = array<i64: 64, 32>}, {pipeline_mode = #tpu.pipeline_mode<synchronous>, transform_indices = @transform_10, window_bounds = array<i64: 1, 32>}, {pipeline_mode = #tpu.pipeline_mode<synchronous>, transform_indices = @transform_11, window_bounds = array<i64: 1, 32>}, {pipeline_mode = #tpu.pipeline_mode<synchronous>, transform_indices = @transform_12, window_bounds = array<i64: 1, 32>}, {transform_indices = @transform_13, window_bounds = array<i64: 1, 4, 32>}]} {
    %c0 = arith.constant 0 : index
    %c0_0 = arith.constant 0 : index
    %c0_1 = arith.constant 0 : index
    %0 = vector.load %arg1[%c0, %c0_0, %c0_1] : memref<1x4x32xf32, #tpu.memory_space<vmem>>, vector<1x4x32xf32>
    %1 = vector.shape_cast %0 : vector<1x4x32xf32> to vector<4x32xf32>
    %c0_2 = arith.constant 0 : index
    %c0_3 = arith.constant 0 : index
    %2 = vector.load %arg2[%c0_2, %c0_3] : memref<32x96xf32, #tpu.memory_space<vmem>>, vector<32x96xf32>
    %cst = arith.constant dense<0.000000e+00> : vector<4x96xf32>
    %3 = tpu.matmul %1, %2, %cst {dimension_numbers = #tpu.dot_dimension_numbers<[1], [0], [0], [1], [0, 0, 1, 1], [], []>} : vector<4x32xf32>, vector<32x96xf32>, vector<4x96xf32> -> vector<4x96xf32>
    %c0_4 = arith.constant 0 : index
    %c0_5 = arith.constant 0 : index
    %4 = vector.load %arg3[%c0_4, %c0_5] : memref<1x96xf32, #tpu.memory_space<vmem>>, vector<1x96xf32>
    %5 = vector.broadcast %4 : vector<1x96xf32> to vector<4x96xf32>
    %6 = arith.addf %3, %5 : vector<4x96xf32>
    %7 = vector.extract_strided_slice %6 {offsets = [0, 0], sizes = [4, 32], strides = [1, 1]} : vector<4x96xf32> to vector<4x32xf32>
    %8 = vector.extract_strided_slice %6 {offsets = [0, 32], sizes = [4, 32], strides = [1, 1]} : vector<4x96xf32> to vector<4x32xf32>
    %9 = vector.extract_strided_slice %6 {offsets = [0, 64], sizes = [4, 32], strides = [1, 1]} : vector<4x96xf32> to vector<4x32xf32>
    %10 = vector.extract_strided_slice %7 {offsets = [0, 0], sizes = [4, 8], strides = [1, 1]} : vector<4x32xf32> to vector<4x8xf32>
    %11 = vector.shape_cast %10 : vector<4x8xf32> to vector<1x4x8xf32>
    %12 = vector.extract_strided_slice %7 {offsets = [0, 8], sizes = [4, 8], strides = [1, 1]} : vector<4x32xf32> to vector<4x8xf32>
    %13 = vector.shape_cast %12 : vector<4x8xf32> to vector<1x4x8xf32>
    %14 = vector.extract_strided_slice %7 {offsets = [0, 16], sizes = [4, 8], strides = [1, 1]} : vector<4x32xf32> to vector<4x8xf32>
    %15 = vector.shape_cast %14 : vector<4x8xf32> to vector<1x4x8xf32>
    %16 = vector.extract_strided_slice %7 {offsets = [0, 24], sizes = [4, 8], strides = [1, 1]} : vector<4x32xf32> to vector<4x8xf32>
    %17 = vector.shape_cast %16 : vector<4x8xf32> to vector<1x4x8xf32>
    %18 = tpu.concatenate %11, %13, %15, %17 in 0 : vector<1x4x8xf32>, vector<1x4x8xf32>, vector<1x4x8xf32>, vector<1x4x8xf32> -> vector<4x4x8xf32>
    %19 = vector.extract_strided_slice %8 {offsets = [0, 0], sizes = [4, 8], strides = [1, 1]} : vector<4x32xf32> to vector<4x8xf32>
    %20 = vector.shape_cast %19 : vector<4x8xf32> to vector<1x4x8xf32>
    %21 = vector.extract_strided_slice %8 {offsets = [0, 8], sizes = [4, 8], strides = [1, 1]} : vector<4x32xf32> to vector<4x8xf32>
    %22 = vector.shape_cast %21 : vector<4x8xf32> to vector<1x4x8xf32>
    %23 = vector.extract_strided_slice %8 {offsets = [0, 16], sizes = [4, 8], strides = [1, 1]} : vector<4x32xf32> to vector<4x8xf32>
    %24 = vector.shape_cast %23 : vector<4x8xf32> to vector<1x4x8xf32>
    %25 = vector.extract_strided_slice %8 {offsets = [0, 24], sizes = [4, 8], strides = [1, 1]} : vector<4x32xf32> to vector<4x8xf32>
    %26 = vector.shape_cast %25 : vector<4x8xf32> to vector<1x4x8xf32>
    %27 = tpu.concatenate %20, %22, %24, %26 in 0 : vector<1x4x8xf32>, vector<1x4x8xf32>, vector<1x4x8xf32>, vector<1x4x8xf32> -> vector<4x4x8xf32>
    %28 = vector.extract_strided_slice %9 {offsets = [0, 0], sizes = [4, 8], strides = [1, 1]} : vector<4x32xf32> to vector<4x8xf32>
    %29 = vector.shape_cast %28 : vector<4x8xf32> to vector<1x4x8xf32>
    %30 = vector.extract_strided_slice %9 {offsets = [0, 8], sizes = [4, 8], strides = [1, 1]} : vector<4x32xf32> to vector<4x8xf32>
    %31 = vector.shape_cast %30 : vector<4x8xf32> to vector<1x4x8xf32>
    %32 = vector.extract_strided_slice %9 {offsets = [0, 16], sizes = [4, 8], strides = [1, 1]} : vector<4x32xf32> to vector<4x8xf32>
    %33 = vector.shape_cast %32 : vector<4x8xf32> to vector<1x4x8xf32>
    %34 = vector.extract_strided_slice %9 {offsets = [0, 24], sizes = [4, 8], strides = [1, 1]} : vector<4x32xf32> to vector<4x8xf32>
    %35 = vector.shape_cast %34 : vector<4x8xf32> to vector<1x4x8xf32>
    %36 = tpu.concatenate %29, %31, %33, %35 in 0 : vector<1x4x8xf32>, vector<1x4x8xf32>, vector<1x4x8xf32>, vector<1x4x8xf32> -> vector<4x4x8xf32>
    "tpu.trace_start"() <{level = 10 : i32, message = "hqd,hkd->hqk"}> : () -> ()
    %cst_6 = arith.constant dense<0.000000e+00> : vector<4x4x4xf32>
    %37 = tpu.matmul %18, %27, %cst_6 {dimension_numbers = #tpu.dot_dimension_numbers<[2], [2], [1], [1], [0, 0, 0, 1, 1, 1], [0], [0]>} : vector<4x4x8xf32>, vector<4x4x8xf32>, vector<4x4x4xf32> -> vector<4x4x4xf32>
    "tpu.trace_stop"() : () -> ()
    %cst_7 = arith.constant 0.353553385 : f32
    %38 = vector.broadcast %cst_7 : f32 to vector<4x4x4xf32>
    %39 = arith.mulf %37, %38 : vector<4x4x4xf32>
    %cst_8 = arith.constant dense<0xFF800000> : vector<4x4xf32>
    %40 = vector.multi_reduction <maximumf>, %39, %cst_8 [2] : vector<4x4x4xf32> to vector<4x4xf32>
    %41 = vector.shape_cast %40 : vector<4x4xf32> to vector<4x4x1xf32>
    %42 = vector.broadcast %41 : vector<4x4x1xf32> to vector<4x4x4xf32>
    %43 = arith.subf %39, %42 : vector<4x4x4xf32>
    %44 = math.exp %43 : vector<4x4x4xf32>
    %cst_9 = arith.constant dense<0.000000e+00> : vector<4x4xf32>
    %45 = vector.multi_reduction <add>, %44, %cst_9 [2] : vector<4x4x4xf32> to vector<4x4xf32>
    %46 = vector.shape_cast %45 : vector<4x4xf32> to vector<4x4x1xf32>
    %cst_10 = arith.constant 1.000000e+00 : f32
    %47 = vector.broadcast %cst_10 : f32 to vector<4x4x1xf32>
    %48 = arith.divf %47, %46 : vector<4x4x1xf32>
    %49 = vector.broadcast %48 : vector<4x4x1xf32> to vector<4x4x4xf32>
    %50 = arith.mulf %44, %49 : vector<4x4x4xf32>
    "tpu.trace_start"() <{level = 10 : i32, message = "hqk,hkd->hqd"}> : () -> ()
    %cst_11 = arith.constant dense<0.000000e+00> : vector<4x4x8xf32>
    %51 = tpu.matmul %50, %36, %cst_11 {dimension_numbers = #tpu.dot_dimension_numbers<[2], [1], [1], [2], [0, 0, 0, 1, 1, 2], [0], [0]>} : vector<4x4x4xf32>, vector<4x4x8xf32>, vector<4x4x8xf32> -> vector<4x4x8xf32>
    "tpu.trace_stop"() : () -> ()
    %52 = vector.extract_strided_slice %51 {offsets = [0, 0, 0], sizes = [1, 4, 8], strides = [1, 1, 1]} : vector<4x4x8xf32> to vector<1x4x8xf32>
    %53 = vector.shape_cast %52 : vector<1x4x8xf32> to vector<4x8xf32>
    %54 = vector.extract_strided_slice %51 {offsets = [1, 0, 0], sizes = [1, 4, 8], strides = [1, 1, 1]} : vector<4x4x8xf32> to vector<1x4x8xf32>
    %55 = vector.shape_cast %54 : vector<1x4x8xf32> to vector<4x8xf32>
    %56 = vector.extract_strided_slice %51 {offsets = [2, 0, 0], sizes = [1, 4, 8], strides = [1, 1, 1]} : vector<4x4x8xf32> to vector<1x4x8xf32>
    %57 = vector.shape_cast %56 : vector<1x4x8xf32> to vector<4x8xf32>
    %58 = vector.extract_strided_slice %51 {offsets = [3, 0, 0], sizes = [1, 4, 8], strides = [1, 1, 1]} : vector<4x4x8xf32> to vector<1x4x8xf32>
    %59 = vector.shape_cast %58 : vector<1x4x8xf32> to vector<4x8xf32>
    %60 = tpu.concatenate %53, %55, %57, %59 in 1 : vector<4x8xf32>, vector<4x8xf32>, vector<4x8xf32>, vector<4x8xf32> -> vector<4x32xf32>
    %c0_12 = arith.constant 0 : index
    %c0_13 = arith.constant 0 : index
    %61 = vector.load %arg4[%c0_12, %c0_13] : memref<32x32xf32, #tpu.memory_space<vmem>>, vector<32x32xf32>
    %cst_14 = arith.constant dense<0.000000e+00> : vector<4x32xf32>
    %62 = tpu.matmul %60, %61, %cst_14 {dimension_numbers = #tpu.dot_dimension_numbers<[1], [0], [0], [1], [0, 0, 1, 1], [], []>} : vector<4x32xf32>, vector<32x32xf32>, vector<4x32xf32> -> vector<4x32xf32>
    %c0_15 = arith.constant 0 : index
    %c0_16 = arith.constant 0 : index
    %63 = vector.load %arg5[%c0_15, %c0_16] : memref<1x32xf32, #tpu.memory_space<vmem>>, vector<1x32xf32>
    %64 = vector.broadcast %63 : vector<1x32xf32> to vector<4x32xf32>
    %65 = arith.addf %62, %64 : vector<4x32xf32>
    %66 = arith.addf %1, %65 : vector<4x32xf32>
    %c0_17 = arith.constant 0 : index
    %c0_18 = arith.constant 0 : index
    %67 = vector.load %arg6[%c0_17, %c0_18] : memref<1x32xf32, #tpu.memory_space<vmem>>, vector<1x32xf32>
    %c0_19 = arith.constant 0 : index
    %c0_20 = arith.constant 0 : index
    %68 = vector.load %arg7[%c0_19, %c0_20] : memref<1x32xf32, #tpu.memory_space<vmem>>, vector<1x32xf32>
    %cst_21 = arith.constant dense<0.000000e+00> : vector<4xf32>
    %69 = vector.multi_reduction <add>, %66, %cst_21 [1] : vector<4x32xf32> to vector<4xf32>
    %70 = vector.shape_cast %69 : vector<4xf32> to vector<4x1xf32>
    %cst_22 = arith.constant 3.200000e+01 : f32
    %71 = vector.broadcast %cst_22 : f32 to vector<4x1xf32>
    %72 = arith.divf %70, %71 : vector<4x1xf32>
    %73 = vector.broadcast %72 : vector<4x1xf32> to vector<4x32xf32>
    %74 = arith.subf %66, %73 : vector<4x32xf32>
    %75 = arith.mulf %74, %74 : vector<4x32xf32>
    %cst_23 = arith.constant dense<0.000000e+00> : vector<4xf32>
    %76 = vector.multi_reduction <add>, %75, %cst_23 [1] : vector<4x32xf32> to vector<4xf32>
    %77 = vector.shape_cast %76 : vector<4xf32> to vector<4x1xf32>
    %cst_24 = arith.constant 3.200000e+01 : f32
    %78 = vector.broadcast %cst_24 : f32 to vector<4x1xf32>
    %79 = arith.divf %77, %78 : vector<4x1xf32>
    %cst_25 = arith.constant 9.99999974E-6 : f32
    %80 = vector.broadcast %cst_25 : f32 to vector<4x1xf32>
    %81 = arith.addf %79, %80 : vector<4x1xf32>
    %82 = math.rsqrt %81 : vector<4x1xf32>
    %83 = vector.broadcast %82 : vector<4x1xf32> to vector<4x32xf32>
    %84 = arith.mulf %74, %83 : vector<4x32xf32>
    %85 = vector.broadcast %67 : vector<1x32xf32> to vector<4x32xf32>
    %86 = arith.mulf %84, %85 : vector<4x32xf32>
    %87 = vector.broadcast %68 : vector<1x32xf32> to vector<4x32xf32>
    %88 = arith.addf %86, %87 : vector<4x32xf32>
    %c0_26 = arith.constant 0 : index
    %c0_27 = arith.constant 0 : index
    %89 = vector.load %arg8[%c0_26, %c0_27] : memref<32x64xf32, #tpu.memory_space<vmem>>, vector<32x64xf32>
    %cst_28 = arith.constant dense<0.000000e+00> : vector<4x64xf32>
    %90 = tpu.matmul %88, %89, %cst_28 {dimension_numbers = #tpu.dot_dimension_numbers<[1], [0], [0], [1], [0, 0, 1, 1], [], []>} : vector<4x32xf32>, vector<32x64xf32>, vector<4x64xf32> -> vector<4x64xf32>
    %c0_29 = arith.constant 0 : index
    %c0_30 = arith.constant 0 : index
    %91 = vector.load %arg9[%c0_29, %c0_30] : memref<1x64xf32, #tpu.memory_space<vmem>>, vector<1x64xf32>
    %92 = vector.broadcast %91 : vector<1x64xf32> to vector<4x64xf32>
    %93 = arith.addf %90, %92 : vector<4x64xf32>
    %cst_31 = arith.constant 0.000000e+00 : f32
    %94 = vector.broadcast %cst_31 : f32 to vector<4x64xf32>
    %95 = arith.maximumf %93, %94 : vector<4x64xf32>
    %c0_32 = arith.constant 0 : index
    %c0_33 = arith.constant 0 : index
    %96 = vector.load %arg10[%c0_32, %c0_33] : memref<64x32xf32, #tpu.memory_space<vmem>>, vector<64x32xf32>
    %cst_34 = arith.constant dense<0.000000e+00> : vector<4x32xf32>
    %97 = tpu.matmul %95, %96, %cst_34 {dimension_numbers = #tpu.dot_dimension_numbers<[1], [0], [0], [1], [0, 0, 1, 1], [], []>} : vector<4x64xf32>, vector<64x32xf32>, vector<4x32xf32> -> vector<4x32xf32>
    %c0_35 = arith.constant 0 : index
    %c0_36 = arith.constant 0 : index
    %98 = vector.load %arg11[%c0_35, %c0_36] : memref<1x32xf32, #tpu.memory_space<vmem>>, vector<1x32xf32>
    %99 = vector.broadcast %98 : vector<1x32xf32> to vector<4x32xf32>
    %100 = arith.addf %97, %99 : vector<4x32xf32>
    %101 = arith.addf %88, %100 : vector<4x32xf32>
    %c0_37 = arith.constant 0 : index
    %c0_38 = arith.constant 0 : index
    %102 = vector.load %arg12[%c0_37, %c0_38] : memref<1x32xf32, #tpu.memory_space<vmem>>, vector<1x32xf32>
    %c0_39 = arith.constant 0 : index
    %c0_40 = arith.constant 0 : index
    %103 = vector.load %arg13[%c0_39, %c0_40] : memref<1x32xf32, #tpu.memory_space<vmem>>, vector<1x32xf32>
    %cst_41 = arith.constant dense<0.000000e+00> : vector<4xf32>
    %104 = vector.multi_reduction <add>, %101, %cst_41 [1] : vector<4x32xf32> to vector<4xf32>
    %105 = vector.shape_cast %104 : vector<4xf32> to vector<4x1xf32>
    %cst_42 = arith.constant 3.200000e+01 : f32
    %106 = vector.broadcast %cst_42 : f32 to vector<4x1xf32>
    %107 = arith.divf %105, %106 : vector<4x1xf32>
    %108 = vector.broadcast %107 : vector<4x1xf32> to vector<4x32xf32>
    %109 = arith.subf %101, %108 : vector<4x32xf32>
    %110 = arith.mulf %109, %109 : vector<4x32xf32>
    %cst_43 = arith.constant dense<0.000000e+00> : vector<4xf32>
    %111 = vector.multi_reduction <add>, %110, %cst_43 [1] : vector<4x32xf32> to vector<4xf32>
    %112 = vector.shape_cast %111 : vector<4xf32> to vector<4x1xf32>
    %cst_44 = arith.constant 3.200000e+01 : f32
    %113 = vector.broadcast %cst_44 : f32 to vector<4x1xf32>
    %114 = arith.divf %112, %113 : vector<4x1xf32>
    %cst_45 = arith.constant 9.99999974E-6 : f32
    %115 = vector.broadcast %cst_45 : f32 to vector<4x1xf32>
    %116 = arith.addf %114, %115 : vector<4x1xf32>
    %117 = math.rsqrt %116 : vector<4x1xf32>
    %118 = vector.broadcast %117 : vector<4x1xf32> to vector<4x32xf32>
    %119 = arith.mulf %109, %118 : vector<4x32xf32>
    %120 = vector.broadcast %102 : vector<1x32xf32> to vector<4x32xf32>
    %121 = arith.mulf %119, %120 : vector<4x32xf32>
    %122 = vector.broadcast %103 : vector<1x32xf32> to vector<4x32xf32>
    %123 = arith.addf %121, %122 : vector<4x32xf32>
    %124 = vector.shape_cast %123 : vector<4x32xf32> to vector<1x4x32xf32>
    %c0_46 = arith.constant 0 : index
    %c0_47 = arith.constant 0 : index
    %c0_48 = arith.constant 0 : index
    %125 = vector.load %arg14[%c0_46, %c0_47, %c0_48] : memref<1x4x32xf32, #tpu.memory_space<vmem>>, vector<1x4x32xf32>
    tpu.vector_store %arg14[%c0_46, %c0_47, %c0_48], %124 {strides = array<i32>} : memref<1x4x32xf32, #tpu.memory_space<vmem>>, vector<1x4x32xf32>,
    return
  }
  func.func @transform_0(%arg0: i32) -> (i32, i32, i32) {
    %c0_i32 = arith.constant 0 : i32
    %c0_i32_0 = arith.constant 0 : i32
    %c0_i32_1 = arith.constant 0 : i32
    return %arg0, %c0_i32, %c0_i32_0 : i32, i32, i32
  }
  func.func @transform_1(%arg0: i32) -> (i32, i32) {
    %c0_i32 = arith.constant 0 : i32
    %c0_i32_0 = arith.constant 0 : i32
    %c0_i32_1 = arith.constant 0 : i32
    return %c0_i32, %c0_i32_0 : i32, i32
  }
  func.func @transform_2(%arg0: i32) -> (i32, i32) {
    %c0_i32 = arith.constant 0 : i32
    %c0_i32_0 = arith.constant 0 : i32
    %c0_i32_1 = arith.constant 0 : i32
    return %c0_i32, %c0_i32_0 : i32, i32
  }
  func.func @transform_3(%arg0: i32) -> (i32, i32) {
    %c0_i32 = arith.constant 0 : i32
    %c0_i32_0 = arith.constant 0 : i32
    %c0_i32_1 = arith.constant 0 : i32
    return %c0_i32, %c0_i32_0 : i32, i32
  }
  func.func @transform_4(%arg0: i32) -> (i32, i32) {
    %c0_i32 = arith.constant 0 : i32
    %c0_i32_0 = arith.constant 0 : i32
    %c0_i32_1 = arith.constant 0 : i32
    return %c0_i32, %c0_i32_0 : i32, i32
  }
  func.func @transform_5(%arg0: i32) -> (i32, i32) {
    %c0_i32 = arith.constant 0 : i32
    %c0_i32_0 = arith.constant 0 : i32
    %c0_i32_1 = arith.constant 0 : i32
    return %c0_i32, %c0_i32_0 : i32, i32
  }
  func.func @transform_6(%arg0: i32) -> (i32, i32) {
    %c0_i32 = arith.constant 0 : i32
    %c0_i32_0 = arith.constant 0 : i32
    %c0_i32_1 = arith.constant 0 : i32
    return %c0_i32, %c0_i32_0 : i32, i32
  }
  func.func @transform_7(%arg0: i32) -> (i32, i32) {
    %c0_i32 = arith.constant 0 : i32
    %c0_i32_0 = arith.constant 0 : i32
    %c0_i32_1 = arith.constant 0 : i32
    return %c0_i32, %c0_i32_0 : i32, i32
  }
  func.func @transform_8(%arg0: i32) -> (i32, i32) {
    %c0_i32 = arith.constant 0 : i32
    %c0_i32_0 = arith.constant 0 : i32
    %c0_i32_1 = arith.constant 0 : i32
    return %c0_i32, %c0_i32_0 : i32, i32
  }
  func.func @transform_9(%arg0: i32) -> (i32, i32) {
    %c0_i32 = arith.constant 0 : i32
    %c0_i32_0 = arith.constant 0 : i32
    %c0_i32_1 = arith.constant 0 : i32
    return %c0_i32, %c0_i32_0 : i32, i32
  }
  func.func @transform_10(%arg0: i32) -> (i32, i32) {
    %c0_i32 = arith.constant 0 : i32
    %c0_i32_0 = arith.constant 0 : i32
    %c0_i32_1 = arith.constant 0 : i32
    return %c0_i32, %c0_i32_0 : i32, i32
  }
  func.func @transform_11(%arg0: i32) -> (i32, i32) {
    %c0_i32 = arith.constant 0 : i32
    %c0_i32_0 = arith.constant 0 : i32
    %c0_i32_1 = arith.constant 0 : i32
    return %c0_i32, %c0_i32_0 : i32, i32
  }
  func.func @transform_12(%arg0: i32) -> (i32, i32) {
    %c0_i32 = arith.constant 0 : i32
    %c0_i32_0 = arith.constant 0 : i32
    %c0_i32_1 = arith.constant 0 : i32
    return %c0_i32, %c0_i32_0 : i32, i32
  }
  func.func @transform_13(%arg0: i32) -> (i32, i32, i32) {
    %c0_i32 = arith.constant 0 : i32
    %c0_i32_0 = arith.constant 0 : i32
    %c0_i32_1 = arith.constant 0 : i32
    return %arg0, %c0_i32, %c0_i32_0 : i32, i32, i32
  }
}

module attributes {stable_mosaic.version = 11 : i64} {
  func.func @_encoder_layer_kernel(%arg0: i32, %arg1: memref<1x4x32xf32, #tpu.memory_space<vmem>>, %arg2: memref<32x96xf32, #tpu.memory_space<vmem>>, %arg3: memref<1x96xf32, #tpu.memory_space<vmem>>, %arg4: memref<32x32xf32, #tpu.memory_space<vmem>>, %arg5: memref<1x32xf32, #tpu.memory_space<vmem>>, %arg6: memref<1x32xf32, #tpu.memory_space<vmem>>, %arg7: memref<1x32xf32, #tpu.memory_space<vmem>>, %arg8: memref<32x64xf32, #tpu.memory_space<vmem>>, %arg9: memref<1x64xf32, #tpu.memory_space<vmem>>, %arg10: memref<64x32xf32, #tpu.memory_space<vmem>>, %arg11: memref<1x32xf32, #tpu.memory_space<vmem>>, %arg12: memref<1x32xf32, #tpu.memory_space<vmem>>, %arg13: memref<1x32xf32, #tpu.memory_space<vmem>>, %arg14: memref<1x32xf32, #tpu.memory_space<vmem>>, %arg15: memref<1x32xf32, #tpu.memory_space<vmem>>, %arg16: memref<1x4x32xf32, #tpu.memory_space<vmem>>) attributes {dimension_semantics = [#tpu.dimension_semantics<parallel>], iteration_bounds = array<i64: 2>, scalar_prefetch = 0 : i64, scratch_operands = 0 : i64, tpu.core_type = #tpu.core_type<tc>, window_params = [{transform_indices = @transform_0, window_bounds = array<i64: 1, 4, 32>}, {pipeline_mode = #tpu.pipeline_mode<synchronous>, transform_indices = @transform_1, window_bounds = array<i64: 32, 96>}, {pipeline_mode = #tpu.pipeline_mode<synchronous>, transform_indices = @transform_2, window_bounds = array<i64: 1, 96>}, {pipeline_mode = #tpu.pipeline_mode<synchronous>, transform_indices = @transform_3, window_bounds = array<i64: 32, 32>}, {pipeline_mode = #tpu.pipeline_mode<synchronous>, transform_indices = @transform_4, window_bounds = array<i64: 1, 32>}, {pipeline_mode = #tpu.pipeline_mode<synchronous>, transform_indices = @transform_5, window_bounds = array<i64: 1, 32>}, {pipeline_mode = #tpu.pipeline_mode<synchronous>, transform_indices = @transform_6, window_bounds = array<i64: 1, 32>}, {pipeline_mode = #tpu.pipeline_mode<synchronous>, transform_indices = @transform_7, window_bounds = array<i64: 32, 64>}, {pipeline_mode = #tpu.pipeline_mode<synchronous>, transform_indices = @transform_8, window_bounds = array<i64: 1, 64>}, {pipeline_mode = #tpu.pipeline_mode<synchronous>, transform_indices = @transform_9, window_bounds = array<i64: 64, 32>}, {pipeline_mode = #tpu.pipeline_mode<synchronous>, transform_indices = @transform_10, window_bounds = array<i64: 1, 32>}, {pipeline_mode = #tpu.pipeline_mode<synchronous>, transform_indices = @transform_11, window_bounds = array<i64: 1, 32>}, {pipeline_mode = #tpu.pipeline_mode<synchronous>, transform_indices = @transform_12, window_bounds = array<i64: 1, 32>}, {pipeline_mode = #tpu.pipeline_mode<synchronous>, transform_indices = @transform_13, window_bounds = array<i64: 1, 32>}, {pipeline_mode = #tpu.pipeline_mode<synchronous>, transform_indices = @transform_14, window_bounds = array<i64: 1, 32>}, {transform_indices = @transform_15, window_bounds = array<i64: 1, 4, 32>}]} {
    %c0 = arith.constant 0 : index
    %c0_0 = arith.constant 0 : index
    %c0_1 = arith.constant 0 : index
    %0 = vector.load %arg1[%c0, %c0_0, %c0_1] : memref<1x4x32xf32, #tpu.memory_space<vmem>>, vector<1x4x32xf32>
    %1 = vector.shape_cast %0 : vector<1x4x32xf32> to vector<4x32xf32>
    %c0_2 = arith.constant 0 : index
    %c0_3 = arith.constant 0 : index
    %2 = vector.load %arg2[%c0_2, %c0_3] : memref<32x96xf32, #tpu.memory_space<vmem>>, vector<32x96xf32>
    %cst = arith.constant dense<0.000000e+00> : vector<4x96xf32>
    %3 = tpu.matmul %1, %2, %cst {dimension_numbers = #tpu.dot_dimension_numbers<[1], [0], [0], [1], [0, 0, 1, 1], [], []>} : vector<4x32xf32>, vector<32x96xf32>, vector<4x96xf32> -> vector<4x96xf32>
    %c0_4 = arith.constant 0 : index
    %c0_5 = arith.constant 0 : index
    %4 = vector.load %arg3[%c0_4, %c0_5] : memref<1x96xf32, #tpu.memory_space<vmem>>, vector<1x96xf32>
    %5 = vector.broadcast %4 : vector<1x96xf32> to vector<4x96xf32>
    %6 = arith.addf %3, %5 : vector<4x96xf32>
    %7 = vector.extract_strided_slice %6 {offsets = [0, 0], sizes = [4, 32], strides = [1, 1]} : vector<4x96xf32> to vector<4x32xf32>
    %8 = vector.extract_strided_slice %6 {offsets = [0, 32], sizes = [4, 32], strides = [1, 1]} : vector<4x96xf32> to vector<4x32xf32>
    %9 = vector.extract_strided_slice %6 {offsets = [0, 64], sizes = [4, 32], strides = [1, 1]} : vector<4x96xf32> to vector<4x32xf32>
    %10 = vector.extract_strided_slice %7 {offsets = [0, 0], sizes = [4, 8], strides = [1, 1]} : vector<4x32xf32> to vector<4x8xf32>
    %11 = vector.shape_cast %10 : vector<4x8xf32> to vector<1x4x8xf32>
    %12 = vector.extract_strided_slice %7 {offsets = [0, 8], sizes = [4, 8], strides = [1, 1]} : vector<4x32xf32> to vector<4x8xf32>
    %13 = vector.shape_cast %12 : vector<4x8xf32> to vector<1x4x8xf32>
    %14 = vector.extract_strided_slice %7 {offsets = [0, 16], sizes = [4, 8], strides = [1, 1]} : vector<4x32xf32> to vector<4x8xf32>
    %15 = vector.shape_cast %14 : vector<4x8xf32> to vector<1x4x8xf32>
    %16 = vector.extract_strided_slice %7 {offsets = [0, 24], sizes = [4, 8], strides = [1, 1]} : vector<4x32xf32> to vector<4x8xf32>
    %17 = vector.shape_cast %16 : vector<4x8xf32> to vector<1x4x8xf32>
    %18 = tpu.concatenate %11, %13, %15, %17 in 0 : vector<1x4x8xf32>, vector<1x4x8xf32>, vector<1x4x8xf32>, vector<1x4x8xf32> -> vector<4x4x8xf32>
    %19 = vector.extract_strided_slice %8 {offsets = [0, 0], sizes = [4, 8], strides = [1, 1]} : vector<4x32xf32> to vector<4x8xf32>
    %20 = vector.shape_cast %19 : vector<4x8xf32> to vector<1x4x8xf32>
    %21 = vector.extract_strided_slice %8 {offsets = [0, 8], sizes = [4, 8], strides = [1, 1]} : vector<4x32xf32> to vector<4x8xf32>
    %22 = vector.shape_cast %21 : vector<4x8xf32> to vector<1x4x8xf32>
    %23 = vector.extract_strided_slice %8 {offsets = [0, 16], sizes = [4, 8], strides = [1, 1]} : vector<4x32xf32> to vector<4x8xf32>
    %24 = vector.shape_cast %23 : vector<4x8xf32> to vector<1x4x8xf32>
    %25 = vector.extract_strided_slice %8 {offsets = [0, 24], sizes = [4, 8], strides = [1, 1]} : vector<4x32xf32> to vector<4x8xf32>
    %26 = vector.shape_cast %25 : vector<4x8xf32> to vector<1x4x8xf32>
    %27 = tpu.concatenate %20, %22, %24, %26 in 0 : vector<1x4x8xf32>, vector<1x4x8xf32>, vector<1x4x8xf32>, vector<1x4x8xf32> -> vector<4x4x8xf32>
    %28 = vector.extract_strided_slice %9 {offsets = [0, 0], sizes = [4, 8], strides = [1, 1]} : vector<4x32xf32> to vector<4x8xf32>
    %29 = vector.shape_cast %28 : vector<4x8xf32> to vector<1x4x8xf32>
    %30 = vector.extract_strided_slice %9 {offsets = [0, 8], sizes = [4, 8], strides = [1, 1]} : vector<4x32xf32> to vector<4x8xf32>
    %31 = vector.shape_cast %30 : vector<4x8xf32> to vector<1x4x8xf32>
    %32 = vector.extract_strided_slice %9 {offsets = [0, 16], sizes = [4, 8], strides = [1, 1]} : vector<4x32xf32> to vector<4x8xf32>
    %33 = vector.shape_cast %32 : vector<4x8xf32> to vector<1x4x8xf32>
    %34 = vector.extract_strided_slice %9 {offsets = [0, 24], sizes = [4, 8], strides = [1, 1]} : vector<4x32xf32> to vector<4x8xf32>
    %35 = vector.shape_cast %34 : vector<4x8xf32> to vector<1x4x8xf32>
    %36 = tpu.concatenate %29, %31, %33, %35 in 0 : vector<1x4x8xf32>, vector<1x4x8xf32>, vector<1x4x8xf32>, vector<1x4x8xf32> -> vector<4x4x8xf32>
    "tpu.trace_start"() <{level = 10 : i32, message = "hqd,hkd->hqk"}> : () -> ()
    %cst_6 = arith.constant dense<0.000000e+00> : vector<4x4x4xf32>
    %37 = tpu.matmul %18, %27, %cst_6 {dimension_numbers = #tpu.dot_dimension_numbers<[2], [2], [1], [1], [0, 0, 0, 1, 1, 1], [0], [0]>} : vector<4x4x8xf32>, vector<4x4x8xf32>, vector<4x4x4xf32> -> vector<4x4x4xf32>
    "tpu.trace_stop"() : () -> ()
    %cst_7 = arith.constant 0.353553385 : f32
    %38 = vector.broadcast %cst_7 : f32 to vector<4x4x4xf32>
    %39 = arith.mulf %37, %38 : vector<4x4x4xf32>
    %cst_8 = arith.constant dense<0xFF800000> : vector<4x4xf32>
    %40 = vector.multi_reduction <maximumf>, %39, %cst_8 [2] : vector<4x4x4xf32> to vector<4x4xf32>
    %41 = vector.shape_cast %40 : vector<4x4xf32> to vector<4x4x1xf32>
    %42 = vector.broadcast %41 : vector<4x4x1xf32> to vector<4x4x4xf32>
    %43 = arith.subf %39, %42 : vector<4x4x4xf32>
    %44 = math.exp %43 : vector<4x4x4xf32>
    %cst_9 = arith.constant dense<0.000000e+00> : vector<4x4xf32>
    %45 = vector.multi_reduction <add>, %44, %cst_9 [2] : vector<4x4x4xf32> to vector<4x4xf32>
    %46 = vector.shape_cast %45 : vector<4x4xf32> to vector<4x4x1xf32>
    %cst_10 = arith.constant 1.000000e+00 : f32
    %47 = vector.broadcast %cst_10 : f32 to vector<4x4x1xf32>
    %48 = arith.divf %47, %46 : vector<4x4x1xf32>
    %49 = vector.broadcast %48 : vector<4x4x1xf32> to vector<4x4x4xf32>
    %50 = arith.mulf %44, %49 : vector<4x4x4xf32>
    "tpu.trace_start"() <{level = 10 : i32, message = "hqk,hkd->hqd"}> : () -> ()
    %cst_11 = arith.constant dense<0.000000e+00> : vector<4x4x8xf32>
    %51 = tpu.matmul %50, %36, %cst_11 {dimension_numbers = #tpu.dot_dimension_numbers<[2], [1], [1], [2], [0, 0, 0, 1, 1, 2], [0], [0]>} : vector<4x4x4xf32>, vector<4x4x8xf32>, vector<4x4x8xf32> -> vector<4x4x8xf32>
    "tpu.trace_stop"() : () -> ()
    %52 = vector.extract_strided_slice %51 {offsets = [0, 0, 0], sizes = [1, 4, 8], strides = [1, 1, 1]} : vector<4x4x8xf32> to vector<1x4x8xf32>
    %53 = vector.shape_cast %52 : vector<1x4x8xf32> to vector<4x8xf32>
    %54 = vector.extract_strided_slice %51 {offsets = [1, 0, 0], sizes = [1, 4, 8], strides = [1, 1, 1]} : vector<4x4x8xf32> to vector<1x4x8xf32>
    %55 = vector.shape_cast %54 : vector<1x4x8xf32> to vector<4x8xf32>
    %56 = vector.extract_strided_slice %51 {offsets = [2, 0, 0], sizes = [1, 4, 8], strides = [1, 1, 1]} : vector<4x4x8xf32> to vector<1x4x8xf32>
    %57 = vector.shape_cast %56 : vector<1x4x8xf32> to vector<4x8xf32>
    %58 = vector.extract_strided_slice %51 {offsets = [3, 0, 0], sizes = [1, 4, 8], strides = [1, 1, 1]} : vector<4x4x8xf32> to vector<1x4x8xf32>
    %59 = vector.shape_cast %58 : vector<1x4x8xf32> to vector<4x8xf32>
    %60 = tpu.concatenate %53, %55, %57, %59 in 1 : vector<4x8xf32>, vector<4x8xf32>, vector<4x8xf32>, vector<4x8xf32> -> vector<4x32xf32>
    %c0_12 = arith.constant 0 : index
    %c0_13 = arith.constant 0 : index
    %61 = vector.load %arg4[%c0_12, %c0_13] : memref<32x32xf32, #tpu.memory_space<vmem>>, vector<32x32xf32>
    %cst_14 = arith.constant dense<0.000000e+00> : vector<4x32xf32>
    %62 = tpu.matmul %60, %61, %cst_14 {dimension_numbers = #tpu.dot_dimension_numbers<[1], [0], [0], [1], [0, 0, 1, 1], [], []>} : vector<4x32xf32>, vector<32x32xf32>, vector<4x32xf32> -> vector<4x32xf32>
    %c0_15 = arith.constant 0 : index
    %c0_16 = arith.constant 0 : index
    %63 = vector.load %arg5[%c0_15, %c0_16] : memref<1x32xf32, #tpu.memory_space<vmem>>, vector<1x32xf32>
    %64 = vector.broadcast %63 : vector<1x32xf32> to vector<4x32xf32>
    %65 = arith.addf %62, %64 : vector<4x32xf32>
    %66 = arith.addf %1, %65 : vector<4x32xf32>
    %c0_17 = arith.constant 0 : index
    %c0_18 = arith.constant 0 : index
    %67 = vector.load %arg6[%c0_17, %c0_18] : memref<1x32xf32, #tpu.memory_space<vmem>>, vector<1x32xf32>
    %c0_19 = arith.constant 0 : index
    %c0_20 = arith.constant 0 : index
    %68 = vector.load %arg7[%c0_19, %c0_20] : memref<1x32xf32, #tpu.memory_space<vmem>>, vector<1x32xf32>
    %cst_21 = arith.constant dense<0.000000e+00> : vector<4xf32>
    %69 = vector.multi_reduction <add>, %66, %cst_21 [1] : vector<4x32xf32> to vector<4xf32>
    %70 = vector.shape_cast %69 : vector<4xf32> to vector<4x1xf32>
    %cst_22 = arith.constant 3.200000e+01 : f32
    %71 = vector.broadcast %cst_22 : f32 to vector<4x1xf32>
    %72 = arith.divf %70, %71 : vector<4x1xf32>
    %73 = vector.broadcast %72 : vector<4x1xf32> to vector<4x32xf32>
    %74 = arith.subf %66, %73 : vector<4x32xf32>
    %75 = arith.mulf %74, %74 : vector<4x32xf32>
    %cst_23 = arith.constant dense<0.000000e+00> : vector<4xf32>
    %76 = vector.multi_reduction <add>, %75, %cst_23 [1] : vector<4x32xf32> to vector<4xf32>
    %77 = vector.shape_cast %76 : vector<4xf32> to vector<4x1xf32>
    %cst_24 = arith.constant 3.200000e+01 : f32
    %78 = vector.broadcast %cst_24 : f32 to vector<4x1xf32>
    %79 = arith.divf %77, %78 : vector<4x1xf32>
    %cst_25 = arith.constant 9.99999974E-6 : f32
    %80 = vector.broadcast %cst_25 : f32 to vector<4x1xf32>
    %81 = arith.addf %79, %80 : vector<4x1xf32>
    %82 = math.rsqrt %81 : vector<4x1xf32>
    %83 = vector.broadcast %82 : vector<4x1xf32> to vector<4x32xf32>
    %84 = arith.mulf %74, %83 : vector<4x32xf32>
    %85 = vector.broadcast %67 : vector<1x32xf32> to vector<4x32xf32>
    %86 = arith.mulf %84, %85 : vector<4x32xf32>
    %87 = vector.broadcast %68 : vector<1x32xf32> to vector<4x32xf32>
    %88 = arith.addf %86, %87 : vector<4x32xf32>
    %c0_26 = arith.constant 0 : index
    %c0_27 = arith.constant 0 : index
    %89 = vector.load %arg8[%c0_26, %c0_27] : memref<32x64xf32, #tpu.memory_space<vmem>>, vector<32x64xf32>
    %cst_28 = arith.constant dense<0.000000e+00> : vector<4x64xf32>
    %90 = tpu.matmul %88, %89, %cst_28 {dimension_numbers = #tpu.dot_dimension_numbers<[1], [0], [0], [1], [0, 0, 1, 1], [], []>} : vector<4x32xf32>, vector<32x64xf32>, vector<4x64xf32> -> vector<4x64xf32>
    %c0_29 = arith.constant 0 : index
    %c0_30 = arith.constant 0 : index
    %91 = vector.load %arg9[%c0_29, %c0_30] : memref<1x64xf32, #tpu.memory_space<vmem>>, vector<1x64xf32>
    %92 = vector.broadcast %91 : vector<1x64xf32> to vector<4x64xf32>
    %93 = arith.addf %90, %92 : vector<4x64xf32>
    %cst_31 = arith.constant 0.000000e+00 : f32
    %94 = vector.broadcast %cst_31 : f32 to vector<4x64xf32>
    %95 = arith.maximumf %93, %94 : vector<4x64xf32>
    %c0_32 = arith.constant 0 : index
    %c0_33 = arith.constant 0 : index
    %96 = vector.load %arg10[%c0_32, %c0_33] : memref<64x32xf32, #tpu.memory_space<vmem>>, vector<64x32xf32>
    %cst_34 = arith.constant dense<0.000000e+00> : vector<4x32xf32>
    %97 = tpu.matmul %95, %96, %cst_34 {dimension_numbers = #tpu.dot_dimension_numbers<[1], [0], [0], [1], [0, 0, 1, 1], [], []>} : vector<4x64xf32>, vector<64x32xf32>, vector<4x32xf32> -> vector<4x32xf32>
    %c0_35 = arith.constant 0 : index
    %c0_36 = arith.constant 0 : index
    %98 = vector.load %arg11[%c0_35, %c0_36] : memref<1x32xf32, #tpu.memory_space<vmem>>, vector<1x32xf32>
    %99 = vector.broadcast %98 : vector<1x32xf32> to vector<4x32xf32>
    %100 = arith.addf %97, %99 : vector<4x32xf32>
    %101 = arith.addf %88, %100 : vector<4x32xf32>
    %c0_37 = arith.constant 0 : index
    %c0_38 = arith.constant 0 : index
    %102 = vector.load %arg12[%c0_37, %c0_38] : memref<1x32xf32, #tpu.memory_space<vmem>>, vector<1x32xf32>
    %c0_39 = arith.constant 0 : index
    %c0_40 = arith.constant 0 : index
    %103 = vector.load %arg13[%c0_39, %c0_40] : memref<1x32xf32, #tpu.memory_space<vmem>>, vector<1x32xf32>
    %cst_41 = arith.constant dense<0.000000e+00> : vector<4xf32>
    %104 = vector.multi_reduction <add>, %101, %cst_41 [1] : vector<4x32xf32> to vector<4xf32>
    %105 = vector.shape_cast %104 : vector<4xf32> to vector<4x1xf32>
    %cst_42 = arith.constant 3.200000e+01 : f32
    %106 = vector.broadcast %cst_42 : f32 to vector<4x1xf32>
    %107 = arith.divf %105, %106 : vector<4x1xf32>
    %108 = vector.broadcast %107 : vector<4x1xf32> to vector<4x32xf32>
    %109 = arith.subf %101, %108 : vector<4x32xf32>
    %110 = arith.mulf %109, %109 : vector<4x32xf32>
    %cst_43 = arith.constant dense<0.000000e+00> : vector<4xf32>
    %111 = vector.multi_reduction <add>, %110, %cst_43 [1] : vector<4x32xf32> to vector<4xf32>
    %112 = vector.shape_cast %111 : vector<4xf32> to vector<4x1xf32>
    %cst_44 = arith.constant 3.200000e+01 : f32
    %113 = vector.broadcast %cst_44 : f32 to vector<4x1xf32>
    %114 = arith.divf %112, %113 : vector<4x1xf32>
    %cst_45 = arith.constant 9.99999974E-6 : f32
    %115 = vector.broadcast %cst_45 : f32 to vector<4x1xf32>
    %116 = arith.addf %114, %115 : vector<4x1xf32>
    %117 = math.rsqrt %116 : vector<4x1xf32>
    %118 = vector.broadcast %117 : vector<4x1xf32> to vector<4x32xf32>
    %119 = arith.mulf %109, %118 : vector<4x32xf32>
    %120 = vector.broadcast %102 : vector<1x32xf32> to vector<4x32xf32>
    %121 = arith.mulf %119, %120 : vector<4x32xf32>
    %122 = vector.broadcast %103 : vector<1x32xf32> to vector<4x32xf32>
    %123 = arith.addf %121, %122 : vector<4x32xf32>
    %c0_46 = arith.constant 0 : index
    %c0_47 = arith.constant 0 : index
    %124 = vector.load %arg14[%c0_46, %c0_47] : memref<1x32xf32, #tpu.memory_space<vmem>>, vector<1x32xf32>
    %c0_48 = arith.constant 0 : index
    %c0_49 = arith.constant 0 : index
    %125 = vector.load %arg15[%c0_48, %c0_49] : memref<1x32xf32, #tpu.memory_space<vmem>>, vector<1x32xf32>
    %cst_50 = arith.constant dense<0.000000e+00> : vector<4xf32>
    %126 = vector.multi_reduction <add>, %123, %cst_50 [1] : vector<4x32xf32> to vector<4xf32>
    %127 = vector.shape_cast %126 : vector<4xf32> to vector<4x1xf32>
    %cst_51 = arith.constant 3.200000e+01 : f32
    %128 = vector.broadcast %cst_51 : f32 to vector<4x1xf32>
    %129 = arith.divf %127, %128 : vector<4x1xf32>
    %130 = vector.broadcast %129 : vector<4x1xf32> to vector<4x32xf32>
    %131 = arith.subf %123, %130 : vector<4x32xf32>
    %132 = arith.mulf %131, %131 : vector<4x32xf32>
    %cst_52 = arith.constant dense<0.000000e+00> : vector<4xf32>
    %133 = vector.multi_reduction <add>, %132, %cst_52 [1] : vector<4x32xf32> to vector<4xf32>
    %134 = vector.shape_cast %133 : vector<4xf32> to vector<4x1xf32>
    %cst_53 = arith.constant 3.200000e+01 : f32
    %135 = vector.broadcast %cst_53 : f32 to vector<4x1xf32>
    %136 = arith.divf %134, %135 : vector<4x1xf32>
    %cst_54 = arith.constant 9.99999974E-6 : f32
    %137 = vector.broadcast %cst_54 : f32 to vector<4x1xf32>
    %138 = arith.addf %136, %137 : vector<4x1xf32>
    %139 = math.rsqrt %138 : vector<4x1xf32>
    %140 = vector.broadcast %139 : vector<4x1xf32> to vector<4x32xf32>
    %141 = arith.mulf %131, %140 : vector<4x32xf32>
    %142 = vector.broadcast %124 : vector<1x32xf32> to vector<4x32xf32>
    %143 = arith.mulf %141, %142 : vector<4x32xf32>
    %144 = vector.broadcast %125 : vector<1x32xf32> to vector<4x32xf32>
    %145 = arith.addf %143, %144 : vector<4x32xf32>
    %146 = vector.shape_cast %145 : vector<4x32xf32> to vector<1x4x32xf32>
    %c0_55 = arith.constant 0 : index
    %c0_56 = arith.constant 0 : index
    %c0_57 = arith.constant 0 : index
    %147 = vector.load %arg16[%c0_55, %c0_56, %c0_57] : memref<1x4x32xf32, #tpu.memory_space<vmem>>, vector<1x4x32xf32>
    tpu.vector_store %arg16[%c0_55, %c0_56, %c0_57], %146 {strides = array<i32>} : memref<1x4x32xf32, #tpu.memory_space<vmem>>, vector<1x4x32xf32>,
    return
  }
  func.func @transform_0(%arg0: i32) -> (i32, i32, i32) {
    %c0_i32 = arith.constant 0 : i32
    %c0_i32_0 = arith.constant 0 : i32
    %c0_i32_1 = arith.constant 0 : i32
    return %arg0, %c0_i32, %c0_i32_0 : i32, i32, i32
  }
  func.func @transform_1(%arg0: i32) -> (i32, i32) {
    %c0_i32 = arith.constant 0 : i32
    %c0_i32_0 = arith.constant 0 : i32
    %c0_i32_1 = arith.constant 0 : i32
    return %c0_i32, %c0_i32_0 : i32, i32
  }
  func.func @transform_2(%arg0: i32) -> (i32, i32) {
    %c0_i32 = arith.constant 0 : i32
    %c0_i32_0 = arith.constant 0 : i32
    %c0_i32_1 = arith.constant 0 : i32
    return %c0_i32, %c0_i32_0 : i32, i32
  }
  func.func @transform_3(%arg0: i32) -> (i32, i32) {
    %c0_i32 = arith.constant 0 : i32
    %c0_i32_0 = arith.constant 0 : i32
    %c0_i32_1 = arith.constant 0 : i32
    return %c0_i32, %c0_i32_0 : i32, i32
  }
  func.func @transform_4(%arg0: i32) -> (i32, i32) {
    %c0_i32 = arith.constant 0 : i32
    %c0_i32_0 = arith.constant 0 : i32
    %c0_i32_1 = arith.constant 0 : i32
    return %c0_i32, %c0_i32_0 : i32, i32
  }
  func.func @transform_5(%arg0: i32) -> (i32, i32) {
    %c0_i32 = arith.constant 0 : i32
    %c0_i32_0 = arith.constant 0 : i32
    %c0_i32_1 = arith.constant 0 : i32
    return %c0_i32, %c0_i32_0 : i32, i32
  }
  func.func @transform_6(%arg0: i32) -> (i32, i32) {
    %c0_i32 = arith.constant 0 : i32
    %c0_i32_0 = arith.constant 0 : i32
    %c0_i32_1 = arith.constant 0 : i32
    return %c0_i32, %c0_i32_0 : i32, i32
  }
  func.func @transform_7(%arg0: i32) -> (i32, i32) {
    %c0_i32 = arith.constant 0 : i32
    %c0_i32_0 = arith.constant 0 : i32
    %c0_i32_1 = arith.constant 0 : i32
    return %c0_i32, %c0_i32_0 : i32, i32
  }
  func.func @transform_8(%arg0: i32) -> (i32, i32) {
    %c0_i32 = arith.constant 0 : i32
    %c0_i32_0 = arith.constant 0 : i32
    %c0_i32_1 = arith.constant 0 : i32
    return %c0_i32, %c0_i32_0 : i32, i32
  }
  func.func @transform_9(%arg0: i32) -> (i32, i32) {
    %c0_i32 = arith.constant 0 : i32
    %c0_i32_0 = arith.constant 0 : i32
    %c0_i32_1 = arith.constant 0 : i32
    return %c0_i32, %c0_i32_0 : i32, i32
  }
  func.func @transform_10(%arg0: i32) -> (i32, i32) {
    %c0_i32 = arith.constant 0 : i32
    %c0_i32_0 = arith.constant 0 : i32
    %c0_i32_1 = arith.constant 0 : i32
    return %c0_i32, %c0_i32_0 : i32, i32
  }
  func.func @transform_11(%arg0: i32) -> (i32, i32) {
    %c0_i32 = arith.constant 0 : i32
    %c0_i32_0 = arith.constant 0 : i32
    %c0_i32_1 = arith.constant 0 : i32
    return %c0_i32, %c0_i32_0 : i32, i32
  }
  func.func @transform_12(%arg0: i32) -> (i32, i32) {
    %c0_i32 = arith.constant 0 : i32
    %c0_i32_0 = arith.constant 0 : i32
    %c0_i32_1 = arith.constant 0 : i32
    return %c0_i32, %c0_i32_0 : i32, i32
  }
  func.func @transform_13(%arg0: i32) -> (i32, i32) {
    %c0_i32 = arith.constant 0 : i32
    %c0_i32_0 = arith.constant 0 : i32
    %c0_i32_1 = arith.constant 0 : i32
    return %c0_i32, %c0_i32_0 : i32, i32
  }
  func.func @transform_14(%arg0: i32) -> (i32, i32) {
    %c0_i32 = arith.constant 0 : i32
    %c0_i32_0 = arith.constant 0 : i32
    %c0_i32_1 = arith.constant 0 : i32
    return %c0_i32, %c0_i32_0 : i32, i32
  }
  func.func @transform_15(%arg0: i32) -> (i32, i32, i32) {
    %c0_i32 = arith.constant 0 : i32
    %c0_i32_0 = arith.constant 0 : i32
    %c0_i32_1 = arith.constant 0 : i32
    return %arg0, %c0_i32, %c0_i32_0 : i32, i32, i32
  }
}

</mosaic_0001>

<bundles_post_ra>
// kernel: seq_transformer_forward.5
= control target key start
LH: loop header
LB: loop body
LE: loop exit
PB: predicated region body
PF: predicated region fallthrough
CT: control target
= control target key end

     0   :  { %s493_s18 = smov 0   ;;  %s525_s0 = inlined_call_operand.vmem [shape: f32[2,16,32], index: 0, kind: input, shape index: {}]   ;;  %s526_s1 = inlined_call_operand.vmem [shape: f32[2,16,6], index: 1, kind: input, shape index: {}]   ;;  %s527_s2 = inlined_call_operand.vmem [shape: f32[6,32], index: 2, kind: input, shape index: {}]   ;;  %s528_s3 = inlined_call_operand.vmem [shape: f32[1,32], index: 3, kind: input, shape index: {}]   ;;  %s529_s4 = inlined_call_operand.vmem [shape: f32[16,32], index: 4, kind: input, shape index: {}]   ;;  %s530_s5 = inlined_call_operand.vmem [shape: f32[2,16,32], index: 5, kind: output, shape index: {}]  }
   0x1 LB: > { %s419_s19 = sadd.s32 4294967295, %s461_s18   ;;  %p423_p0 = scmp.ge.s32.totalorder %s461_s18, 1  ;;  %s461_s18 = sphi %s493_s18, %s15_s18  }
   0x2   : > { %p197_p1 = scmp.lt.s32.totalorder %s461_s18, 3 }
   0x4   : > { %p198_p2 = pnand %p423_p0, %p197_p1 }
   0x5   : > { %v247_v0 = vld [vmem:[%s527_s2] sm:$0x3f] (!%p198_p2)  ;;  %vm262_vm0 = vcmask (!%p198_p2), 1045504   ;;  %p230_p3 = scmp.lt.s32.totalorder (!%p198_p2), %s419_s19, 1  ;;  %vm255_vm1 = vcmask (!%p198_p2), 48128   ;;  %v346_v9 = vld [vmem:[%s529_s4 + $0x8] sm:$0xff] (!%p198_p2) }
   0x6   : > { %201 = sbr.rel (%p198_p2) target bundleno = 238 (0xee), region = 40  ;;  %442 = vmatprep.subr.msk.mxu0 (!%p198_p2), %vm262_vm0, %v247_v0  ;;  %v430_v3 = vld [vmem:[%s528_s3] ss:$0 sm:$0xff] (!%p198_p2)  ;;  %vm349_vm2 = vcmask (!%p198_p2), 261120  }
   0x7   : > { %443 = vmatpush3.msk.msra.mxu0 (!%p198_p2), %vm262_vm0, %v247_v0  ;;  %v345_v12 = vld [vmem:[%s529_s4] sm:$0xff] (!%p198_p2) }
   0xd   : > { %s532_s19 = smov (!%p230_p3, %s419_s19), 1 }
   0xe   : > { %s436_s22 = sshll.u32 %s532_s19, 4 }
   0xf   : > { %s239_s25 = scalar_lea.vmem %s526_s1, %s436_s22  ;;  %s234_s28 = scalar_lea.vmem %s525_s0, %s436_s22 }
  0x10   : > { %v245_v1 = vld [vmem:[%s239_s25] sm:$0xff]  ;;  %v246_v2 = vld [vmem:[%s239_s25 + $0x8] sm:$0xff]  ;;  %s244_s12 = scalar_lea.vmem %s530_s5, %s436_s22 }
  0x11   : > { %444 = vmatprep.mubr.msk.f32.mxu0 %vm255_vm1, %v245_v1  ;;  %v342_v5 = vld [vmem:[%s234_s28 + $0x8] sm:$0xff]  ;;  %v341_v8 = vld [vmem:[%s234_s28] sm:$0xff] }
  0x12   : > { %445 = vmatmul.mubr.msk.f32.vlgmr.msra.gmra.mrb[0].mxu0 %vm255_vm1, %v246_v2 }
  0xe5   : > { %v446_v4 = vpop.f32.mrb[0].mxu0 }
  0xe6   : > { %v338_v6 = vadd.f32 %v446_v4, %v430_v3  ;;  %v332_v7 = vpop.f32.mrb[1].mxu0 }
  0xe7   : > { %v333_v10 = vadd.f32 %v430_v3, %v332_v7 }
  0xe8   : > { %v344_v11 = vadd.f32 %v342_v5, %v338_v6 }
  0xe9   : > { %v343_v13 = vadd.f32 %v341_v8, %v333_v10 }
  0xea   : > { %v348_v14 = vadd.f32 %v346_v9, %v344_v11 }
  0xeb   : > { %v347_v15 = vadd.f32 %v345_v12, %v343_v13 }
  0xec   : > { %351 = vst.msk [vmem:[%s244_s12 + $0x8] sm:$0xff] %vm349_vm2, %v348_v14 }
  0xed   : > { %350 = vst.msk [vmem:[%s244_s12] sm:$0xff] %vm349_vm2, %v347_v15 }
  0xee PF: > { %s15_s18 = sadd.s32 1, %s461_s18  }
  0xef   : > { %p12_p4 = scmp.ge.s32.totalorder %s15_s18, 4  }
  0xf1   :  { %14 = sbr.rel (!%p12_p4) target bundleno = 1 (0x1), region = 73 }

// kernel: seq_transformer_forward.7
= control target key start
LH: loop header
LB: loop body
LE: loop exit
PB: predicated region body
PF: predicated region fallthrough
CT: control target
= control target key end

     0   :  { %s971_s24 = smov 0   ;;  %s1115_s0 = inlined_call_operand.vmem [shape: f32[2,8,32], index: 0, kind: input, shape index: {}]   ;;  %s1116_s1 = inlined_call_operand.vmem [shape: f32[96,32], index: 1, kind: input, shape index: {}]   ;;  %s1117_s2 = inlined_call_operand.vmem [shape: f32[1,32], index: 2, kind: input, shape index: {}]   ;;  %s1118_s3 = inlined_call_operand.vmem [shape: f32[96,32], index: 3, kind: input, shape index: {}]   ;;  %s1119_s4 = inlined_call_operand.vmem [shape: f32[1,32], index: 4, kind: input, shape index: {}]   ;;  %s1120_s5 = inlined_call_operand.vmem [shape: f32[1,32], index: 5, kind: input, shape index: {}]   ;;  %s1121_s6 = inlined_call_operand.vmem [shape: f32[1,32], index: 6, kind: input, shape index: {}]   ;;  %s1122_s7 = inlined_call_operand.vmem [shape: f32[2,4,32], index: 7, kind: output, shape index: {}]  }
   0x1 LB: > { %s752_s25 = sadd.s32 4294967295, %s924_s24   ;;  %p756_p0 = scmp.ge.s32.totalorder %s924_s24, 1  ;;  %s924_s24 = sphi %s971_s24, %s17_s24  }
   0x2   : > { %p236_p1 = scmp.lt.s32.totalorder %s924_s24, 3 }
   0x4   : > { %p237_p2 = pnand %p756_p0, %p236_p1 }
   0x5   : > { %p266_p3 = scmp.lt.s32.totalorder (!%p237_p2), %s752_s25, 1  ;;  %v275_v0 = vld [vmem:[%s1116_s1] sm:$0xff] (!%p237_p2)  ;;  %v276_v1 = vld [vmem:[%s1116_s1 + $0x8] sm:$0xff] (!%p237_p2)  ;;  %v926_v2 = vmov (!%p237_p2), 0.0|0.0   ;;  %v277_v4 = vld [vmem:[%s1116_s1 + $0x10] sm:$0xff] (!%p237_p2)  ;;  %vm927_vm0 = vmmov (!%p237_p2), 0   ;;  %v397_v36 = vlaneseq (!%p237_p2) }
   0x6   : > { %240 = sbr.rel (%p237_p2) target bundleno = 1241 (0x4d9), region = 48  ;;  %865 = vmatprep.subr.bf16.mxu0 (!%p237_p2), %v926_v2  ;;  %v866_v3 = vpack.c.bf16 (!%p237_p2), %v276_v1, %v275_v0  ;;  %v278_v5 = vld [vmem:[%s1116_s1 + $0x18] sm:$0xff] (!%p237_p2)  ;;  %v279_v7 = vld [vmem:[%s1116_s1 + $0x20] sm:$0xff] (!%p237_p2)  ;;  %v280_v8 = vld [vmem:[%s1116_s1 + $0x28] sm:$0xff] (!%p237_p2)  ;;  %v928_v9 = vmov (!%p237_p2), 0.0   ;;  %vm295_vm1 = vcmask (!%p237_p2), 1046528  }
   0x7   : > { %v869_v6 = vpack.c.bf16 (!%p237_p2), %v278_v5, %v277_v4  ;;  %825 = vmatprep.mubr.msk.f32.mxu0 (!%p237_p2), %vm927_vm0, %v928_v9  ;;  %833 = vmatprep.subr.mxu1 (!%p237_p2), %v928_v9  ;;  %s929_s19 = smov (!%p237_p2), 32   ;;  %v872_v12 = vpack.c.bf16 (!%p237_p2), %v280_v8, %v279_v7  ;;  %v281_v13 = vld [vmem:[%s1116_s1 + $0x30] sm:$0xff] (!%p237_p2)  ;;  %v282_v14 = vld [vmem:[%s1116_s1 + $0x38] sm:$0xff] (!%p237_p2)  ;;  %s930_s26 = smov (!%p237_p2), 64   ;;  %v283_v17 = vld [vmem:[%s1116_s1 + $0x40] sm:$0xff] (!%p237_p2)  ;;  %vm291_vm2 = vcmask (!%p237_p2), 1040384  }
   0x8   : > { %867 = vmatpush3.bf16.msra.mxu0 (!%p237_p2), %v866_v3  ;;  %835 = vmatprep.mubr.msk.f32.mxu1 (!%p237_p2), %vm927_vm0, %v928_v9  ;;  %v875_v16 = vpack.c.bf16 (!%p237_p2), %v282_v14, %v281_v13  ;;  %v284_v18 = vld [vmem:[%s1116_s1 + $0x48] sm:$0xff] (!%p237_p2)  ;;  %v285_v20 = vld [vmem:[%s1116_s1 + $0x50] sm:$0xff] (!%p237_p2)  ;;  %v286_v21 = vld [vmem:[%s1116_s1 + $0x58] sm:$0xff] (!%p237_p2)  ;;  %vm304_vm3 = vcmask (!%p237_p2), 261120   ;;  %vm306_vm4 = vcmask (!%p237_p2), 523264   ;;  %vm314_vm5 = vcmask (!%p237_p2), 785408  }
   0x9   : > { %868 = vmatprep.subr.bf16.mxu0 (!%p237_p2), %v926_v2  ;;  %v878_v19 = vpack.c.bf16 (!%p237_p2), %v284_v18, %v283_v17  ;;  %v881_v22 = vpack.c.bf16 (!%p237_p2), %v286_v21, %v285_v20  ;;  %v759_v29 = vld [vmem:[%s1117_s2] ss:$0 sm:$0xff] (!%p237_p2)  ;;  %v398_v39 = vshrl.u32 (!%p237_p2), %v397_v36, 7  ;;  %v400_v41 = vand.u32 (!%p237_p2), 127, %v397_v36  ;;  %v558_v50 = vld [vmem:[%s1118_s3 + $0x8] sm:$0xff] (!%p237_p2)  ;;  %v559_v51 = vld [vmem:[%s1118_s3 + $0x10] sm:$0xff] (!%p237_p2) }
   0xa   : > { %vm405_vm8 = vcmask (!%p237_p2), 64512   ;;  %v557_v49 = vld [vmem:[%s1118_s3] sm:$0xff] (!%p237_p2)  ;;  %v560_v53 = vld [vmem:[%s1118_s3 + $0x18] sm:$0xff] (!%p237_p2)  ;;  %v562_v56 = vld [vmem:[%s1118_s3 + $0x28] sm:$0xff] (!%p237_p2)  ;;  %vm576_vm9 = vcmask (!%p237_p2), 1042432   ;;  %vm668_vm10 = vcmask (!%p237_p2), 257024  }
   0xb   : > { %v401_v40 = vmul.u32 (!%p237_p2), 2, %v398_v39  ;;  %v884_v52 = vpack.c.bf16 (!%p237_p2), %v558_v50, %v557_v49  ;;  %v887_v54 = vpack.c.bf16 (!%p237_p2), %v560_v53, %v559_v51  ;;  %v561_v55 = vld [vmem:[%s1118_s3 + $0x20] sm:$0xff] (!%p237_p2)  ;;  %v563_v58 = vld [vmem:[%s1118_s3 + $0x30] sm:$0xff] (!%p237_p2)  ;;  %v564_v59 = vld [vmem:[%s1118_s3 + $0x38] sm:$0xff] (!%p237_p2) }
   0xc   : > { %870 = vmatpush3.bf16.msra.mxu0 (!%p237_p2), %v869_v6  ;;  %v890_v57 = vpack.c.bf16 (!%p237_p2), %v562_v56, %v561_v55  ;;  %v893_v60 = vpack.c.bf16 (!%p237_p2), %v564_v59, %v563_v58  ;;  %v565_v61 = vld [vmem:[%s1118_s3 + $0x40] sm:$0xff] (!%p237_p2)  ;;  %v566_v62 = vld [vmem:[%s1118_s3 + $0x48] sm:$0xff] (!%p237_p2)  ;;  %v567_v0 = vld [vmem:[%s1118_s3 + $0x50] sm:$0xff] (!%p237_p2) }
   0xd   : > { %s1124_s25 = smov (!%p266_p3, %s752_s25), 1  ;;  %871 = vmatprep.subr.bf16.mxu0 %v926_v2  ;;  %v479_v42 = vadd.s32 1, %v401_v40  ;;  %vm402_vm6 = vcmp.eq.s32.totalorder %v400_v41, %v401_v40  ;;  %v896_v63 = vpack.c.bf16 %v566_v62, %v565_v61  ;;  %v568_v1 = vld [vmem:[%s1118_s3 + $0x58] sm:$0xff] }
   0xe   : > { %s757_s11 = sshll.u32 %s1124_s25, 3  ;;  %v761_v47 = vsel %vm402_vm6, 1.0, %v928_v9  ;;  %v899_v3 = vpack.c.bf16 %v568_v1, %v567_v0  ;;  %s758_s27 = sshll.u32 %s1124_s25, 2 }
   0xf   : > { %s269_s18 = scalar_lea.vmem %s1115_s0, %s757_s11  ;;  %vm480_vm7 = vcmp.eq.s32.totalorder %v400_v41, %v479_v42  ;;  %s273_s30 = scalar_lea.vmem %s1122_s7, %s758_s27 }
  0x10   : > { %v274_v10 = vld [vmem:[%s269_s18] sm:$0xff]  ;;  %873 = vmatpush3.bf16.msra.mxu0 %v872_v12  ;;  %v763_v48 = vsel %vm480_vm7, 1.0, %v928_v9 }
  0x11   : > { %297 = vrot.lane.b32.xlu0 %v274_v10, %s929_s19  ;;  %v293_v11 = vrot.slane %v274_v10, 1  ;;  %874 = vmatprep.subr.bf16.mxu0 %v926_v2  ;;  %v289_v23 = vrot.slane %v274_v10, 7 }
  0x13   : > { %v296_v15 = vsel %vm295_vm1, %v293_v11, 0.0  ;;  %v292_v25 = vsel %vm291_vm2, 0.0, %v289_v23 }
  0x14   : > { %876 = vmatpush3.bf16.msra.mxu0 %v875_v16  ;;  %v765_v16 = vld [vmem:[%s1119_s4] ss:$0 sm:$0xff] }
  0x15   : > { %301 = vrot.lane.b32.xlu0 %v296_v15, %s930_s26  ;;  %877 = vmatprep.subr.bf16.mxu0 %v926_v2 }
  0x18   : > { %879 = vmatpush3.bf16.msra.mxu0 %v878_v19 }
  0x19   : > { %880 = vmatprep.subr.bf16.mxu0 %v926_v2 }
  0x1c   : > { %882 = vmatpush3.bf16.msra.mxu0 %v881_v22 }
  0x1d   : > { %828 = vmatprep.subr.mxu0 %v928_v9 }
  0x83   : > { %v298_v24 = vpop.permute.xlu0 %297 }
  0x84   : > { %v305_v26 = vsel %vm304_vm3, %v292_v25, %v298_v24 }
  0x87   : > { %v302_v27 = vpop.permute.xlu0 %301 }
  0x88   : > { %v307_v28 = vsel %vm306_vm4, %v305_v26, %v302_v27 }
  0x89   : > { %826 = vmatmul.mubr.msk.f32.vlgmr.msra.gmra.mrb[0].mxu0 %vm314_vm5, %v307_v28 }
  0x8a   : > { %830 = vmatprep.mubr.msk.f32.mxu0 %vm927_vm0, %v928_v9 }
 0x15c   : > { %v384_v30 = vpop.f32.mrb[0].mxu0 }
 0x15d   : > { %v385_v31 = vadd.f32 %v759_v29, %v384_v30  ;;  %v827_v32 = vpop.f32.mrb[1].mxu0  ;;  %v767_v30 = vld [vmem:[%s1120_s5] ss:$0 sm:$0xff] }
 0x15e   : > { %v768_v32 = vld [vmem:[%s1121_s6] ss:$0 sm:$0xff] }
 0x15f   : > { %v389_v33 = vmul.f32 0.044715, %v385_v31  ;;  %v388_v44 = vmul.f32 0.5, %v385_v31 }
 0x161   : > { %v390_v34 = vmul.f32 %v389_v33, %v385_v31 }
 0x163   : > { %v391_v35 = vmul.f32 %v390_v34, %v385_v31 }
 0x165   : > { %v392_v37 = vadd.f32 %v391_v35, %v385_v31 }
 0x167   : > { %v393_v38 = vmul.f32 0.7978846, %v392_v37 }
 0x169   : > { %914 = vtanh.f32 %v393_v38 }
 0x173   : > { %v915_v43 = vpop.eup %914 }
 0x174   : > { %v395_v45 = vadd.f32 1.0, %v915_v43 }
 0x176   : > { %v396_v46 = vmul.f32 %v395_v45, %v388_v44 }
 0x178   : > { %829 = vmatpush3.msra.mxu0 %v396_v46  ;;  %834 = vmatpush3.msra.mxu1 %v396_v46 }
 0x179   : > { %831 = vmatmul.mubr.msk.f32.vlgmr.msra.gmra.mrb[2].mxu0 %vm405_vm8, %v761_v47  ;;  %836 = vmatmul.mubr.msk.f32.vlgmr.msra.gmra.mrb[0].mxu1 %vm405_vm8, %v763_v48 }
 0x17a   : > { %883 = vmatprep.subr.bf16.mxu1 %v926_v2  ;;  %862 = vmatprep.mubr.msk.f32.mxu1 %vm927_vm0, %v928_v9 }
 0x17b   : > { %885 = vmatpush3.bf16.msra.mxu1 %v884_v52 }
 0x17c   : > { %886 = vmatprep.subr.bf16.mxu1 %v926_v2 }
 0x17f   : > { %888 = vmatpush3.bf16.msra.mxu1 %v887_v54 }
 0x180   : > { %889 = vmatprep.subr.bf16.mxu1 %v926_v2 }
 0x183   : > { %891 = vmatpush3.bf16.msra.mxu1 %v890_v57 }
 0x184   : > { %892 = vmatprep.subr.bf16.mxu1 %v926_v2 }
 0x187   : > { %894 = vmatpush3.bf16.msra.mxu1 %v893_v60 }
 0x188   : > { %895 = vmatprep.subr.bf16.mxu1 %v926_v2 }
 0x18b   : > { %897 = vmatpush3.bf16.msra.mxu1 %v896_v63 }
 0x18c   : > { %898 = vmatprep.subr.bf16.mxu1 %v926_v2 }
 0x18f   : > { %900 = vmatpush3.bf16.msra.mxu1 %v899_v3 }
 0x24c   : > { %v475_v4 = vpop.f32.mrb[2].mxu0  ;;  %v552_v5 = vpop.f32.mrb[0].mxu1 }
 0x24d   : > { %v556_v6 = vmax.f32 %v475_v4, %v552_v5  ;;  %v837_v7 = vpop.f32.mrb[1].mxu1  ;;  %v832_v8 = vpop.f32.mrb[3].mxu0 }
 0x24f   : > { %578 = vrot.lane.b32.xlu1 %v556_v6, %s929_s19  ;;  %v574_v9 = vrot.slane %v556_v6, 1  ;;  %v571_v10 = vrot.slane %v556_v6, 7 }
 0x251   : > { %v577_v2 = vsel %vm576_vm9, %v574_v9, 0.0  ;;  %v573_v12 = vsel %vm291_vm2, 0.0, %v571_v10 }
 0x253   : > { %582 = vrot.lane.b32.xlu1 %v577_v2, %s930_s26 }
 0x2c1   : > { %v579_v11 = vpop.permute.xlu1 %578 }
 0x2c2   : > { %v585_v13 = vsel %vm304_vm3, %v573_v12, %v579_v11 }
 0x2c5   : > { %v583_v14 = vpop.permute.xlu1 %582 }
 0x2c6   : > { %v586_v15 = vsel %vm306_vm4, %v585_v13, %v583_v14 }
 0x2c7   : > { %863 = vmatmul.mubr.msk.f32.vlgmr.msra.gmra.mrb[2].mxu1 %vm314_vm5, %v586_v15 }
 0x39a   : > { %v662_v17 = vpop.f32.mrb[2].mxu1 }
 0x39b   : > { %v663_v18 = vadd.f32 %v765_v16, %v662_v17  ;;  %v864_v19 = vpop.f32.mrb[3].mxu1 }
 0x39d   : > { %v669_v20 = vsel %vm668_vm10, %v663_v18, 0.0 }
 0x39e   : > { %670 = vadd.xlane.f32.xlu0 %v669_v20 }
 0x42b   : > { %v671_v21 = vpop.xlane.xlu0 %670 }
 0x42c   : > { %v673_v22 = vmul.f32 0.03125, %v671_v21 }
 0x42e   : > { %v674_v23 = vsub.f32 %v663_v18, %v673_v22 }
 0x430   : > { %v675_v24 = vmul.f32 %v674_v23, %v674_v23 }
 0x432   : > { %v676_v25 = vsel %vm668_vm10, %v675_v24, 0.0 }
 0x433   : > { %677 = vadd.xlane.f32.xlu1 %v676_v25 }
 0x4c0   : > { %v678_v26 = vpop.xlane.xlu1 %677 }
 0x4c1   : > { %v679_v27 = vmul.f32 0.03125, %v678_v26 }
 0x4c3   : > { %v680_v28 = vadd.f32 1e-05, %v679_v27 }
 0x4c5   : > { %916 = vrsqrt.f32 %v680_v28 }
 0x4cf   : > { %v917_v29 = vpop.eup %916 }
 0x4d0   : > { %v682_v31 = vmul.f32 %v917_v29, %v674_v23 }
 0x4d2   : > { %v689_v33 = vmul.f32 %v767_v30, %v682_v31 }
 0x4d4   : > { %v696_v34 = vadd.f32 %v768_v32, %v689_v33 }
 0x4d6   : > { %v697_v35 = vadd.f32 %v696_v34, %v556_v6 }
 0x4d8   : > { %698 = vst.msk [vmem:[%s273_s30] sm:$0xf] %vm668_vm10, %v697_v35 }
 0x4d9 PF: > { %s17_s24 = sadd.s32 1, %s924_s24  }
 0x4da   : > { %p14_p4 = scmp.ge.s32.totalorder %s17_s24, 4  }
 0x4dc   :  { %16 = sbr.rel (!%p14_p4) target bundleno = 1 (0x1), region = 78 }

// kernel: seq_transformer_forward.6
= control target key start
LH: loop header
LB: loop body
LE: loop exit
PB: predicated region body
PF: predicated region fallthrough
CT: control target
= control target key end

     0   :  { %s1028_s24 = smov 0   ;;  %s1168_s0 = inlined_call_operand.vmem [shape: f32[2,16,32], index: 0, kind: input, shape index: {}]   ;;  %s1169_s1 = inlined_call_operand.vmem [shape: f32[96,32], index: 1, kind: input, shape index: {}]   ;;  %s1170_s2 = inlined_call_operand.vmem [shape: f32[1,32], index: 2, kind: input, shape index: {}]   ;;  %s1171_s3 = inlined_call_operand.vmem [shape: f32[96,32], index: 3, kind: input, shape index: {}]   ;;  %s1172_s4 = inlined_call_operand.vmem [shape: f32[1,32], index: 4, kind: input, shape index: {}]   ;;  %s1173_s5 = inlined_call_operand.vmem [shape: f32[1,32], index: 5, kind: input, shape index: {}]   ;;  %s1174_s6 = inlined_call_operand.vmem [shape: f32[1,32], index: 6, kind: input, shape index: {}]   ;;  %s1175_s7 = inlined_call_operand.vmem [shape: f32[2,8,32], index: 7, kind: output, shape index: {}]  }
   0x1 LB: > { %s785_s25 = sadd.s32 4294967295, %s981_s24   ;;  %p789_p0 = scmp.ge.s32.totalorder %s981_s24, 1  ;;  %s981_s24 = sphi %s1028_s24, %s17_s24  }
   0x2   : > { %p237_p1 = scmp.lt.s32.totalorder %s981_s24, 3 }
   0x4   : > { %p238_p2 = pnand %p789_p0, %p237_p1 }
   0x5   : > { %p268_p3 = scmp.lt.s32.totalorder (!%p238_p2), %s785_s25, 1  ;;  %v279_v0 = vld [vmem:[%s1169_s1] sm:$0xff] (!%p238_p2)  ;;  %v280_v1 = vld [vmem:[%s1169_s1 + $0x8] sm:$0xff] (!%p238_p2)  ;;  %v281_v2 = vld [vmem:[%s1169_s1 + $0x10] sm:$0xff] (!%p238_p2)  ;;  %vm301_vm0 = vcmask (!%p238_p2), 1046528   ;;  %s983_s23 = smov (!%p238_p2), 32   ;;  %v432_v53 = vlaneseq (!%p238_p2) }
   0x6   : > { %241 = sbr.rel (%p238_p2) target bundleno = 1248 (0x4e0), region = 48  ;;  %v908_v3 = vpack.c.bf16 (!%p238_p2), %v280_v1, %v279_v0  ;;  %v282_v4 = vld [vmem:[%s1169_s1 + $0x18] sm:$0xff] (!%p238_p2)  ;;  %v283_v6 = vld [vmem:[%s1169_s1 + $0x20] sm:$0xff] (!%p238_p2)  ;;  %v284_v7 = vld [vmem:[%s1169_s1 + $0x28] sm:$0xff] (!%p238_p2)  ;;  %vm294_vm1 = vcmask (!%p238_p2), 1040384   ;;  %s984_s26 = smov (!%p238_p2), 64  }
   0x7   : > { %v912_v5 = vpack.c.bf16 (!%p238_p2), %v282_v4, %v281_v2  ;;  %v916_v8 = vpack.c.bf16 (!%p238_p2), %v284_v7, %v283_v6  ;;  %v285_v9 = vld [vmem:[%s1169_s1 + $0x30] sm:$0xff] (!%p238_p2)  ;;  %v286_v12 = vld [vmem:[%s1169_s1 + $0x38] sm:$0xff] (!%p238_p2)  ;;  %v287_v20 = vld [vmem:[%s1169_s1 + $0x40] sm:$0xff] (!%p238_p2)  ;;  %vm320_vm2 = vcmask (!%p238_p2), 261120   ;;  %vm323_vm3 = vcmask (!%p238_p2), 523264  }
   0x8   : > { %909 = vmatprep.subr.bf16.mxu0 (!%p238_p2), %v908_v3  ;;  %v920_v18 = vpack.c.bf16 (!%p238_p2), %v286_v12, %v285_v9  ;;  %v288_v21 = vld [vmem:[%s1169_s1 + $0x48] sm:$0xff] (!%p238_p2)  ;;  %v289_v24 = vld [vmem:[%s1169_s1 + $0x50] sm:$0xff] (!%p238_p2)  ;;  %v290_v25 = vld [vmem:[%s1169_s1 + $0x58] sm:$0xff] (!%p238_p2)  ;;  %vm332_vm4 = vcmask (!%p238_p2), 785408   ;;  %v985_v36 = vmov (!%p238_p2), 0.0|0.0   ;;  %vm986_vm5 = vmmov (!%p238_p2), 0  }
   0x9   : > { %911 = vmatpush3.bf16.msra.mxu0 (!%p238_p2), %v908_v3  ;;  %v924_v23 = vpack.c.bf16 (!%p238_p2), %v288_v21, %v287_v20  ;;  %v928_v26 = vpack.c.bf16 (!%p238_p2), %v290_v25, %v289_v24  ;;  %935 = vmatprep.subr.bf16.mxu1 (!%p238_p2), %v985_v36  ;;  %v987_v37 = vmov (!%p238_p2), 0.0   ;;  %v793_v38 = vld [vmem:[%s1170_s2] ss:$0 sm:$0xff] (!%p238_p2)  ;;  %v433_v54 = vshrl.u32 (!%p238_p2), %v432_v53, 7  ;;  %v593_v6 = vld [vmem:[%s1171_s3 + $0x8] sm:$0xff] (!%p238_p2)  ;;  %v594_v7 = vld [vmem:[%s1171_s3 + $0x10] sm:$0xff] (!%p238_p2) }
   0xa   : > { %913 = vmatprep.subr.bf16.mxu0 (!%p238_p2), %v912_v5  ;;  %878 = vmatprep.mubr.msk.f32.mxu1 (!%p238_p2), %vm986_vm5, %v987_v37  ;;  %v435_v60 = vand.u32 (!%p238_p2), 127, %v432_v53  ;;  %vm440_vm8 = vcmask (!%p238_p2), 130048   ;;  %v595_v9 = vld [vmem:[%s1171_s3 + $0x18] sm:$0xff] (!%p238_p2)  ;;  %v597_v12 = vld [vmem:[%s1171_s3 + $0x28] sm:$0xff] (!%p238_p2)  ;;  %v602_v20 = vld [vmem:[%s1171_s3 + $0x50] sm:$0xff] (!%p238_p2) }
   0xb   : > { %v436_v55 = vmul.u32 (!%p238_p2), 2, %v433_v54  ;;  %v603_v21 = vld [vmem:[%s1171_s3 + $0x58] sm:$0xff] (!%p238_p2) }
   0xd   : > { %s1177_s25 = smov (!%p268_p3, %s785_s25), 1  ;;  %915 = vmatpush3.bf16.msra.mxu0 %v912_v5  ;;  %v514_v61 = vadd.s32 1, %v436_v55  ;;  %vm437_vm6 = vcmp.eq.s32.totalorder %v435_v60, %v436_v55  ;;  %v592_v5 = vld [vmem:[%s1171_s3] sm:$0xff] }
   0xe   : > { %s806_s15 = sshll.u32 %s1177_s25, 4  ;;  %917 = vmatprep.subr.bf16.mxu0 %v916_v8  ;;  %v796_v3 = vsel %vm437_vm6, 1.0, %v987_v37  ;;  %s792_s27 = sshll.u32 %s1177_s25, 3 }
   0xf   : > { %s272_s18 = scalar_lea.vmem %s1168_s0, %s806_s15  ;;  %vm515_vm7 = vcmp.eq.s32.totalorder %v435_v60, %v514_v61  ;;  %s276_s30 = scalar_lea.vmem %s1175_s7, %s792_s27 }
  0x10   : > { %v277_v10 = vld [vmem:[%s272_s18] sm:$0xff]  ;;  %v278_v11 = vld [vmem:[%s272_s18 + $0x8] sm:$0xff]  ;;  %v798_v4 = vsel %vm515_vm7, 1.0, %v987_v37 }
  0x11   : > { %v296_v13 = vrot.slane %v278_v11, 7  ;;  %307 = vrot.lane.b32.xlu0 %v277_v10, %s983_s23  ;;  %v295_v14 = vrot.slane %v277_v10, 7  ;;  %v302_v15 = vrot.slane %v277_v10, 1  ;;  %v303_v16 = vrot.slane %v278_v11, 1  ;;  %919 = vmatpush3.bf16.msra.mxu0 %v916_v8 }
  0x12   : > { %921 = vmatprep.subr.bf16.mxu0 %v920_v18  ;;  %v939_v8 = vpack.c.bf16 %v593_v6, %v592_v5  ;;  %v942_v10 = vpack.c.bf16 %v595_v9, %v594_v7 }
  0x13   : > { %v304_v17 = vsel %vm301_vm0, %v302_v15, %v303_v16  ;;  %v297_v19 = vsel %vm294_vm1, %v295_v14, %v296_v13  ;;  %v306_v22 = vsel %vm301_vm0, %v303_v16, 0.0  ;;  %v300_v27 = vsel %vm294_vm1, 0.0, %v295_v14  ;;  %v598_v14 = vld [vmem:[%s1171_s3 + $0x30] sm:$0xff]  ;;  %v599_v15 = vld [vmem:[%s1171_s3 + $0x38] sm:$0xff] }
  0x14   : > { %314 = vrot.lane.b32.xlu1 %v304_v17, %s984_s26  ;;  %v948_v16 = vpack.c.bf16 %v599_v15, %v598_v14  ;;  %v600_v17 = vld [vmem:[%s1171_s3 + $0x40] sm:$0xff] }
  0x15   : > { %309 = vrot.lane.b32.xlu0 %v278_v11, %s983_s23  ;;  %923 = vmatpush3.bf16.msra.mxu0 %v920_v18  ;;  %v596_v11 = vld [vmem:[%s1171_s3 + $0x20] sm:$0xff]  ;;  %v601_v18 = vld [vmem:[%s1171_s3 + $0x48] sm:$0xff] }
  0x16   : > { %925 = vmatprep.subr.bf16.mxu0 %v924_v23  ;;  %v945_v13 = vpack.c.bf16 %v597_v12, %v596_v11 }
  0x18   : > { %316 = vrot.lane.b32.xlu1 %v306_v22, %s984_s26  ;;  %v954_v22 = vpack.c.bf16 %v603_v21, %v602_v20 }
  0x19   : > { %927 = vmatpush3.bf16.msra.mxu0 %v924_v23 }
  0x1a   : > { %929 = vmatprep.subr.bf16.mxu0 %v928_v26 }
  0x1d   : > { %931 = vmatpush3.bf16.msra.mxu0 %v928_v26 }
  0x1e   : > { %932 = vmatprep.subr.bf16.mxu0 %v985_v36 }
  0x83   : > { %v308_v28 = vpop.permute.xlu0 %307 }
  0x84   : > { %v321_v29 = vsel %vm320_vm2, %v300_v27, %v308_v28 }
  0x86   : > { %v315_v30 = vpop.permute.xlu1 %314 }
  0x87   : > { %v324_v31 = vsel %vm323_vm3, %v321_v29, %v315_v30  ;;  %v310_v32 = vpop.permute.xlu0 %309 }
  0x88   : > { %864 = vmatprep.mubr.msk.f32.mxu0 %vm332_vm4, %v324_v31  ;;  %v322_v33 = vsel %vm320_vm2, %v297_v19, %v310_v32  ;;  %v951_v19 = vpack.c.bf16 %v601_v18, %v600_v17 }
  0x8a   : > { %v317_v34 = vpop.permute.xlu1 %316 }
  0x8b   : > { %v325_v35 = vsel %vm323_vm3, %v322_v33, %v317_v34 }
  0x8c   : > { %865 = vmatmul.mubr.msk.f32.vlgmr.msra.gmra.mrb[0].mxu0 %vm332_vm4, %v325_v35 }
  0x8d   : > { %871 = vmatprep.mubr.msk.f32.mxu0 %vm986_vm5, %v987_v37 }
 0x15f   : > { %v866_v39 = vpop.f32.mrb[0].mxu0 }
 0x160   : > { %v411_v40 = vadd.f32 %v866_v39, %v793_v38  ;;  %v405_v41 = vpop.f32.mrb[1].mxu0 }
 0x161   : > { %v406_v42 = vadd.f32 %v793_v38, %v405_v41 }
 0x162   : > { %v417_v43 = vmul.f32 0.044715, %v411_v40  ;;  %v415_v58 = vmul.f32 0.5, %v411_v40 }
 0x163   : > { %v416_v44 = vmul.f32 0.044715, %v406_v42  ;;  %v414_v62 = vmul.f32 0.5, %v406_v42 }
 0x164   : > { %v419_v45 = vmul.f32 %v417_v43, %v411_v40 }
 0x165   : > { %v418_v46 = vmul.f32 %v416_v44, %v406_v42 }
 0x166   : > { %v421_v47 = vmul.f32 %v419_v45, %v411_v40 }
 0x167   : > { %v420_v48 = vmul.f32 %v418_v46, %v406_v42 }
 0x168   : > { %v423_v49 = vadd.f32 %v421_v47, %v411_v40 }
 0x169   : > { %v422_v50 = vadd.f32 %v420_v48, %v406_v42 }
 0x16a   : > { %v425_v51 = vmul.f32 0.7978846, %v423_v49 }
 0x16b   : > { %v424_v52 = vmul.f32 0.7978846, %v422_v50  ;;  %v802_v50 = vld [vmem:[%s1173_s5] ss:$0 sm:$0xff] }
 0x16c   : > { %969 = vtanh.f32 %v425_v51 }
 0x16d   : > { %971 = vtanh.f32 %v424_v52  ;;  %v803_v52 = vld [vmem:[%s1174_s6] ss:$0 sm:$0xff] }
 0x176   : > { %v970_v56 = vpop.eup %969 }
 0x177   : > { %v972_v57 = vpop.eup %971  ;;  %v429_v59 = vadd.f32 1.0, %v970_v56 }
 0x178   : > { %v428_v63 = vadd.f32 1.0, %v972_v57 }
 0x179   : > { %v431_v0 = vmul.f32 %v429_v59, %v415_v58 }
 0x17a   : > { %v430_v1 = vmul.f32 %v428_v63, %v414_v62 }
 0x17c   : > { %v933_v2 = vpack.c.bf16 %v431_v0, %v430_v1 }
 0x17e   : > { %934 = vmatpush3.bf16.msra.mxu0 %v933_v2  ;;  %937 = vmatpush3.bf16.msra.mxu1 %v933_v2 }
 0x17f   : > { %938 = vmatprep.subr.bf16.mxu1 %v985_v36 }
 0x181   : > { %872 = vmatmul.mubr.msk.f32.vlgmr.msra.gmra.mrb[2].mxu0 %vm440_vm8, %v796_v3  ;;  %879 = vmatmul.mubr.msk.f32.vlgmr.msra.gmra.mrb[0].mxu1 %vm440_vm8, %v798_v4 }
 0x182   : > { %905 = vmatprep.mubr.msk.f32.mxu1 %vm986_vm5, %v987_v37  ;;  %940 = vmatpush3.bf16.msra.mxu1 %v939_v8 }
 0x183   : > { %941 = vmatprep.subr.bf16.mxu1 %v985_v36 }
 0x186   : > { %943 = vmatpush3.bf16.msra.mxu1 %v942_v10 }
 0x187   : > { %944 = vmatprep.subr.bf16.mxu1 %v985_v36 }
 0x18a   : > { %946 = vmatpush3.bf16.msra.mxu1 %v945_v13 }
 0x18b   : > { %947 = vmatprep.subr.bf16.mxu1 %v985_v36 }
 0x18e   : > { %949 = vmatpush3.bf16.msra.mxu1 %v948_v16 }
 0x18f   : > { %950 = vmatprep.subr.bf16.mxu1 %v985_v36 }
 0x192   : > { %952 = vmatpush3.bf16.msra.mxu1 %v951_v19 }
 0x193   : > { %953 = vmatprep.subr.bf16.mxu1 %v985_v36  ;;  %v800_v36 = vld [vmem:[%s1172_s4] ss:$0 sm:$0xff] }
 0x196   : > { %955 = vmatpush3.bf16.msra.mxu1 %v954_v22 }
 0x254   : > { %v510_v23 = vpop.f32.mrb[2].mxu0  ;;  %v587_v24 = vpop.f32.mrb[0].mxu1 }
 0x255   : > { %v591_v25 = vmax.f32 %v510_v23, %v587_v24  ;;  %v873_v26 = vpop.f32.mrb[3].mxu0  ;;  %v880_v27 = vpop.f32.mrb[1].mxu1 }
 0x257   : > { %612 = vrot.lane.b32.xlu0 %v591_v25, %s983_s23  ;;  %v609_v28 = vrot.slane %v591_v25, 1  ;;  %v606_v30 = vrot.slane %v591_v25, 7 }
 0x259   : > { %v611_v29 = vsel %vm301_vm0, %v609_v28, 0.0  ;;  %v608_v32 = vsel %vm294_vm1, 0.0, %v606_v30 }
 0x25a   : > { %616 = vrot.lane.b32.xlu1 %v611_v29, %s984_s26 }
 0x2c9   : > { %v613_v31 = vpop.permute.xlu0 %612 }
 0x2ca   : > { %v619_v33 = vsel %vm320_vm2, %v608_v32, %v613_v31 }
 0x2cc   : > { %v617_v34 = vpop.permute.xlu1 %616 }
 0x2cd   : > { %v620_v35 = vsel %vm323_vm3, %v619_v33, %v617_v34 }
 0x2ce   : > { %906 = vmatmul.mubr.msk.f32.vlgmr.msra.gmra.mrb[2].mxu1 %vm332_vm4, %v620_v35 }
 0x3a1   : > { %v696_v37 = vpop.f32.mrb[2].mxu1 }
 0x3a2   : > { %v697_v38 = vadd.f32 %v800_v36, %v696_v37  ;;  %v907_v39 = vpop.f32.mrb[3].mxu1 }
 0x3a4   : > { %v702_v40 = vsel %vm320_vm2, %v697_v38, 0.0 }
 0x3a5   : > { %703 = vadd.xlane.f32.xlu0 %v702_v40 }
 0x432   : > { %v704_v41 = vpop.xlane.xlu0 %703 }
 0x433   : > { %v706_v42 = vmul.f32 0.03125, %v704_v41 }
 0x435   : > { %v707_v43 = vsub.f32 %v697_v38, %v706_v42 }
 0x437   : > { %v708_v44 = vmul.f32 %v707_v43, %v707_v43 }
 0x439   : > { %v709_v45 = vsel %vm320_vm2, %v708_v44, 0.0 }
 0x43a   : > { %710 = vadd.xlane.f32.xlu1 %v709_v45 }
 0x4c7   : > { %v711_v46 = vpop.xlane.xlu1 %710 }
 0x4c8   : > { %v712_v47 = vmul.f32 0.03125, %v711_v46 }
 0x4ca   : > { %v713_v48 = vadd.f32 1e-05, %v712_v47 }
 0x4cc   : > { %973 = vrsqrt.f32 %v713_v48 }
 0x4d6   : > { %v974_v49 = vpop.eup %973 }
 0x4d7   : > { %v715_v51 = vmul.f32 %v974_v49, %v707_v43 }
 0x4d9   : > { %v722_v53 = vmul.f32 %v802_v50, %v715_v51 }
 0x4db   : > { %v729_v54 = vadd.f32 %v803_v52, %v722_v53 }
 0x4dd   : > { %v730_v55 = vadd.f32 %v729_v54, %v591_v25 }
 0x4df   : > { %731 = vst.msk [vmem:[%s276_s30] sm:$0xff] %vm320_vm2, %v730_v55 }
 0x4e0 PF: > { %s17_s24 = sadd.s32 1, %s981_s24  }
 0x4e1   : > { %p14_p4 = scmp.ge.s32.totalorder %s17_s24, 4  }
 0x4e3   :  { %16 = sbr.rel (!%p14_p4) target bundleno = 1 (0x1), region = 78 }

// kernel: seq_transformer_forward.8
= control target key start
LH: loop header
LB: loop body
LE: loop exit
PB: predicated region body
PF: predicated region fallthrough
CT: control target
= control target key end

     0   :  { %s1915_s25 = smov 0   ;;  %s2116_s0 = inlined_call_operand.vmem [shape: f32[2,4,32], index: 0, kind: input, shape index: {}]   ;;  %s2117_s1 = inlined_call_operand.vmem [shape: f32[32,96], index: 1, kind: input, shape index: {}]   ;;  %s2118_s2 = inlined_call_operand.vmem [shape: f32[1,96], index: 2, kind: input, shape index: {}]   ;;  %s2119_s3 = inlined_call_operand.vmem [shape: f32[32,32], index: 3, kind: input, shape index: {}]   ;;  %s2120_s4 = inlined_call_operand.vmem [shape: f32[1,32], index: 4, kind: input, shape index: {}, may-alias: {4,6,10,12}]   ;;  %s2121_s5 = inlined_call_operand.vmem [shape: f32[1,32], index: 5, kind: input, shape index: {}, may-alias: {5,11}]   ;;  %s2122_s6 = inlined_call_operand.vmem [shape: f32[1,32], index: 6, kind: input, shape index: {}, may-alias: {4,6,10,12}]   ;;  %s2123_s7 = inlined_call_operand.vmem [shape: f32[32,64], index: 7, kind: input, shape index: {}]   ;;  %s2124_s8 = inlined_call_operand.vmem [shape: f32[1,64], index: 8, kind: input, shape index: {}]   ;;  %s2125_s9 = inlined_call_operand.vmem [shape: f32[64,32], index: 9, kind: input, shape index: {}]   ;;  %s2126_s10 = inlined_call_operand.vmem [shape: f32[1,32], index: 10, kind: input, shape index: {}, may-alias: {4,6,10,12}]   ;;  %s2127_s11 = inlined_call_operand.vmem [shape: f32[1,32], index: 11, kind: input, shape index: {}, may-alias: {5,11}]   ;;  %s2128_s12 = inlined_call_operand.vmem [shape: f32[1,32], index: 12, kind: input, shape index: {}, may-alias: {4,6,10,12}]   ;;  %s2129_s13 = inlined_call_operand.vmem [shape: f32[2,4,32], index: 13, kind: output, shape index: {}]  }
   0x1 LB: > { %s1588_s26 = sadd.s32 4294967295, %s1832_s25   ;;  %p1592_p0 = scmp.ge.s32.totalorder %s1832_s25, 1  ;;  %s1832_s25 = sphi %s1915_s25, %s23_s25  }
   0x2   : > { %p386_p1 = scmp.lt.s32.totalorder %s1832_s25, 3 }
   0x4   : > { %p387_p2 = pnand %p1592_p0, %p386_p1 }
   0x5   : > { %v437_v0 = vld [vmem:[%s2117_s1] sm:$0xff] (!%p387_p2)  ;;  %v438_v1 = vld [vmem:[%s2117_s1 + $0x8] sm:$0xff] (!%p387_p2)  ;;  %v439_v2 = vld [vmem:[%s2117_s1 + $0x10] sm:$0xff] (!%p387_p2)  ;;  %v1834_v3 = vmov (!%p387_p2), 0.0|0.0   ;;  %vm1835_vm0 = vmmov (!%p387_p2), 0   ;;  %v1836_v6 = vmov (!%p387_p2), 0.0  }
   0x6   : > { %390 = sbr.rel (%p387_p2) target bundleno = 2601 (0xa29), region = 72  ;;  %1757 = vmatprep.subr.bf16.mxu1 (!%p387_p2), %v1834_v3  ;;  %v1758_v4 = vpack.c.bf16 (!%p387_p2), %v438_v1, %v437_v0  ;;  %v440_v5 = vld [vmem:[%s2117_s1 + $0x18] sm:$0xff] (!%p387_p2)  ;;  %1673 = vmatprep.mubr.msk.f32.mxu1 (!%p387_p2), %vm1835_vm0, %v1836_v6  ;;  %p428_p3 = scmp.lt.s32.totalorder (!%p387_p2), %s1588_s26, 1  ;;  %vm448_vm1 = vcmask (!%p387_p2), 261120   ;;  %v1595_v9 = vld [vmem:[%s2118_s2] ss:$0 sm:$0xff] (!%p387_p2) }
   0x7   : > { %1686 = vmatprep.subr.mxu0 (!%p387_p2), %v1836_v6  ;;  %1688 = vmatprep.mubr.msk.f32.mxu0 (!%p387_p2), %vm1835_vm0, %v1836_v6  ;;  %v1761_v7 = vpack.c.bf16 (!%p387_p2), %v440_v5, %v439_v2  ;;  %s1837_s24 = smov (!%p387_p2), 104   ;;  %s1838_s27 = smov (!%p387_p2), 120   ;;  %vm531_vm2 = vcmask (!%p387_p2), 64512   ;;  %vm838_vm3 = vcmask (!%p387_p2), 27648   ;;  %vm893_vm4 = vcmask (!%p387_p2), 1043456  }
   0x8   : > { %1759 = vmatpush3.bf16.msra.mxu1 (!%p387_p2), %v1758_v4  ;;  %s1839_s28 = smov (!%p387_p2), 96   ;;  %s1840_s29 = smov (!%p387_p2), 112   ;;  %vm889_vm5 = vcmask (!%p387_p2), 31744   ;;  %vm1210_vm6 = vcmask (!%p387_p2), 130048   ;;  %vm1212_vm7 = vcmask (!%p387_p2), 195584   ;;  %vm1301_vm8 = vcmask (!%p387_p2), 257024  }
   0x9   : > { %1760 = vmatprep.subr.bf16.mxu1 (!%p387_p2), %v1834_v3  ;;  %s1841_s30 = smov (!%p387_p2), 64   ;;  %s1842_s23 = smov (!%p387_p2), 8   ;;  %vm1430_vm9 = vcmask (!%p387_p2), 523264  }
   0xc   : > { %1762 = vmatpush3.bf16.msra.mxu1 (!%p387_p2), %v1761_v7 }
   0xd   : > { %s2131_s26 = smov (!%p428_p3, %s1588_s26), 1  ;;  %1676 = vmatprep.subr.mxu1 %v1836_v6 }
   0xe   : > { %s1593_s18 = sshll.u32 %s2131_s26, 2 }
   0xf   : > { %s431_s21 = scalar_lea.vmem %s2116_s0, %s1593_s18 }
  0x10   : > { %v1950_v8 = vld [vmem:[%s431_s21] sm:$0xf] }
  0x11   : > { %1674 = vmatmul.mubr.msk.f32.vlgmr.msra.gmra.mrb[0].mxu1 %vm448_vm1, %v1950_v8 }
  0x12   : > { %1678 = vmatprep.mubr.msk.f32.mxu1 %vm1835_vm0, %v1836_v6 }
  0xe4   : > { %v518_v10 = vpop.f32.mrb[0].mxu1 }
  0xe5   : > { %v519_v11 = vadd.f32 %v1595_v9, %v518_v10  ;;  %v1675_v12 = vpop.f32.mrb[1].mxu1 }
  0xe6   : > { %v1215_v12 = vld [vmem:[%s2119_s3 + $0x8] sm:$0xff] }
  0xe7   : > { %527 = vrot.lane.b32.xlu1 %v519_v11, %s1837_s24  ;;  %523 = vrot.lane.b32.xlu0 %v519_v11, %s1838_s27  ;;  %s1843_s24 = smov 24   ;;  %s1844_s27 = smov 16  }
  0xeb   : > { %529 = vrot.lane.b32.xlu1 %v519_v11, %s1839_s28  ;;  %525 = vrot.lane.b32.xlu0 %v519_v11, %s1840_s29 }
 0x159   : > { %v1960_v13 = vpop.permute.xlu1 %527  ;;  %v524_v14 = vpop.permute.xlu0 %523 }
 0x15a   : > { %606 = vrot.lane.b32.xlu0 %v524_v14, %s1839_s28 }
 0x15d   : > { %v530_v15 = vpop.permute.xlu1 %529  ;;  %v1962_v16 = vpop.permute.xlu0 %525 }
 0x15e   : > { %1677 = vmatpush3.xpose.msk.msra.mxu1 %vm531_vm2, %v530_v15  ;;  %758 = vrot.lane.b32.xlu0 %v1960_v13, %s1839_s28 }
 0x15f   : > { %682 = vrot.lane.b32.xlu1 %v1962_v16, %s1839_s28  ;;  %1681 = vmatprep.subr.mxu1 %v1836_v6 }
 0x161   : > { %1679 = vmatmul.mubr.msk.f32.vlgmr.msra.gmra.mrb[2].mxu1 %vm531_vm2, %v519_v11 }
 0x162   : > { %1683 = vmatprep.mubr.msk.f32.mxu1 %vm1835_vm0, %v1836_v6 }
 0x1cc   : > { %v607_v17 = vpop.permute.xlu0 %606 }
 0x1cd   : > { %1682 = vmatpush3.xpose.msk.msra.mxu1 %vm531_vm2, %v607_v17  ;;  %v1217_v17 = vld [vmem:[%s2119_s3 + $0x18] sm:$0xff] }
 0x1ce   : > { %1691 = vmatprep.subr.mxu1 %v1836_v6 }
 0x1d0   : > { %1684 = vmatmul.mubr.msk.f32.vlgmr.msra.gmra.mrb[4].mxu1 %vm531_vm2, %v524_v14  ;;  %v759_v18 = vpop.permute.xlu0 %758 }
 0x1d1   : > { %v683_v19 = vpop.permute.xlu1 %682  ;;  %1692 = vmatpush3.xpose.msk.msra.mxu1 %vm531_vm2, %v759_v18  ;;  %1693 = vmatprep.mubr.msk.f32.mxu1 %vm1835_vm0, %v1836_v6 }
 0x1d2   : > { %1687 = vmatpush3.xpose.msk.msra.mxu0 %vm531_vm2, %v683_v19  ;;  %1701 = vmatprep.subr.mxu1 %v1836_v6 }
 0x1d3   : > { %1696 = vmatprep.subr.mxu0 %v1836_v6 }
 0x1d4   : > { %1694 = vmatmul.mubr.msk.f32.vlgmr.msra.gmra.mrb[6].mxu1 %vm531_vm2, %v1960_v13 }
 0x1d5   : > { %1689 = vmatmul.mubr.msk.f32.vlgmr.msra.gmra.mrb[0].mxu0 %vm531_vm2, %v1962_v16  ;;  %1703 = vmatprep.mubr.msk.f32.mxu1 %vm1835_vm0, %v1836_v6 }
 0x1d6   : > { %1698 = vmatprep.mubr.msk.f32.mxu0 %vm1835_vm0, %v1836_v6 }
 0x234   : > { %v602_v20 = vpop.f32.mrb[2].mxu1 }
 0x235   : > { %v834_v21 = vmul.f32 0.35355338, %v602_v20  ;;  %v1680_v22 = vpop.f32.mrb[3].mxu1 }
 0x237   : > { %v839_v23 = vsel %vm838_vm3, %v834_v21, -inf }
 0x238   : > { %840 = vmax.xlane.f32.xlu1 %v839_v23 }
 0x2a3   : > { %v678_v24 = vpop.f32.mrb[4].mxu1 }
 0x2a4   : > { %v835_v25 = vmul.f32 0.35355338, %v678_v24  ;;  %v1685_v26 = vpop.f32.mrb[5].mxu1 }
 0x2a6   : > { %v842_v27 = vsel %vm838_vm3, %v835_v25, -inf }
 0x2a7   : > { %843 = vmax.xlane.f32.xlu0 %v842_v27  ;;  %v830_v28 = vpop.f32.mrb[6].mxu1 }
 0x2a8   : > { %v754_v29 = vpop.f32.mrb[0].mxu0  ;;  %v837_v30 = vmul.f32 0.35355338, %v830_v28  ;;  %v1695_v31 = vpop.f32.mrb[7].mxu1 }
 0x2a9   : > { %v836_v32 = vmul.f32 0.35355338, %v754_v29  ;;  %v1690_v33 = vpop.f32.mrb[1].mxu0  ;;  %v1613_v31 = vld [vmem:[%s2120_s4] ss:$0 sm:$0xff] }
 0x2aa   : > { %v848_v34 = vsel %vm838_vm3, %v837_v30, -inf }
 0x2ab   : > { %v845_v35 = vsel %vm838_vm3, %v836_v32, -inf  ;;  %849 = vmax.xlane.f32.xlu1 %v848_v34 }
 0x2ac   : > { %846 = vmax.xlane.f32.xlu0 %v845_v35 }
 0x2bc   : > { %966 = vrot.lane.b32.xlu1 %v524_v14, %s1841_s30 }
 0x2c2   : > { %887 = vrot.lane.b32.xlu0 %v519_v11, %s1841_s30  ;;  %v1214_v11 = vld [vmem:[%s2119_s3] sm:$0xff] }
 0x2c5   : > { %v841_v36 = vpop.xlane.xlu1 %840 }
 0x2c6   : > { %v851_v37 = vsub.f32 %v834_v21, %v841_v36 }
 0x2c8   : > { %v855_v38 = vmul.f32 1.442695, %v851_v37 }
 0x2ca   : > { %1806 = vpow2.f32 %v855_v38 }
 0x2d4   : > { %v1807_v39 = vpop.eup %1806 }
 0x2d5   : > { %v863_v40 = vsel %vm838_vm3, %v1807_v39, 0.0 }
 0x2e1   : > { %864 = vadd.xlane.f32.xlu0 %v863_v40 }
 0x334   : > { %v844_v41 = vpop.xlane.xlu0 %843 }
 0x335   : > { %v852_v42 = vsub.f32 %v835_v25, %v844_v41 }
 0x337   : > { %v857_v43 = vmul.f32 1.442695, %v852_v42  ;;  %v1331_v42 = vld [vmem:[%s2123_s7 + $0x8] sm:$0xff] }
 0x338   : > { %v850_v44 = vpop.xlane.xlu1 %849 }
 0x339   : > { %1808 = vpow2.f32 %v857_v43  ;;  %v847_v45 = vpop.xlane.xlu0 %846  ;;  %v854_v46 = vsub.f32 %v837_v30, %v850_v44  ;;  %v1333_v44 = vld [vmem:[%s2123_s7 + $0x18] sm:$0xff] }
 0x33a   : > { %v853_v47 = vsub.f32 %v836_v32, %v847_v45 }
 0x33b   : > { %v861_v48 = vmul.f32 1.442695, %v854_v46  ;;  %v1415_v46 = vld [vmem:[%s2125_s9] sm:$0xff] }
 0x33c   : > { %v859_v49 = vmul.f32 1.442695, %v853_v47  ;;  %v967_v50 = vpop.permute.xlu1 %966  ;;  %v1416_v47 = vld [vmem:[%s2125_s9 + $0x8] sm:$0xff] }
 0x33d   : > { %1810 = vpow2.f32 %v861_v48  ;;  %v888_v51 = vpop.permute.xlu0 %887  ;;  %1702 = vmatpush3.msk.msra.mxu1 %vm893_vm4, %v967_v50  ;;  %v1417_v48 = vld [vmem:[%s2125_s9 + $0x10] sm:$0xff]  ;;  %v1418_v50 = vld [vmem:[%s2125_s9 + $0x18] sm:$0xff] }
 0x33e   : > { %1812 = vpow2.f32 %v859_v49  ;;  %1697 = vmatpush3.msk.msra.mxu0 %vm893_vm4, %v888_v51  ;;  %1711 = vmatprep.subr.mxu1 %v1836_v6  ;;  %v1776_v49 = vpack.c.bf16 %v1416_v47, %v1415_v46  ;;  %v1779_v51 = vpack.c.bf16 %v1418_v50, %v1417_v48 }
 0x33f   : > { %1706 = vmatprep.subr.mxu0 %v1836_v6 }
 0x343   : > { %v1809_v52 = vpop.eup %1808 }
 0x344   : > { %v866_v53 = vsel %vm838_vm3, %v1809_v52, 0.0 }
 0x345   : > { %867 = vadd.xlane.f32.xlu1 %v866_v53  ;;  %v1420_v53 = vld [vmem:[%s2125_s9 + $0x28] sm:$0xff] }
 0x347   : > { %v1811_v54 = vpop.eup %1810 }
 0x348   : > { %v1813_v55 = vpop.eup %1812  ;;  %v872_v56 = vsel %vm838_vm3, %v1811_v54, 0.0 }
 0x349   : > { %v869_v57 = vsel %vm838_vm3, %v1813_v55, 0.0  ;;  %873 = vadd.xlane.f32.xlu1 %v872_v56 }
 0x34a   : > { %870 = vadd.xlane.f32.xlu0 %v869_v57 }
 0x35a   : > { %1043 = vrot.lane.b32.xlu1 %v1962_v16, %s1841_s30  ;;  %v1216_v16 = vld [vmem:[%s2119_s3 + $0x10] sm:$0xff] }
 0x35b   : > { %v1767_v18 = vpack.c.bf16 %v1217_v17, %v1216_v16 }
 0x360   : > { %1120 = vrot.lane.b32.xlu0 %v1960_v13, %s1841_s30  ;;  %v1764_v13 = vpack.c.bf16 %v1215_v12, %v1214_v11 }
 0x36e   : > { %v865_v58 = vpop.xlane.xlu0 %864 }
 0x36f   : > { %1814 = vrcp.f32 %v865_v58 }
 0x379   : > { %v1815_v59 = vpop.eup %1814 }
 0x37a   : > { %v883_v60 = vmul.f32 %v1815_v59, %v1807_v39  ;;  %v1615_v59 = vld [vmem:[%s2121_s5] ss:$0 sm:$0xff] }
 0x37c   : > { %1699 = vmatmul.mubr.msk.f32.vlgmr.msra.gmra.mrb[2].mxu0 %vm889_vm5, %v883_v60 }
 0x37d   : > { %1708 = vmatprep.mubr.msk.f32.mxu0 %vm1835_vm0, %v1836_v6 }
 0x3d2   : > { %v868_v61 = vpop.xlane.xlu1 %867 }
 0x3d3   : > { %1816 = vrcp.f32 %v868_v61  ;;  %v1616_v61 = vld [vmem:[%s2122_s6] ss:$0 sm:$0xff] }
 0x3d6   : > { %v874_v62 = vpop.xlane.xlu1 %873 }
 0x3d7   : > { %v871_v63 = vpop.xlane.xlu0 %870  ;;  %1818 = vrcp.f32 %v874_v62 }
 0x3d8   : > { %1820 = vrcp.f32 %v871_v63 }
 0x3da   : > { %v1044_v0 = vpop.permute.xlu1 %1043 }
 0x3db   : > { %1707 = vmatpush3.msk.msra.mxu0 %vm893_vm4, %v1044_v0  ;;  %v1121_v4 = vpop.permute.xlu0 %1120  ;;  %v1422_v0 = vld [vmem:[%s2125_s9 + $0x38] sm:$0xff] }
 0x3dc   : > { %1763 = vmatprep.subr.bf16.mxu0 %v1834_v3 }
 0x3dd   : > { %v1817_v1 = vpop.eup %1816 }
 0x3de   : > { %v884_v2 = vmul.f32 %v1817_v1, %v1809_v52  ;;  %v1419_v52 = vld [vmem:[%s2125_s9 + $0x20] sm:$0xff] }
 0x3e0   : > { %1704 = vmatmul.mubr.msk.f32.vlgmr.msra.gmra.mrb[8].mxu1 %vm889_vm5, %v884_v2  ;;  %v1617_v2 = vld [vmem:[%s2124_s8] ss:$0 sm:$0xff] }
 0x3e1   : > { %v1819_v5 = vpop.eup %1818  ;;  %1712 = vmatpush3.msk.msra.mxu1 %vm893_vm4, %v1121_v4  ;;  %1713 = vmatprep.mubr.msk.f32.mxu1 %vm1835_vm0, %v1836_v6 }
 0x3e2   : > { %v1821_v7 = vpop.eup %1820  ;;  %v886_v9 = vmul.f32 %v1819_v5, %v1811_v54  ;;  %1769 = vmatprep.subr.bf16.mxu1 %v1834_v3  ;;  %v1782_v54 = vpack.c.bf16 %v1420_v53, %v1419_v52 }
 0x3e3   : > { %v885_v10 = vmul.f32 %v1821_v7, %v1813_v55 }
 0x3e4   : > { %1714 = vmatmul.mubr.msk.f32.vlgmr.msra.gmra.mrb[10].mxu1 %vm889_vm5, %v886_v9 }
 0x3e5   : > { %1709 = vmatmul.mubr.msk.f32.vlgmr.msra.gmra.mrb[4].mxu0 %vm889_vm5, %v885_v10  ;;  %1735 = vmatprep.mubr.msk.f32.mxu1 %vm1835_vm0, %v1836_v6  ;;  %v1619_v10 = vld [vmem:[%s2126_s10] ss:$0 sm:$0xff] }
 0x3e6   : > { %1724 = vmatprep.mubr.msk.f32.mxu0 %vm1835_vm0, %v1836_v6  ;;  %1765 = vmatpush3.bf16.msra.mxu0 %v1764_v13 }
 0x3e7   : > { %1766 = vmatprep.subr.bf16.mxu0 %v1834_v3 }
 0x3ea   : > { %1768 = vmatpush3.bf16.msra.mxu0 %v1767_v18 }
 0x3eb   : > { %1775 = vmatprep.subr.bf16.mxu0 %v1834_v3 }
 0x44f   : > { %v962_v14 = vpop.f32.mrb[2].mxu0 }
 0x450   : > { %v1700_v15 = vpop.f32.mrb[3].mxu0 }
 0x4b3   : > { %v1039_v19 = vpop.f32.mrb[8].mxu1 }
 0x4b4   : > { %1198 = vrot.lane.b32.xlu1 %v1039_v19, %s1842_s23  ;;  %v1705_v20 = vpop.f32.mrb[9].mxu1 }
 0x4b7   : > { %v1193_v21 = vpop.f32.mrb[10].mxu1 }
 0x4b8   : > { %v1116_v22 = vpop.f32.mrb[4].mxu0  ;;  %1206 = vrot.lane.b32.xlu1 %v1193_v21, %s1843_s24  ;;  %v1715_v23 = vpop.f32.mrb[11].mxu1  ;;  %s435_s24 = scalar_lea.vmem %s2129_s13, %s1593_s18 }
 0x4b9   : > { %1202 = vrot.lane.b32.xlu0 %v1116_v22, %s1844_s27  ;;  %v1710_v24 = vpop.f32.mrb[5].mxu0 }
 0x526   : > { %v1199_v25 = vpop.permute.xlu1 %1198 }
 0x527   : > { %v1209_v27 = vsel %vm531_vm2, %v962_v14, %v1199_v25  ;;  %v1621_v25 = vld [vmem:[%s2127_s11] ss:$0 sm:$0xff] }
 0x52a   : > { %v1207_v26 = vpop.permute.xlu1 %1206 }
 0x52b   : > { %v1203_v28 = vpop.permute.xlu0 %1202 }
 0x52c   : > { %v1211_v29 = vsel %vm1210_vm6, %v1209_v27, %v1203_v28  ;;  %v1622_v27 = vld [vmem:[%s2128_s12] ss:$0 sm:$0xff] }
 0x52d   : > { %v1213_v30 = vsel %vm1212_vm7, %v1211_v29, %v1207_v26 }
 0x52e   : > { %1725 = vmatmul.mubr.msk.f32.vlgmr.msra.gmra.mrb[6].mxu0 %vm448_vm1, %v1213_v30 }
 0x52f   : > { %1754 = vmatprep.mubr.msk.f32.mxu0 %vm1835_vm0, %v1836_v6  ;;  %v1330_v6 = vld [vmem:[%s2123_s7] sm:$0xff]  ;;  %1777 = vmatpush3.bf16.msra.mxu0 %v1776_v49 }
 0x530   : > { %v1770_v43 = vpack.c.bf16 %v1331_v42, %v1330_v6  ;;  %1778 = vmatprep.subr.bf16.mxu0 %v1834_v3 }
 0x532   : > { %1771 = vmatpush3.bf16.msra.mxu1 %v1770_v43 }
 0x533   : > { %1772 = vmatprep.subr.bf16.mxu1 %v1834_v3  ;;  %1780 = vmatpush3.bf16.msra.mxu0 %v1779_v51 }
 0x534   : > { %1781 = vmatprep.subr.bf16.mxu0 %v1834_v3 }
 0x537   : > { %1783 = vmatpush3.bf16.msra.mxu0 %v1782_v54 }
 0x538   : > { %1784 = vmatprep.subr.bf16.mxu0 %v1834_v3  ;;  %v1421_v3 = vld [vmem:[%s2125_s9 + $0x30] sm:$0xff] }
 0x539   : > { %v1785_v1 = vpack.c.bf16 %v1422_v0, %v1421_v3 }
 0x53b   : > { %1786 = vmatpush3.bf16.msra.mxu0 %v1785_v1 }
 0x601   : > { %v1294_v32 = vpop.f32.mrb[6].mxu0 }
 0x602   : > { %v1295_v33 = vadd.f32 %v1613_v31, %v1294_v32  ;;  %v1726_v34 = vpop.f32.mrb[7].mxu0 }
 0x604   : > { %v1298_v35 = vadd.f32 %v1295_v33, %v1950_v8  ;;  %v1332_v8 = vld [vmem:[%s2123_s7 + $0x10] sm:$0xff] }
 0x605   : > { %v1773_v45 = vpack.c.bf16 %v1333_v44, %v1332_v8 }
 0x606   : > { %v1302_v36 = vsel %vm1301_vm8, %v1298_v35, 0.0 }
 0x607   : > { %1303 = vadd.xlane.f32.xlu0 %v1302_v36  ;;  %1774 = vmatpush3.bf16.msra.mxu1 %v1773_v45 }
 0x694   : > { %v1304_v37 = vpop.xlane.xlu0 %1303 }
 0x695   : > { %v1306_v38 = vmul.f32 0.03125, %v1304_v37 }
 0x697   : > { %v1307_v39 = vsub.f32 %v1298_v35, %v1306_v38 }
 0x699   : > { %v1308_v40 = vmul.f32 %v1307_v39, %v1307_v39 }
 0x69b   : > { %v1309_v41 = vsel %vm1301_vm8, %v1308_v40, 0.0 }
 0x69c   : > { %1310 = vadd.xlane.f32.xlu1 %v1309_v41 }
 0x729   : > { %v1311_v55 = vpop.xlane.xlu1 %1310 }
 0x72a   : > { %v1312_v56 = vmul.f32 0.03125, %v1311_v55 }
 0x72c   : > { %v1313_v57 = vadd.f32 1e-05, %v1312_v56 }
 0x72e   : > { %1822 = vrsqrt.f32 %v1313_v57 }
 0x738   : > { %v1823_v58 = vpop.eup %1822 }
 0x739   : > { %v1315_v60 = vmul.f32 %v1823_v58, %v1307_v39 }
 0x73b   : > { %v1322_v62 = vmul.f32 %v1615_v59, %v1315_v60 }
 0x73d   : > { %v1329_v63 = vadd.f32 %v1616_v61, %v1322_v62 }
 0x73f   : > { %1736 = vmatmul.mubr.msk.f32.vlgmr.msra.gmra.mrb[12].mxu1 %vm448_vm1, %v1329_v63 }
 0x812   : > { %v1410_v4 = vpop.f32.mrb[12].mxu1 }
 0x813   : > { %v1411_v5 = vadd.f32 %v1617_v2, %v1410_v4  ;;  %v1737_v7 = vpop.f32.mrb[13].mxu1 }
 0x815   : > { %v1414_v9 = vmax.f32 %v1411_v5, 0.0 }
 0x817   : > { %1755 = vmatmul.mubr.msk.f32.vlgmr.msra.gmra.mrb[8].mxu0 %vm1430_vm9, %v1414_v9 }
 0x8ea   : > { %v1500_v11 = vpop.f32.mrb[8].mxu0 }
 0x8eb   : > { %v1501_v12 = vadd.f32 %v1619_v10, %v1500_v11  ;;  %v1756_v13 = vpop.f32.mrb[9].mxu0 }
 0x8ed   : > { %v1504_v14 = vadd.f32 %v1501_v12, %v1329_v63 }
 0x8ef   : > { %v1507_v15 = vsel %vm1301_vm8, %v1504_v14, 0.0 }
 0x8f0   : > { %1508 = vadd.xlane.f32.xlu0 %v1507_v15 }
 0x97d   : > { %v1509_v16 = vpop.xlane.xlu0 %1508 }
 0x97e   : > { %v1510_v17 = vmul.f32 0.03125, %v1509_v16 }
 0x980   : > { %v1511_v18 = vsub.f32 %v1504_v14, %v1510_v17 }
 0x982   : > { %v1512_v19 = vmul.f32 %v1511_v18, %v1511_v18 }
 0x984   : > { %v1513_v20 = vsel %vm1301_vm8, %v1512_v19, 0.0 }
 0x985   : > { %1514 = vadd.xlane.f32.xlu0 %v1513_v20 }
 0xa12   : > { %v1515_v21 = vpop.xlane.xlu0 %1514 }
 0xa13   : > { %v1516_v22 = vmul.f32 0.03125, %v1515_v21 }
 0xa15   : > { %v1517_v23 = vadd.f32 1e-05, %v1516_v22 }
 0xa17   : > { %1824 = vrsqrt.f32 %v1517_v23 }
 0xa21   : > { %v1825_v24 = vpop.eup %1824 }
 0xa22   : > { %v1519_v26 = vmul.f32 %v1825_v24, %v1511_v18 }
 0xa24   : > { %v1526_v28 = vmul.f32 %v1621_v25, %v1519_v26 }
 0xa26   : > { %v1533_v29 = vadd.f32 %v1622_v27, %v1526_v28 }
 0xa28   : > { %1534 = vst.msk [vmem:[%s435_s24] sm:$0xf] %vm1301_vm8, %v1533_v29 }
 0xa29 PF: > { %s23_s25 = sadd.s32 1, %s1832_s25  }
 0xa2a   : > { %p20_p4 = scmp.ge.s32.totalorder %s23_s25, 4  }
 0xa2c   :  { %22 = sbr.rel (!%p20_p4) target bundleno = 1 (0x1), region = 102 }

// kernel: seq_transformer_forward.9
= control target key start
LH: loop header
LB: loop body
LE: loop exit
PB: predicated region body
PF: predicated region fallthrough
CT: control target
= control target key end

     0   :  { %s2406_s0 = inlined_call_operand.vmem [shape: f32[2,4,32], index: 0, kind: input, shape index: {}]   ;;  %s2407_s1 = inlined_call_operand.vmem [shape: f32[32,96], index: 1, kind: input, shape index: {}]   ;;  %s2408_s2 = inlined_call_operand.vmem [shape: f32[1,96], index: 2, kind: input, shape index: {}]   ;;  %s2409_s3 = inlined_call_operand.vmem [shape: f32[32,32], index: 3, kind: input, shape index: {}]   ;;  %s2410_s4 = inlined_call_operand.vmem [shape: f32[1,32], index: 4, kind: input, shape index: {}, may-alias: {4,6,10,12,14}]   ;;  %s2411_s5 = inlined_call_operand.vmem [shape: f32[1,32], index: 5, kind: input, shape index: {}, may-alias: {5,11,13}]   ;;  %s2412_s6 = inlined_call_operand.vmem [shape: f32[1,32], index: 6, kind: input, shape index: {}, may-alias: {4,6,10,12,14}]   ;;  %s2413_s7 = inlined_call_operand.vmem [shape: f32[32,64], index: 7, kind: input, shape index: {}]   ;;  %s2414_s8 = inlined_call_operand.vmem [shape: f32[1,64], index: 8, kind: input, shape index: {}]   ;;  %s2415_s9 = inlined_call_operand.vmem [shape: f32[64,32], index: 9, kind: input, shape index: {}]   ;;  %s2416_s10 = inlined_call_operand.vmem [shape: f32[1,32], index: 10, kind: input, shape index: {}, may-alias: {4,6,10,12,14}]   ;;  %s2417_s11 = inlined_call_operand.vmem [shape: f32[1,32], index: 11, kind: input, shape index: {}, may-alias: {5,11,13}]   ;;  %s2418_s12 = inlined_call_operand.vmem [shape: f32[1,32], index: 12, kind: input, shape index: {}, may-alias: {4,6,10,12,14}]   ;;  %s2419_s13 = inlined_call_operand.vmem [shape: f32[1,32], index: 13, kind: input, shape index: {}, may-alias: {5,11,13}]   ;;  %s2420_s14 = inlined_call_operand.vmem [shape: f32[1,32], index: 14, kind: input, shape index: {}, may-alias: {4,6,10,12,14}]   ;;  %s2421_s15 = inlined_call_operand.hbm [shape: f32[2,4,32], index: 15, kind: output, shape index: {}]  }
   0x1   :  { %2423 = sst [smem:[#allocation7_spill]] %s2406_s0 }
   0x2   :  { %2424 = sst [smem:[#allocation8_spill]] %s2407_s1 }
   0x3   :  { %2425 = sst [smem:[#allocation9_spill]] %s2408_s2 }
   0x4   :  { %2426 = sst [smem:[#allocation10_spill]] %s2409_s3 }
   0x5   :  { %20 = vsyncpa [#allocation3], 0 }
   0x6   :  { %22 = vsyncpa [#allocation3 + $0x1], 0  ;;  %s2121_s18 = smov 0   ;;  %s2123_s19 = smov 0  }
   0x7   :  { %s2125_s20 = smov 0   ;;  %s2127_s21 = smov 0  }
   0x8 LB: > { %2427 = sst [smem:[#allocation5_spill]] %s2023_s20  ;;  %s2142_s22 = sadd.s32 4294967295, %s2027_s21   ;;  %s2027_s21 = sphi %s2127_s21, %s2439_s21   ;;  %s2023_s20 = sphi %s2125_s20, %s2436_s20   ;;  %s2019_s19 = sphi %s2123_s19, %s2438_s19   ;;  %s2015_s18 = sphi %s2121_s18, %s2437_s18  }
   0x9   : > { %s1691_s23 = sadd.s32 4294967294, %s2027_s21   ;;  %s2146_s24 = sadd.s32 1, %s2027_s21  }
   0xa   : > { %s355_s25 = sadd.s32 1, %s2023_s20  ;;  %s352_s26 = ssub.s32 %s2027_s21, %s2146_s24 }
   0xb   : > { %p365_p0 = scmp.ne.s32.totalorder %s2023_s20, %s2019_s19  ;;  %p353_p1 = scmp.eq.s32.totalorder %s352_s26, 0 }
   0xc   : > { %p366_p2 = scmp.eq.s32.totalorder %s2142_s22, 1  ;;  %p371_p3 = scmp.ne.s32.totalorder %s2019_s19, %s2015_s18 }
   0xd   : > { %p372_p4 = scmp.eq.s32.totalorder %s1691_s23, 1  ;;  %p1694_p7 = scmp.ge.s32.totalorder %s2027_s21, 1 }
   0xe   : > { %s2157_s27 = scalar_select %p353_p1, %s2023_s20, %s355_s25  }
   0xf   : > { %p2159_p5 = por %p366_p2, %p365_p0  ;;  %p2163_p6 = por %p372_p4, %p371_p3 }
  0x10   : > { %2428 = sst [smem:[#allocation6_spill]] %s2157_s27  ;;  %p439_p8 = scmp.lt.s32.totalorder %s2027_s21, 3 }
  0x12   : > { %p440_p9 = pnand %p1694_p7, %p439_p8 }
  0x13   : > { %s2431_s1 = sld [smem:[#allocation8_spill]] (!%p440_p9)  ;;  %v2029_v3 = vmov (!%p440_p9), 0.0|0.0   ;;  %vm2030_vm0 = vmmov (!%p440_p9), 0   ;;  %v2031_v6 = vmov (!%p440_p9), 0.0   ;;  %p486_p10 = scmp.lt.s32.totalorder (!%p440_p9), %s2142_s22, 1  ;;  %vm502_vm1 = vcmask (!%p440_p9), 261120  }
  0x14   : > { %443 = sbr.rel (%p440_p9) target bundleno = 2945 (0xb81), region = 80  ;;  %1863 = vmatprep.subr.bf16.mxu1 (!%p440_p9), %v2029_v3  ;;  %1779 = vmatprep.mubr.msk.f32.mxu1 (!%p440_p9), %vm2030_vm0, %v2031_v6  ;;  %s2432_s0 = sld [smem:[#allocation7_spill]] (!%p440_p9)  ;;  %vm585_vm2 = vcmask (!%p440_p9), 64512   ;;  %vm892_vm3 = vcmask (!%p440_p9), 27648   ;;  %vm947_vm4 = vcmask (!%p440_p9), 1043456   ;;  %vm943_vm5 = vcmask (!%p440_p9), 31744  }
  0x15   : > { %1792 = vmatprep.subr.mxu0 (!%p440_p9), %v2031_v6  ;;  %1794 = vmatprep.mubr.msk.f32.mxu0 (!%p440_p9), %vm2030_vm0, %v2031_v6  ;;  %s2433_s2 = sld [smem:[#allocation9_spill]] (!%p440_p9)  ;;  %s2032_s26 = smov (!%p440_p9), 104   ;;  %vm1264_vm6 = vcmask (!%p440_p9), 130048   ;;  %vm1266_vm7 = vcmask (!%p440_p9), 195584   ;;  %vm1355_vm8 = vcmask (!%p440_p9), 257024   ;;  %vm1484_vm9 = vcmask (!%p440_p9), 523264  }
  0x16   : > { %s2035_s17 = smov (!%p440_p9), 112   ;;  %s2036_s20 = smov (!%p440_p9), 64  }
  0x17   : > { %s2434_s3 = sld [smem:[#allocation10_spill]] (!%p440_p9)  ;;  %s2038_s23 = smov (!%p440_p9), 24  }
  0x18   : > { %s2039_s25 = smov (!%p440_p9), 16  }
  0x19   : > { %v491_v0 = vld [vmem:[%s2431_s1] sm:$0xff] (!%p440_p9)  ;;  %v492_v1 = vld [vmem:[%s2431_s1 + $0x8] sm:$0xff] (!%p440_p9)  ;;  %v493_v2 = vld [vmem:[%s2431_s1 + $0x10] sm:$0xff] (!%p440_p9) }
  0x1a   : > { %v1864_v4 = vpack.c.bf16 (!%p440_p9), %v492_v1, %v491_v0  ;;  %v494_v5 = vld [vmem:[%s2431_s1 + $0x18] sm:$0xff] (!%p440_p9) }
  0x1b   : > { %v1867_v7 = vpack.c.bf16 %v494_v5, %v493_v2  ;;  %s487_s30 = scalar_select %p486_p10, %s2142_s22, 1  ;;  %v1697_v9 = vld [vmem:[%s2433_s2] ss:$0 sm:$0xff] }
  0x1c   : > { %1865 = vmatpush3.bf16.msra.mxu1 %v1864_v4 }
  0x1d   : > { %1866 = vmatprep.subr.bf16.mxu1 %v2029_v3  ;;  %s1696_s16 = sshll.u32 %s487_s30, 2  ;;  %s2033_s30 = smov 120  }
  0x1e   : > { %s489_s27 = scalar_lea.vmem %s2432_s0, %s1696_s16  ;;  %s2034_s16 = smov 96  }
  0x1f   : > { %v2193_v8 = vld [vmem:[%s489_s27] sm:$0xf]  ;;  %s2037_s27 = smov 8  }
  0x20   : > { %1868 = vmatpush3.bf16.msra.mxu1 %v1867_v7 }
  0x21   : > { %1782 = vmatprep.subr.mxu1 %v2031_v6 }
  0x23   : > { %1780 = vmatmul.mubr.msk.f32.vlgmr.msra.gmra.mrb[0].mxu1 %vm502_vm1, %v2193_v8 }
  0x24   : > { %1784 = vmatprep.mubr.msk.f32.mxu1 %vm2030_vm0, %v2031_v6 }
  0xf6   : > { %v572_v10 = vpop.f32.mrb[0].mxu1 }
  0xf7   : > { %v573_v11 = vadd.f32 %v1697_v9, %v572_v10  ;;  %v1781_v12 = vpop.f32.mrb[1].mxu1 }
  0xf8   : > { %v1269_v12 = vld [vmem:[%s2434_s3 + $0x8] sm:$0xff] }
  0xf9   : > { %581 = vrot.lane.b32.xlu1 %v573_v11, %s2032_s26  ;;  %577 = vrot.lane.b32.xlu0 %v573_v11, %s2033_s30  ;;  %s483_s26 = sand.u32 1, %s2019_s19  }
  0xfa   : > { %s1695_s30 = sshll.u32 %s483_s26, 2 }
  0xfd   : > { %583 = vrot.lane.b32.xlu1 %v573_v11, %s2034_s16  ;;  %579 = vrot.lane.b32.xlu0 %v573_v11, %s2035_s17 }
 0x16b   : > { %v2203_v13 = vpop.permute.xlu1 %581  ;;  %v578_v14 = vpop.permute.xlu0 %577 }
 0x16c   : > { %660 = vrot.lane.b32.xlu0 %v578_v14, %s2034_s16 }
 0x16f   : > { %v584_v15 = vpop.permute.xlu1 %583  ;;  %v2205_v16 = vpop.permute.xlu0 %579 }
 0x170   : > { %1783 = vmatpush3.xpose.msk.msra.mxu1 %vm585_vm2, %v584_v15  ;;  %812 = vrot.lane.b32.xlu0 %v2203_v13, %s2034_s16 }
 0x171   : > { %736 = vrot.lane.b32.xlu1 %v2205_v16, %s2034_s16  ;;  %1787 = vmatprep.subr.mxu1 %v2031_v6  ;;  %s1619_s16 = scalar_lea.sflag [#allocation3], %s483_s26 }
 0x173   : > { %1785 = vmatmul.mubr.msk.f32.vlgmr.msra.gmra.mrb[2].mxu1 %vm585_vm2, %v573_v11 }
 0x174   : > { %1789 = vmatprep.mubr.msk.f32.mxu1 %vm2030_vm0, %v2031_v6 }
 0x1de   : > { %v661_v17 = vpop.permute.xlu0 %660 }
 0x1df   : > { %1788 = vmatpush3.xpose.msk.msra.mxu1 %vm585_vm2, %v661_v17  ;;  %v1271_v17 = vld [vmem:[%s2434_s3 + $0x18] sm:$0xff] }
 0x1e0   : > { %1797 = vmatprep.subr.mxu1 %v2031_v6 }
 0x1e2   : > { %1790 = vmatmul.mubr.msk.f32.vlgmr.msra.gmra.mrb[4].mxu1 %vm585_vm2, %v578_v14  ;;  %v813_v18 = vpop.permute.xlu0 %812 }
 0x1e3   : > { %v737_v19 = vpop.permute.xlu1 %736  ;;  %1798 = vmatpush3.xpose.msk.msra.mxu1 %vm585_vm2, %v813_v18  ;;  %1799 = vmatprep.mubr.msk.f32.mxu1 %vm2030_vm0, %v2031_v6 }
 0x1e4   : > { %1793 = vmatpush3.xpose.msk.msra.mxu0 %vm585_vm2, %v737_v19  ;;  %1807 = vmatprep.subr.mxu1 %v2031_v6 }
 0x1e5   : > { %1802 = vmatprep.subr.mxu0 %v2031_v6 }
 0x1e6   : > { %1800 = vmatmul.mubr.msk.f32.vlgmr.msra.gmra.mrb[6].mxu1 %vm585_vm2, %v2203_v13 }
 0x1e7   : > { %1795 = vmatmul.mubr.msk.f32.vlgmr.msra.gmra.mrb[0].mxu0 %vm585_vm2, %v2205_v16  ;;  %1809 = vmatprep.mubr.msk.f32.mxu1 %vm2030_vm0, %v2031_v6 }
 0x1e8   : > { %1804 = vmatprep.mubr.msk.f32.mxu0 %vm2030_vm0, %v2031_v6 }
 0x246   : > { %v656_v20 = vpop.f32.mrb[2].mxu1 }
 0x247   : > { %v888_v21 = vmul.f32 0.35355338, %v656_v20  ;;  %v1786_v22 = vpop.f32.mrb[3].mxu1 }
 0x249   : > { %v893_v23 = vsel %vm892_vm3, %v888_v21, -inf }
 0x24a   : > { %894 = vmax.xlane.f32.xlu1 %v893_v23 }
 0x2b5   : > { %v732_v24 = vpop.f32.mrb[4].mxu1 }
 0x2b6   : > { %v889_v25 = vmul.f32 0.35355338, %v732_v24  ;;  %v1791_v26 = vpop.f32.mrb[5].mxu1 }
 0x2b8   : > { %v896_v27 = vsel %vm892_vm3, %v889_v25, -inf }
 0x2b9   : > { %897 = vmax.xlane.f32.xlu0 %v896_v27  ;;  %v884_v28 = vpop.f32.mrb[6].mxu1 }
 0x2ba   : > { %v808_v29 = vpop.f32.mrb[0].mxu0  ;;  %v891_v30 = vmul.f32 0.35355338, %v884_v28  ;;  %v1801_v31 = vpop.f32.mrb[7].mxu1 }
 0x2bb   : > { %v890_v32 = vmul.f32 0.35355338, %v808_v29  ;;  %v1796_v33 = vpop.f32.mrb[1].mxu0  ;;  %v1715_v31 = vld [vmem:[%s2410_s4] ss:$0 sm:$0xff] }
 0x2bc   : > { %v902_v34 = vsel %vm892_vm3, %v891_v30, -inf }
 0x2bd   : > { %v899_v35 = vsel %vm892_vm3, %v890_v32, -inf  ;;  %903 = vmax.xlane.f32.xlu1 %v902_v34 }
 0x2be   : > { %900 = vmax.xlane.f32.xlu0 %v899_v35 }
 0x2ce   : > { %1020 = vrot.lane.b32.xlu1 %v578_v14, %s2036_s20 }
 0x2d4   : > { %941 = vrot.lane.b32.xlu0 %v573_v11, %s2036_s20  ;;  %v1268_v11 = vld [vmem:[%s2434_s3] sm:$0xff] }
 0x2d7   : > { %v895_v36 = vpop.xlane.xlu1 %894 }
 0x2d8   : > { %v905_v37 = vsub.f32 %v888_v21, %v895_v36 }
 0x2da   : > { %v909_v38 = vmul.f32 1.442695, %v905_v37 }
 0x2dc   : > { %1943 = vpow2.f32 %v909_v38 }
 0x2e6   : > { %v1944_v39 = vpop.eup %1943 }
 0x2e7   : > { %v917_v40 = vsel %vm892_vm3, %v1944_v39, 0.0 }
 0x2f3   : > { %918 = vadd.xlane.f32.xlu0 %v917_v40 }
 0x346   : > { %v898_v41 = vpop.xlane.xlu0 %897 }
 0x347   : > { %v906_v42 = vsub.f32 %v889_v25, %v898_v41 }
 0x349   : > { %v911_v43 = vmul.f32 1.442695, %v906_v42  ;;  %v1385_v42 = vld [vmem:[%s2413_s7 + $0x8] sm:$0xff] }
 0x34a   : > { %v904_v44 = vpop.xlane.xlu1 %903 }
 0x34b   : > { %1945 = vpow2.f32 %v911_v43  ;;  %v901_v45 = vpop.xlane.xlu0 %900  ;;  %v908_v46 = vsub.f32 %v891_v30, %v904_v44  ;;  %v1387_v44 = vld [vmem:[%s2413_s7 + $0x18] sm:$0xff] }
 0x34c   : > { %v907_v47 = vsub.f32 %v890_v32, %v901_v45 }
 0x34d   : > { %v915_v48 = vmul.f32 1.442695, %v908_v46  ;;  %v1469_v46 = vld [vmem:[%s2415_s9] sm:$0xff] }
 0x34e   : > { %v913_v49 = vmul.f32 1.442695, %v907_v47  ;;  %v1021_v50 = vpop.permute.xlu1 %1020  ;;  %v1470_v47 = vld [vmem:[%s2415_s9 + $0x8] sm:$0xff] }
 0x34f   : > { %1947 = vpow2.f32 %v915_v48  ;;  %v942_v51 = vpop.permute.xlu0 %941  ;;  %1808 = vmatpush3.msk.msra.mxu1 %vm947_vm4, %v1021_v50  ;;  %v1471_v48 = vld [vmem:[%s2415_s9 + $0x10] sm:$0xff]  ;;  %v1472_v50 = vld [vmem:[%s2415_s9 + $0x18] sm:$0xff] }
 0x350   : > { %1949 = vpow2.f32 %v913_v49  ;;  %1803 = vmatpush3.msk.msra.mxu0 %vm947_vm4, %v942_v51  ;;  %1817 = vmatprep.subr.mxu1 %v2031_v6  ;;  %v1882_v49 = vpack.c.bf16 %v1470_v47, %v1469_v46  ;;  %v1885_v51 = vpack.c.bf16 %v1472_v50, %v1471_v48 }
 0x351   : > { %1812 = vmatprep.subr.mxu0 %v2031_v6 }
 0x355   : > { %v1946_v52 = vpop.eup %1945 }
 0x356   : > { %v920_v53 = vsel %vm892_vm3, %v1946_v52, 0.0 }
 0x357   : > { %921 = vadd.xlane.f32.xlu1 %v920_v53  ;;  %v1474_v53 = vld [vmem:[%s2415_s9 + $0x28] sm:$0xff] }
 0x359   : > { %v1948_v54 = vpop.eup %1947 }
 0x35a   : > { %v1950_v55 = vpop.eup %1949  ;;  %v926_v56 = vsel %vm892_vm3, %v1948_v54, 0.0 }
 0x35b   : > { %v923_v57 = vsel %vm892_vm3, %v1950_v55, 0.0  ;;  %927 = vadd.xlane.f32.xlu1 %v926_v56 }
 0x35c   : > { %924 = vadd.xlane.f32.xlu0 %v923_v57 }
 0x36c   : > { %1097 = vrot.lane.b32.xlu1 %v2205_v16, %s2036_s20  ;;  %v1270_v16 = vld [vmem:[%s2434_s3 + $0x10] sm:$0xff] }
 0x36d   : > { %v1873_v18 = vpack.c.bf16 %v1271_v17, %v1270_v16 }
 0x372   : > { %1174 = vrot.lane.b32.xlu0 %v2203_v13, %s2036_s20  ;;  %v1870_v13 = vpack.c.bf16 %v1269_v12, %v1268_v11  ;;  %s1728_s20 = sshll.u32 %s2142_s22, 6  ;;  %s2040_s22 = smov [#allocation2]  }
 0x373   : > { %s2363_s3 = scalar_lea.hbm %s2421_s15, %s1728_s20 }
 0x380   : > { %v919_v58 = vpop.xlane.xlu0 %918 }
 0x381   : > { %1951 = vrcp.f32 %v919_v58 }
 0x38b   : > { %v1952_v59 = vpop.eup %1951 }
 0x38c   : > { %v937_v60 = vmul.f32 %v1952_v59, %v1944_v39  ;;  %v1717_v59 = vld [vmem:[%s2411_s5] ss:$0 sm:$0xff] }
 0x38e   : > { %1805 = vmatmul.mubr.msk.f32.vlgmr.msra.gmra.mrb[2].mxu0 %vm943_vm5, %v937_v60 }
 0x38f   : > { %1814 = vmatprep.mubr.msk.f32.mxu0 %vm2030_vm0, %v2031_v6 }
 0x3e4   : > { %v922_v61 = vpop.xlane.xlu1 %921 }
 0x3e5   : > { %1953 = vrcp.f32 %v922_v61  ;;  %v1718_v61 = vld [vmem:[%s2412_s6] ss:$0 sm:$0xff] }
 0x3e8   : > { %v928_v62 = vpop.xlane.xlu1 %927 }
 0x3e9   : > { %v925_v63 = vpop.xlane.xlu0 %924  ;;  %1955 = vrcp.f32 %v928_v62 }
 0x3ea   : > { %1957 = vrcp.f32 %v925_v63 }
 0x3ec   : > { %v1098_v0 = vpop.permute.xlu1 %1097 }
 0x3ed   : > { %1813 = vmatpush3.msk.msra.mxu0 %vm947_vm4, %v1098_v0  ;;  %v1175_v4 = vpop.permute.xlu0 %1174  ;;  %v1476_v0 = vld [vmem:[%s2415_s9 + $0x38] sm:$0xff] }
 0x3ee   : > { %1869 = vmatprep.subr.bf16.mxu0 %v2029_v3 }
 0x3ef   : > { %v1954_v1 = vpop.eup %1953 }
 0x3f0   : > { %v938_v2 = vmul.f32 %v1954_v1, %v1946_v52  ;;  %v1473_v52 = vld [vmem:[%s2415_s9 + $0x20] sm:$0xff] }
 0x3f2   : > { %1810 = vmatmul.mubr.msk.f32.vlgmr.msra.gmra.mrb[8].mxu1 %vm943_vm5, %v938_v2  ;;  %v1719_v2 = vld [vmem:[%s2414_s8] ss:$0 sm:$0xff] }
 0x3f3   : > { %v1956_v5 = vpop.eup %1955  ;;  %1818 = vmatpush3.msk.msra.mxu1 %vm947_vm4, %v1175_v4  ;;  %1819 = vmatprep.mubr.msk.f32.mxu1 %vm2030_vm0, %v2031_v6 }
 0x3f4   : > { %v1958_v7 = vpop.eup %1957  ;;  %v940_v9 = vmul.f32 %v1956_v5, %v1948_v54  ;;  %1875 = vmatprep.subr.bf16.mxu1 %v2029_v3  ;;  %v1888_v54 = vpack.c.bf16 %v1474_v53, %v1473_v52 }
 0x3f5   : > { %v939_v10 = vmul.f32 %v1958_v7, %v1950_v55 }
 0x3f6   : > { %1820 = vmatmul.mubr.msk.f32.vlgmr.msra.gmra.mrb[10].mxu1 %vm943_vm5, %v940_v9 }
 0x3f7   : > { %1815 = vmatmul.mubr.msk.f32.vlgmr.msra.gmra.mrb[4].mxu0 %vm943_vm5, %v939_v10  ;;  %1841 = vmatprep.mubr.msk.f32.mxu1 %vm2030_vm0, %v2031_v6  ;;  %v1721_v10 = vld [vmem:[%s2416_s10] ss:$0 sm:$0xff] }
 0x3f8   : > { %1830 = vmatprep.mubr.msk.f32.mxu0 %vm2030_vm0, %v2031_v6  ;;  %1871 = vmatpush3.bf16.msra.mxu0 %v1870_v13 }
 0x3f9   : > { %1872 = vmatprep.subr.bf16.mxu0 %v2029_v3 }
 0x3fc   : > { %1874 = vmatpush3.bf16.msra.mxu0 %v1873_v18 }
 0x3fd   : > { %1881 = vmatprep.subr.bf16.mxu0 %v2029_v3 }
 0x461   : > { %v1016_v14 = vpop.f32.mrb[2].mxu0 }
 0x462   : > { %v1806_v15 = vpop.f32.mrb[3].mxu0 }
 0x4c5   : > { %v1093_v19 = vpop.f32.mrb[8].mxu1 }
 0x4c6   : > { %1252 = vrot.lane.b32.xlu1 %v1093_v19, %s2037_s27  ;;  %v1811_v20 = vpop.f32.mrb[9].mxu1  ;;  %s485_s27 = scalar_lea.vmem [#allocation2], %s1695_s30  ;;  %s1969_s30 = sshll.u32 %s2040_s22, 4  ;;  %s1970_s30 = int_to_ptr.vmem [resolvable:$false] %s1969_s30 }
 0x4c7   : > { %s1971_s0 = scalar_lea.vmem %s1970_s30, 128 }
 0x4c9   : > { %v1247_v21 = vpop.f32.mrb[10].mxu1 }
 0x4ca   : > { %v1170_v22 = vpop.f32.mrb[4].mxu0  ;;  %1260 = vrot.lane.b32.xlu1 %v1247_v21, %s2038_s23  ;;  %v1821_v23 = vpop.f32.mrb[11].mxu1  ;;  %s1632_s23 = sshll.u32 %s485_s27, 4  ;;  %s2365_s23 = int_to_ptr.vmem [resolvable:$true] %s1632_s23 }
 0x4cb   : > { %1256 = vrot.lane.b32.xlu0 %v1170_v22, %s2039_s25  ;;  %v1816_v24 = vpop.f32.mrb[5].mxu0  ;;  %s1965_s17 = scalar_lea.vmem %s2365_s23, 64  ;;  %p1972_p0 = scmp.lt.s32.totalorder %s2365_s23, %s1970_s30 }
 0x4cc   : > { %p1966_p11 = scmp.ne.s32.totalorder %s2365_s23, %s1965_s17  ;;  %p1973_p1 = scmp.lt.s32.totalorder %s1971_s0, %s1965_s17 }
 0x4ce   : > { %p1967_p12 = pnand %p1966_p11, %p2159_p5  ;;  %p1974_p2 = por %p1973_p1, %p1972_p0 }
 0x4d0   : > { %p1968_p13 = pneg %p1967_p12 }
 0x4d2   : > { %p1975_p3 = pnand %p1974_p2, %p1968_p13 }
 0x538   : > { %v1253_v25 = vpop.permute.xlu1 %1252 }
 0x539   : > { %v1263_v27 = vsel %vm585_vm2, %v1016_v14, %v1253_v25  ;;  %v1723_v25 = vld [vmem:[%s2417_s11] ss:$0 sm:$0xff] }
 0x53c   : > { %v1261_v26 = vpop.permute.xlu1 %1260 }
 0x53d   : > { %v1257_v28 = vpop.permute.xlu0 %1256 }
 0x53e   : > { %v1265_v29 = vsel %vm1264_vm6, %v1263_v27, %v1257_v28  ;;  %v1724_v27 = vld [vmem:[%s2418_s12] ss:$0 sm:$0xff] }
 0x53f   : > { %v1267_v30 = vsel %vm1266_vm7, %v1265_v29, %v1261_v26 }
 0x540   : > { %1831 = vmatmul.mubr.msk.f32.vlgmr.msra.gmra.mrb[6].mxu0 %vm502_vm1, %v1267_v30 }
 0x541   : > { %1860 = vmatprep.mubr.msk.f32.mxu0 %vm2030_vm0, %v2031_v6  ;;  %v1384_v6 = vld [vmem:[%s2413_s7] sm:$0xff]  ;;  %1883 = vmatpush3.bf16.msra.mxu0 %v1882_v49 }
 0x542   : > { %v1876_v43 = vpack.c.bf16 %v1385_v42, %v1384_v6  ;;  %1884 = vmatprep.subr.bf16.mxu0 %v2029_v3  ;;  %v1726_v6 = vld [vmem:[%s2420_s14] ss:$0 sm:$0xff] }
 0x544   : > { %1877 = vmatpush3.bf16.msra.mxu1 %v1876_v43 }
 0x545   : > { %1878 = vmatprep.subr.bf16.mxu1 %v2029_v3  ;;  %1886 = vmatpush3.bf16.msra.mxu0 %v1885_v51 }
 0x546   : > { %1887 = vmatprep.subr.bf16.mxu0 %v2029_v3 }
 0x549   : > { %1889 = vmatpush3.bf16.msra.mxu0 %v1888_v54 }
 0x54a   : > { %1890 = vmatprep.subr.bf16.mxu0 %v2029_v3  ;;  %v1475_v3 = vld [vmem:[%s2415_s9 + $0x30] sm:$0xff] }
 0x54b   : > { %v1891_v1 = vpack.c.bf16 %v1476_v0, %v1475_v3 }
 0x54d   : > { %1892 = vmatpush3.bf16.msra.mxu0 %v1891_v1 }
 0x613   : > { %v1348_v32 = vpop.f32.mrb[6].mxu0 }
 0x614   : > { %v1349_v33 = vadd.f32 %v1715_v31, %v1348_v32  ;;  %v1832_v34 = vpop.f32.mrb[7].mxu0 }
 0x616   : > { %v1352_v35 = vadd.f32 %v1349_v33, %v2193_v8  ;;  %v1386_v8 = vld [vmem:[%s2413_s7 + $0x10] sm:$0xff] }
 0x617   : > { %v1879_v45 = vpack.c.bf16 %v1387_v44, %v1386_v8 }
 0x618   : > { %v1356_v36 = vsel %vm1355_vm8, %v1352_v35, 0.0 }
 0x619   : > { %1357 = vadd.xlane.f32.xlu0 %v1356_v36  ;;  %1880 = vmatpush3.bf16.msra.mxu1 %v1879_v45 }
 0x6a6   : > { %v1358_v37 = vpop.xlane.xlu0 %1357 }
 0x6a7   : > { %v1360_v38 = vmul.f32 0.03125, %v1358_v37 }
 0x6a9   : > { %v1361_v39 = vsub.f32 %v1352_v35, %v1360_v38 }
 0x6ab   : > { %v1362_v40 = vmul.f32 %v1361_v39, %v1361_v39 }
 0x6ad   : > { %v1363_v41 = vsel %vm1355_vm8, %v1362_v40, 0.0  ;;  %v1725_v40 = vld [vmem:[%s2419_s13] ss:$0 sm:$0xff] }
 0x6ae   : > { %1364 = vadd.xlane.f32.xlu1 %v1363_v41 }
 0x73b   : > { %v1365_v55 = vpop.xlane.xlu1 %1364 }
 0x73c   : > { %v1366_v56 = vmul.f32 0.03125, %v1365_v55 }
 0x73e   : > { %v1367_v57 = vadd.f32 1e-05, %v1366_v56 }
 0x740   : > { %1959 = vrsqrt.f32 %v1367_v57 }
 0x74a   : > { %v1960_v58 = vpop.eup %1959 }
 0x74b   : > { %v1369_v60 = vmul.f32 %v1960_v58, %v1361_v39 }
 0x74d   : > { %v1376_v62 = vmul.f32 %v1717_v59, %v1369_v60 }
 0x74f   : > { %v1383_v63 = vadd.f32 %v1718_v61, %v1376_v62 }
 0x751   : > { %1842 = vmatmul.mubr.msk.f32.vlgmr.msra.gmra.mrb[12].mxu1 %vm502_vm1, %v1383_v63 }
 0x824   : > { %v1464_v4 = vpop.f32.mrb[12].mxu1 }
 0x825   : > { %v1465_v5 = vadd.f32 %v1719_v2, %v1464_v4  ;;  %v1843_v7 = vpop.f32.mrb[13].mxu1 }
 0x827   : > { %v1468_v9 = vmax.f32 %v1465_v5, 0.0 }
 0x829   : > { %1861 = vmatmul.mubr.msk.f32.vlgmr.msra.gmra.mrb[8].mxu0 %vm1484_vm9, %v1468_v9 }
 0x8fc   : > { %v1554_v11 = vpop.f32.mrb[8].mxu0 }
 0x8fd   : > { %v1555_v12 = vadd.f32 %v1721_v10, %v1554_v11  ;;  %v1862_v13 = vpop.f32.mrb[9].mxu0 }
 0x8ff   : > { %v1558_v14 = vadd.f32 %v1555_v12, %v1383_v63 }
 0x901   : > { %v1561_v15 = vsel %vm1355_vm8, %v1558_v14, 0.0 }
 0x902   : > { %1562 = vadd.xlane.f32.xlu0 %v1561_v15 }
 0x98f   : > { %v1563_v16 = vpop.xlane.xlu0 %1562 }
 0x990   : > { %v1564_v17 = vmul.f32 0.03125, %v1563_v16 }
 0x992   : > { %v1565_v18 = vsub.f32 %v1558_v14, %v1564_v17 }
 0x994   : > { %v1566_v19 = vmul.f32 %v1565_v18, %v1565_v18 }
 0x996   : > { %v1567_v20 = vsel %vm1355_vm8, %v1566_v19, 0.0 }
 0x997   : > { %1568 = vadd.xlane.f32.xlu0 %v1567_v20 }
 0xa24   : > { %v1569_v21 = vpop.xlane.xlu0 %1568 }
 0xa25   : > { %v1570_v22 = vmul.f32 0.03125, %v1569_v21 }
 0xa27   : > { %v1571_v23 = vadd.f32 1e-05, %v1570_v22 }
 0xa29   : > { %1961 = vrsqrt.f32 %v1571_v23 }
 0xa33   : > { %v1962_v24 = vpop.eup %1961 }
 0xa34   : > { %v1573_v26 = vmul.f32 %v1962_v24, %v1565_v18 }
 0xa36   : > { %v1580_v28 = vmul.f32 %v1723_v25, %v1573_v26 }
 0xa38   : > { %v1587_v29 = vadd.f32 %v1724_v27, %v1580_v28 }
 0xa3a   : > { %v1590_v30 = vsel %vm1355_vm8, %v1587_v29, 0.0 }
 0xa3b   : > { %1591 = vadd.xlane.f32.xlu1 %v1590_v30 }
 0xac8   : > { %v1592_v31 = vpop.xlane.xlu1 %1591 }
 0xac9   : > { %v1593_v32 = vmul.f32 0.03125, %v1592_v31 }
 0xacb   : > { %v1594_v33 = vsub.f32 %v1587_v29, %v1593_v32 }
 0xacd   : > { %v1595_v34 = vmul.f32 %v1594_v33, %v1594_v33 }
 0xacf   : > { %v1596_v35 = vsel %vm1355_vm8, %v1595_v34, 0.0 }
 0xad0   : > { %1597 = vadd.xlane.f32.xlu0 %v1596_v35 }
 0xb5d   : > { %v1598_v36 = vpop.xlane.xlu0 %1597 }
 0xb5e   : > { %v1599_v37 = vmul.f32 0.03125, %v1598_v36 }
 0xb60   : > { %v1600_v38 = vadd.f32 1e-05, %v1599_v37 }
 0xb62   : > { %1963 = vrsqrt.f32 %v1600_v38 }
 0xb6c   : > { %v1964_v39 = vpop.eup %1963 }
 0xb6d   : > { %v1602_v41 = vmul.f32 %v1964_v39, %v1594_v33 }
 0xb6f   : > { %v1609_v42 = vmul.f32 %v1725_v40, %v1602_v41 }
 0xb71   : > { %v1616_v43 = vadd.f32 %v1726_v6, %v1609_v42 }
 0xb73   : > { %1617 = vst.msk [vmem:[%s485_s27] sm:$0xf] %vm1355_vm8, %v1616_v43 }
 0xb74   : > { %1978 = shalt.err (!%p1975_p3)
}
 0xb75   : > { %s1979_s2 = scalar_lea.hbm %s2363_s3, 64  ;;  %s1983_s20 = scalar_lea.hbm %s2421_s15, 128 }
 0xb76   : > { %p1980_p4 = scmp.ne.s32.totalorder %s2363_s3, %s1979_s2  ;;  %p1984_p9 = scmp.lt.u32.totalorder %s2363_s3, %s2421_s15 }
 0xb77   : > { %p1985_p10 = scmp.lt.u32.totalorder %s1983_s20, %s1979_s2  ;;  %p1987_p12 = scmp.lt.u32.totalorder %s1979_s2, %s2363_s3 }
 0xb78   : > { %p1981_p7 = pnand %p1980_p4, %p2159_p5 }
 0xb79   : > { %p1986_p11 = por %p1985_p10, %p1984_p9 }
 0xb7a   : > { %p1982_p8 = pneg %p1981_p7 }
 0xb7b   : > { %p1988_p13 = por %p1987_p12, %p1986_p11 }
 0xb7d   : > { %p1989_p0 = pnand %p1988_p13, %p1982_p8 }
 0xb7f   : > { %1992 = shalt.err (!%p1989_p0)
}
 0xb80   : > { %1893 = dma.vmem_to_hbm [thread:$0]  (%p2159_p5), %s2365_s23, 64, %s2363_s3, %s1619_s16  }
 0xb81 PF: > { %p1899_p1 = scmp.ge.s32.totalorder %s2027_s21, 2  ;;  %s1644_s17 = sand.u32 1, %s2015_s18  }
 0xb82   : > { %s1645_s22 = scalar_lea.sflag [#allocation3], %s1644_s17 }
 0xb83   : > { %p1896_p2 = pnand %p1899_p1, %p2163_p6 }
 0xb85   : > { %2010 = dma.done.wait (!%p1896_p2), %s1645_s22, 64  }
 0xb86   : > { %2012 = vsyncadd (!%p1896_p2), %s1645_s22, 4294967232  ;;  %s2435_s30 = sld [smem:[#allocation5_spill]]  ;;  %s2436_s20 = sld [smem:[#allocation6_spill]] }
 0xb87   : > { %p25_p3 = scmp.ge.s32.totalorder %s2146_s24, 4   ;;  %s2437_s18 = smov %s2019_s19 }
 0xb88   : > { %s2439_s21 = smov %s2146_s24 }
 0xb89   :  { %27 = sbr.rel (!%p25_p3) target bundleno = 8 (0x8), region = 115 }
 0xb8c   : > { %s2438_s19 = smov %s2435_s30 }
 0xb90   :  { %1650 = vsyncpa [#allocation3], 1 }
 0xb91   :  { %1652 = vsyncpa [#allocation3 + $0x1], 1 }

</bundles_post_ra>
